<compile_context>
chip_gen: v6e
topology: v6e:2x2x1
jax: 0.10.0
libtpu: 0.0.40
codegen_flags: <defaults>
</compile_context>

<pallas_src>
import jax
import jax.numpy as jnp
from jax.experimental import pallas as pl
from jax.experimental.pallas import tpu as pltpu

# ----------------------------- model sizes --------------------------------
B = 2                         # batch
C = 3                         # image channels
T = 2                         # num_frames
H = W = 16                    # spatial size
P = 8                         # patch size
NV = T * (H // P) * (W // P)  # visual tokens = 8
CPP = C * P * P               # flattened patch features = 192
DV = 32                       # vision_width (embed_dim)
DT = 32                       # text_width (hidden_size)   (packing assumes DV == DT)
NQ = 8                        # num_learnable_token (small)
NH = 4                        # num_heads
MLP_RATIO = 4
L = 8                         # text sequence length
S = NQ + L                    # decoder sequence length = 16
VOCAB = 128                   # vocab size (== MLP_RATIO*DT so it packs in the 128-wide slab)


# ----------------------- packed-parameter offset tables ----------------------
def _make_offsets(entries, align=8):
    table, off = {}, 0
    for name, rows in entries:
        table[name] = (off, rows)
        off += -(-rows // align) * align          # keep every slice sublane-aligned
    return table, off


W32_SLICES, W32_ROWS = _make_offsets([            # bf16 weights with 32 columns
    ('patch',     CPP),
    ('vis_attn',  4 * DV),
    ('vis_w2',    MLP_RATIO * DV),
    ('pool_attn', 4 * DV),
    ('pool_w2',   MLP_RATIO * DV),
    ('fc',        DV),
    ('dec_attn',  4 * DT),
    ('dec_w2',    MLP_RATIO * DT),
])
W128_SLICES, W128_ROWS = _make_offsets([          # bf16 weights with 128 columns
    ('vis_w1',  DV),
    ('pool_w1', DV),
    ('dec_w1',  DT),
    ('embT',    DT),                              # tied LM head, pre-transposed (DT, VOCAB)
])
P32_SLICES, P32_ROWS = _make_offsets([            # f32 LN gamma/beta + biases, 32 columns
    ('vis_ln', 6), ('vis_b', 5),
    ('pool_ln', 6), ('pool_b', 5),
    ('dec_ln', 6), ('dec_b', 5),
    ('fc_b', 1),
])
P128_SLICES, P128_ROWS = _make_offsets([          # f32 MLP hidden biases, 128 columns
    ('vis_b1', 1), ('pool_b1', 1), ('dec_b1', 1),
])


def _slab(ref, table, name):
    off, rows = table[name]
    return ref[off:off + rows, :]


# --------------------------- in-kernel helpers ------------------------------
def _mm(a, w):
    # MXU matmul: bf16 operands (weights are pre-cast bf16), f32 accumulation.
    return jnp.dot(a.astype(jnp.bfloat16), w, preferred_element_type=jnp.float32)


def _ln_rows(x, g, b, eps):
    # LayerNormWithForceFP32 over the last dim of an (M, D) slab.
    x = x.astype(jnp.float32)
    mu = jnp.mean(x, axis=-1, keepdims=True)
    var = jnp.mean((x - mu) ** 2, axis=-1, keepdims=True)
    return (x - mu) * jax.lax.rsqrt(var + eps) * g + b


def _attn(q, k, v, wo, bo, head_mask, bn, nq, nk, bias=None):
    """All-heads attention with NO per-head loop and NO sub-128 lane slicing.

    Row (h, q) of the masked query matrix only carries head h's feature chunk,
    so one full-D score matmul yields every per-head score; the per-row context
    then holds the valid result in head h's chunk, which head_mask re-selects.
    q already carries the 1/sqrt(head_dim) scale (folded into wq/bq)."""
    d = q.shape[-1]
    nh = head_mask.shape[0]
    qh = (q.reshape(bn, 1, nq, d) * head_mask.reshape(1, nh, 1, d)
          ).reshape(bn, nh * nq, d).astype(jnp.bfloat16)
    k3 = k.reshape(bn, nk, d).astype(jnp.bfloat16)
    v3 = v.reshape(bn, nk, d).astype(jnp.bfloat16)
    s = jnp.einsum('bqd,bkd->bqk', qh, k3,
                   preferred_element_type=jnp.float32)               # (bn, nh*nq, nk)
    if bias is not None:
        s = s + bias                                                 # single additive mask
    s = s - jnp.max(s, axis=-1, keepdims=True)
    p = jnp.exp(s)
    p = p * pl.reciprocal(jnp.sum(p, axis=-1, keepdims=True), approx=True)
    ctxh = jnp.einsum('bqk,bkd->bqd', p.astype(jnp.bfloat16), v3,
                      preferred_element_type=jnp.float32)            # (bn, nh*nq, d)
    # Re-select head h's chunk from row (h, q) and merge heads back into d.
    ctx = jnp.sum(ctxh.reshape(bn, nh, nq, d) * head_mask.reshape(1, nh, 1, d),
                  axis=1)                                            # (bn, nq, d)
    return _mm(ctx.reshape(bn * nq, d), wo) + bo


def _block(x, ln, w_attn, b, w1, b1, w2, head_mask, bn, n, eps, bias=None):
    """Pre-norm transformer block on a (bn*n, d) slab.
    w_attn rows: [wq*scale ; wk ; wv ; wo]  (sublane-aligned slices)
    b rows:      [bq*scale , bk , bv , bo , b_mlp2]"""
    d = x.shape[-1]
    h = _ln_rows(x, ln[0:1], ln[1:2], eps)
    q = _mm(h, w_attn[0 * d:1 * d]) + b[0:1]
    k = _mm(h, w_attn[1 * d:2 * d]) + b[1:2]
    v = _mm(h, w_attn[2 * d:3 * d]) + b[2:3]
    x = x + _attn(q, k, v, w_attn[3 * d:4 * d], b[3:4], head_mask, bn, n, n, bias)
    h2 = _ln_rows(x, ln[2:3], ln[3:4], eps)
    x = x + _mm(jax.nn.gelu(_mm(h2, w1) + b1), w2) + b[4:5]
    return x


# ----------------------------- fused kernel --------------------------------
def _fused_forward_kernel(
    # ---- data (prepared HBM-side in the wrapper) ----
    patches_ref,      # (B*NV, CPP) f32
    queries_ref,      # (B*NQ, DV)  f32  learnable queries, pre-broadcast
    txt_emb_ref,      # (B, L, DT)  f32  word-embedding gather done in JAX
    dec_bias_ref,     # (B, NH*S, S) f32 additive causal+key mask, head-expanded
    targets_ref,      # (B*S, 1) i32 CE targets
    loss_mask_ref,    # (B*S, 1) f32 CE loss mask
    head_mask_ref,    # (NH, DV) f32 0/1 head-selection mask
    vis_posb_ref,     # (B*NV, DV) f32 pos-emb + conv bias, pre-tiled
    # ---- packed parameters ----
    w32_ref,          # (W32_ROWS, 32)  bf16
    w128_ref,         # (W128_ROWS, 128) bf16
    p32_ref,          # (P32_ROWS, 32)  f32
    p128_ref,         # (P128_ROWS, 128) f32
    # ---- output ----
    loss_ref,         # (1, 1) f32
):
    head_mask = head_mask_ref[...]

    def w32(name): return _slab(w32_ref, W32_SLICES, name)
    def w128(name): return _slab(w128_ref, W128_SLICES, name)
    def p32(name): return _slab(p32_ref, P32_SLICES, name)
    def p128(name): return _slab(p128_ref, P128_SLICES, name)

    # ---------- visual encoder: patch-embed (+bias+pos folded) + block + LN ----
    x = _mm(patches_ref[...], w32('patch')) + vis_posb_ref[...]          # (B*NV, DV)
    vis_ln = p32('vis_ln')
    x = _block(x, vis_ln, w32('vis_attn'), p32('vis_b'),
               w128('vis_w1'), p128('vis_b1'), w32('vis_w2'),
               head_mask, B, NV, 1e-6)
    image_embeds = _ln_rows(x, vis_ln[4:5], vis_ln[5:6], 1e-6)           # (B*NV, DV)

    # ---------- AttentionPool over learnable queries (image_atts all ones) -----
    queries = queries_ref[...]                                           # (B*NQ, DV)
    pln = p32('pool_ln')
    pb = p32('pool_b')
    pw = w32('pool_attn')
    qn = _ln_rows(queries, pln[0:1], pln[1:2], 1e-6)
    kn = _ln_rows(image_embeds, pln[2:3], pln[3:4], 1e-6)
    q = _mm(qn, pw[0:DV]) + pb[0:1]                  # scale pre-folded into wq/bq
    k = _mm(kn, pw[DV:2 * DV]) + pb[1:2]
    v = _mm(kn, pw[2 * DV:3 * DV]) + pb[2:3]
    qres = queries + _attn(q, k, v, pw[3 * DV:4 * DV], pb[3:4],
                           head_mask, B, NQ, NV)
    q2 = _ln_rows(qres, pln[4:5], pln[5:6], 1e-6)
    image_query = qres + _mm(jax.nn.gelu(_mm(q2, w128('pool_w1')) + p128('pool_b1')),
                             w32('pool_w2')) + pb[4:5]

    # ---------- visual_fc (visual_norm == Identity: connect_ln default False) --
    query_features = _mm(image_query, w32('fc')) + p32('fc_b')           # (B*NQ, DT)

    # ---------- decoder input: [query_features ; word embeddings] --------------
    x = jnp.concatenate([query_features.reshape(B, NQ, DT), txt_emb_ref[...]],
                        axis=1).reshape(B * S, DT)

    # ---------- text decoder: causal block + final LN + tied LM head -----------
    dln = p32('dec_ln')
    x = _block(x, dln, w32('dec_attn'), p32('dec_b'),
               w128('dec_w1'), p128('dec_b1'), w32('dec_w2'),
               head_mask, B, S, 1e-5, bias=dec_bias_ref[...])
    hfin = _ln_rows(x, dln[4:5], dln[5:6], 1e-5)                         # (B*S, DT)
    logits = _mm(hfin, w128('embT'))                                     # (B*S, VOCAB)

    # ---------- masked cross entropy with integer targets (no one-hot) ---------
    m = jnp.max(logits, axis=-1, keepdims=True)
    lse = jnp.log(jnp.sum(jnp.exp(logits - m), axis=-1, keepdims=True)) + m
    vid = jax.lax.broadcasted_iota(jnp.int32, (B * S, VOCAB), 1)
    lbl = jnp.sum(jnp.where(vid == targets_ref[...], logits, 0.0),
                  axis=-1, keepdims=True)
    mask = loss_mask_ref[...]                                            # (B*S, 1)
    loss_sum = jnp.sum((lse - lbl) * mask)
    mask_sum = jnp.sum(mask)
    loss_ref[...] = jnp.reshape(loss_sum / jnp.maximum(mask_sum, 1.0), (1, 1))


# ----------------------------- JAX glue -------------------------------------
def image_to_patches(image):
    # (B, C, T, H, W) -> (B, T*nh*nw, C*P*P), channel-major per patch
    # (matches Conv2d(patch, stride=patch) weight reshaped to (C*P*P, embed_dim)).
    bn, cn, tn, hn, wn = image.shape
    x = image.reshape(bn, cn, tn, hn // P, P, wn // P, P)
    x = x.transpose(0, 2, 3, 5, 1, 4, 6)        # B, T, nh, nw, C, P, P
    return x.reshape(bn, tn * (hn // P) * (wn // P), cn * P * P)


def _pack_rows(table, total_rows, width, pieces, dtype):
    out = jnp.zeros((total_rows, width), jnp.float32)
    for name, arr in pieces.items():
        off, rows = table[name]
        out = out.at[off:off + rows, :].set(
            jnp.asarray(arr, jnp.float32).reshape(rows, width))
    return out.astype(dtype)


def init_params(key):
    keys = jax.random.split(key, 32)
    it = iter(keys)

    def nrm(shape, std=0.015):   # trunc_normal_(std=...) approximated by normal
        return jax.random.normal(next(it), shape, jnp.float32) * std

    def ln_rows(num_pairs, d):   # rows: [gamma, beta] * num_pairs
        rows = []
        for _ in range(num_pairs):
            rows.append(jnp.ones((1, d), jnp.float32))
            rows.append(jnp.zeros((1, d), jnp.float32))
        return jnp.concatenate(rows, axis=0)

    scale = float((DV // NH) ** -0.5)

    def block_weights(d):
        hid = MLP_RATIO * d
        wq, wk, wv, wo = nrm((d, d)), nrm((d, d)), nrm((d, d)), nrm((d, d))
        w1, w2 = nrm((d, hid)), nrm((hid, d))
        # 1/sqrt(head_dim) folded into the q projection (weight AND bias row 0),
        # matching the PyTorch in_proj [q;k;v] ordering.
        w_attn = jnp.concatenate([wq * scale, wk, wv, wo], axis=0)     # (4d, d)
        b = jnp.zeros((5, d), jnp.float32)   # rows: bq*scale, bk, bv, bo, b_mlp2
        b1 = jnp.zeros((1, hid), jnp.float32)
        return w_attn, w1, w2, b, b1

    patch_w = nrm((CPP, DV))
    patch_b = jnp.zeros((1, DV), jnp.float32)
    vis_pos = nrm((1, NV, DV))
    vis_w_attn, vis_w1, vis_w2, vis_b, vis_b1 = block_weights(DV)
    vis_ln = ln_rows(3, DV)                      # ln1, ln2, final-LN
    learnable_queries = nrm((1, NQ, DV))
    pool_w_attn, pool_w1, pool_w2, pool_b, pool_b1 = block_weights(DV)
    pool_ln = ln_rows(3, DV)                     # ln_q, ln_k, ln2
    fc_w = nrm((DV, DT))
    fc_b = jnp.zeros((1, DT), jnp.float32)
    emb = nrm((VOCAB, DT), std=0.02)
    dec_w_attn, dec_w1, dec_w2, dec_b, dec_b1 = block_weights(DT)
    dec_ln = ln_rows(3, DT)

    return {
        'emb': emb,                              # f32, used for the HBM-side gather
        'vis_pos': vis_pos,
        'patch_b': patch_b,
        'learnable_queries': learnable_queries,
        # packed slabs: bf16 matmul weights (pre-cast), f32 LN/bias rows
        'w32': _pack_rows(W32_SLICES, W32_ROWS, DV, {
            'patch': patch_w, 'vis_attn': vis_w_attn, 'vis_w2': vis_w2,
            'pool_attn': pool_w_attn, 'pool_w2': pool_w2, 'fc': fc_w,
            'dec_attn': dec_w_attn, 'dec_w2': dec_w2}, jnp.bfloat16),
        'w128': _pack_rows(W128_SLICES, W128_ROWS, MLP_RATIO * DV, {
            'vis_w1': vis_w1, 'pool_w1': pool_w1, 'dec_w1': dec_w1,
            'embT': emb.T}, jnp.bfloat16),       # tied LM head, pre-transposed
        'p32': _pack_rows(P32_SLICES, P32_ROWS, DV, {
            'vis_ln': vis_ln, 'vis_b': vis_b, 'pool_ln': pool_ln, 'pool_b': pool_b,
            'dec_ln': dec_ln, 'dec_b': dec_b, 'fc_b': fc_b}, jnp.float32),
        'p128': _pack_rows(P128_SLICES, P128_ROWS, MLP_RATIO * DV, {
            'vis_b1': vis_b1, 'pool_b1': pool_b1, 'dec_b1': dec_b1}, jnp.float32),
    }


def _flops_estimate():
    f = 2 * B * NV * CPP * DV                            # patch embed
    for (n_q, n_kv, d) in ((NV, NV, DV), (NQ, NV, DV), (S, S, DT)):
        f += 2 * B * (n_q + 2 * n_kv) * d * d            # q/k/v projections
        f += 2 * 2 * B * NH * n_q * n_kv * d             # scores + context
        f += 2 * B * n_q * d * d                         # output projection
        f += 2 * 2 * B * n_q * d * MLP_RATIO * d         # MLP
    f += 2 * B * NQ * DV * DT                            # visual_fc
    f += 2 * B * S * DT * VOCAB                          # tied LM head
    return f


def _transcendentals_estimate():
    t = B * NH * (NV * NV + NQ * NV + S * S)             # softmax exp
    t += B * (NV + NQ + S) * MLP_RATIO * DV              # gelu tanh
    t += B * S * (VOCAB + 1)                             # CE exp / log
    return t


@jax.jit
def forward(params, image, input_ids, attention_mask, prompt_lengths):
    bn = image.shape[0]

    # ----- plain-JAX glue (HBM-side): patches, gathers, masks, targets --------
    patches = image_to_patches(image).reshape(bn * NV, CPP)
    queries = jnp.broadcast_to(params['learnable_queries'],
                               (bn, NQ, DV)).reshape(bn * NQ, DV)
    txt_emb = jnp.take(params['emb'], input_ids, axis=0)                # (B, L, DT)
    vis_posb = jnp.broadcast_to(params['vis_pos'] + params['patch_b'][:, None, :],
                                (bn, NV, DV)).reshape(bn * NV, DV)

    # decoder key-padding + causal mask -> ONE additive bias, pre-expanded over heads
    query_atts = jnp.ones((bn, NQ), jnp.int32)
    attn_full = jnp.concatenate([query_atts, attention_mask], axis=1)   # (B, S)
    key_ok = attn_full[:, None, :] > 0                                  # (B, 1, S)
    pos = jnp.arange(S, dtype=jnp.int32)
    causal = (pos[None, :] <= pos[:, None])[None, :, :]                 # (1, S, S)
    bias = jnp.where(causal & key_ok, 0.0, -1e30).astype(jnp.float32)   # (B, S, S)
    dec_bias = jnp.broadcast_to(bias[:, None], (bn, NH, S, S)).reshape(bn, NH * S, S)

    # head-selection mask: head h <-> feature chunk [h*hd, (h+1)*hd)
    lane = jnp.arange(DV, dtype=jnp.int32)
    head_mask = (lane[None, :] // (DV // NH) ==
                 jnp.arange(NH, dtype=jnp.int32)[:, None]).astype(jnp.float32)

    # targets / loss mask (same shifting + prompt masking as the PyTorch module)
    targets = jnp.concatenate([input_ids[:, 1:], input_ids[:, 1:2]], axis=1)   # (B, L)
    text_loss_atts = attention_mask[:, 1:]                               # (B, L-1)
    tpos = jnp.arange(L - 1, dtype=jnp.int32)[None, :]
    text_loss_atts = jnp.where(tpos < prompt_lengths[:, None], 0, text_loss_atts)
    empty_targets = jnp.full((bn, NQ), 100, jnp.int32)
    targets = jnp.concatenate([empty_targets, targets], axis=1)          # (B, S)
    loss_mask = jnp.concatenate([1 - query_atts, text_loss_atts], axis=1)  # (B, S-1)
    # TODO(synk): DistributedGPT3 resolves the labels(S)/loss_mask(S-1) off-by-one
    # internally; pad with a trailing zero so the masked CE shapes line up.
    loss_mask = jnp.concatenate(
        [loss_mask, jnp.zeros((bn, 1), loss_mask.dtype)], axis=1)        # (B, S)

    args = (
        patches, queries, txt_emb, dec_bias,
        targets.reshape(bn * S, 1).astype(jnp.int32),
        loss_mask.reshape(bn * S, 1).astype(jnp.float32),
        head_mask, vis_posb,
        params['w32'], params['w128'], params['p32'], params['p128'],
    )
    bytes_accessed = int(sum(a.size * a.dtype.itemsize for a in args) + 4)
    cost = pl.CostEstimate(flops=_flops_estimate(),
                           transcendentals=_transcendentals_estimate(),
                           bytes_accessed=bytes_accessed)

    # Whole forward in ONE grid-less pallas_call: all weights + activations stay
    # resident in VMEM (<0.5 MiB); the only HBM output is the (1,1) loss scalar.
    # TODO(synk): on v7x (2 TCs/chip) a per-TensorCore batch split (grid=(B,),
    # dimension_semantics=("parallel",), per-program partial loss/mask sums) would
    # give ~2x; omitted because it only adds serial grid steps on 1-TC v5e/v6e.
    # TODO(synk): at real GPT-3/TimeSformer sizes switch to grid + BlockSpec weight
    # streaming and a vocab-tiled online-logsumexp CE (v7x VMEM is only 64 MiB).
    loss = pl.pallas_call(
        _fused_forward_kernel,
        out_shape=jax.ShapeDtypeStruct((1, 1), jnp.float32),
        cost_estimate=cost,
    )(*args)
    return loss[0, 0]


# ----------------------------- main ----------------------------------------
if __name__ == "__main__":
    key = jax.random.PRNGKey(0)
    pkey, ikey, tkey = jax.random.split(key, 3)

    params = init_params(pkey)
    image = jax.random.normal(ikey, (B, C, T, H, W), jnp.float32)
    input_ids = jax.random.randint(tkey, (B, L), 0, VOCAB, dtype=jnp.int32)
    attention_mask = jnp.array([[1] * L, [1] * (L - 1) + [0]], jnp.int32)
    prompt_lengths = jnp.array([2, 3], jnp.int32)

    loss = forward(params, image, input_ids, attention_mask, prompt_lengths)
    jax.block_until_ready(loss)
    assert jnp.isfinite(loss)
    print("KERNEL_OK")
</pallas_src>

<mosaic_0001>
module attributes {stable_mosaic.version = 11 : i64} {
  func.func @_fused_forward_kernel(%arg0: memref<16x192xf32, #tpu.memory_space<vmem>>, %arg1: memref<16x32xf32, #tpu.memory_space<vmem>>, %arg2: memref<2x8x32xf32, #tpu.memory_space<vmem>>, %arg3: memref<2x64x16xf32, #tpu.memory_space<vmem>>, %arg4: memref<32x1xi32, #tpu.memory_space<vmem>>, %arg5: memref<32x1xf32, #tpu.memory_space<vmem>>, %arg6: memref<4x32xf32, #tpu.memory_space<vmem>>, %arg7: memref<16x32xf32, #tpu.memory_space<vmem>>, %arg8: memref<992x32xbf16, #tpu.memory_space<vmem>>, %arg9: memref<128x128xbf16, #tpu.memory_space<vmem>>, %arg10: memref<56x32xf32, #tpu.memory_space<vmem>>, %arg11: memref<24x128xf32, #tpu.memory_space<vmem>>, %arg12: memref<1x1xf32, #tpu.memory_space<vmem>>) attributes {dimension_semantics = [], scalar_prefetch = 0 : i64, scratch_operands = 0 : i64, tpu.core_type = #tpu.core_type<tc>} {
    %c0 = arith.constant 0 : index
    %c0_0 = arith.constant 0 : index
    %0 = vector.load %arg6[%c0, %c0_0] : memref<4x32xf32, #tpu.memory_space<vmem>>, vector<4x32xf32>
    %c0_1 = arith.constant 0 : index
    %c0_2 = arith.constant 0 : index
    %1 = vector.load %arg0[%c0_1, %c0_2] : memref<16x192xf32, #tpu.memory_space<vmem>>, vector<16x192xf32>
    %c0_3 = arith.constant 0 : index
    %c0_4 = arith.constant 0 : index
    %2 = vector.load %arg8[%c0_3, %c0_4] : memref<992x32xbf16, #tpu.memory_space<vmem>>, vector<192x32xbf16>
    %3 = arith.truncf %1 : vector<16x192xf32> to vector<16x192xbf16>
    %cst = arith.constant dense<0.000000e+00> : vector<16x32xf32>
    %4 = tpu.matmul %3, %2, %cst {dimension_numbers = #tpu.dot_dimension_numbers<[1], [0], [0], [1], [0, 0, 1, 1], [], []>} : vector<16x192xbf16>, vector<192x32xbf16>, vector<16x32xf32> -> vector<16x32xf32>
    %c0_5 = arith.constant 0 : index
    %c0_6 = arith.constant 0 : index
    %5 = vector.load %arg7[%c0_5, %c0_6] : memref<16x32xf32, #tpu.memory_space<vmem>>, vector<16x32xf32>
    %6 = arith.addf %4, %5 : vector<16x32xf32>
    %c0_7 = arith.constant 0 : index
    %c0_8 = arith.constant 0 : index
    %7 = vector.load %arg10[%c0_7, %c0_8] : memref<56x32xf32, #tpu.memory_space<vmem>>, vector<6x32xf32>
    %c192 = arith.constant 192 : index
    %c0_9 = arith.constant 0 : index
    %8 = vector.load %arg8[%c192, %c0_9] : memref<992x32xbf16, #tpu.memory_space<vmem>>, vector<128x32xbf16>
    %c8 = arith.constant 8 : index
    %c0_10 = arith.constant 0 : index
    %9 = vector.load %arg10[%c8, %c0_10] : memref<56x32xf32, #tpu.memory_space<vmem>>, vector<5x32xf32>
    %c0_11 = arith.constant 0 : index
    %c0_12 = arith.constant 0 : index
    %10 = vector.load %arg9[%c0_11, %c0_12] : memref<128x128xbf16, #tpu.memory_space<vmem>>, vector<32x128xbf16>
    %c0_13 = arith.constant 0 : index
    %c0_14 = arith.constant 0 : index
    %11 = vector.load %arg11[%c0_13, %c0_14] : memref<24x128xf32, #tpu.memory_space<vmem>>, vector<1x128xf32>
    %c320 = arith.constant 320 : index
    %c0_15 = arith.constant 0 : index
    %12 = vector.load %arg8[%c320, %c0_15] : memref<992x32xbf16, #tpu.memory_space<vmem>>, vector<128x32xbf16>
    %13 = vector.extract_strided_slice %7 {offsets = [0, 0], sizes = [1, 32], strides = [1, 1]} : vector<6x32xf32> to vector<1x32xf32>
    %14 = vector.extract_strided_slice %7 {offsets = [1, 0], sizes = [1, 32], strides = [1, 1]} : vector<6x32xf32> to vector<1x32xf32>
    %cst_16 = arith.constant dense<0.000000e+00> : vector<16xf32>
    %15 = vector.multi_reduction <add>, %6, %cst_16 [1] : vector<16x32xf32> to vector<16xf32>
    %16 = vector.shape_cast %15 : vector<16xf32> to vector<16x1xf32>
    %cst_17 = arith.constant 3.200000e+01 : f32
    %17 = vector.broadcast %cst_17 : f32 to vector<16x1xf32>
    %18 = arith.divf %16, %17 : vector<16x1xf32>
    %19 = vector.broadcast %18 : vector<16x1xf32> to vector<16x32xf32>
    %20 = arith.subf %6, %19 : vector<16x32xf32>
    %21 = arith.mulf %20, %20 : vector<16x32xf32>
    %cst_18 = arith.constant dense<0.000000e+00> : vector<16xf32>
    %22 = vector.multi_reduction <add>, %21, %cst_18 [1] : vector<16x32xf32> to vector<16xf32>
    %23 = vector.shape_cast %22 : vector<16xf32> to vector<16x1xf32>
    %cst_19 = arith.constant 3.200000e+01 : f32
    %24 = vector.broadcast %cst_19 : f32 to vector<16x1xf32>
    %25 = arith.divf %23, %24 : vector<16x1xf32>
    %26 = vector.broadcast %18 : vector<16x1xf32> to vector<16x32xf32>
    %27 = arith.subf %6, %26 : vector<16x32xf32>
    %cst_20 = arith.constant 9.99999997E-7 : f32
    %28 = vector.broadcast %cst_20 : f32 to vector<16x1xf32>
    %29 = arith.addf %25, %28 : vector<16x1xf32>
    %30 = math.rsqrt %29 : vector<16x1xf32>
    %31 = vector.broadcast %30 : vector<16x1xf32> to vector<16x32xf32>
    %32 = arith.mulf %27, %31 : vector<16x32xf32>
    %33 = vector.broadcast %13 : vector<1x32xf32> to vector<16x32xf32>
    %34 = arith.mulf %32, %33 : vector<16x32xf32>
    %35 = vector.broadcast %14 : vector<1x32xf32> to vector<16x32xf32>
    %36 = arith.addf %34, %35 : vector<16x32xf32>
    %37 = vector.extract_strided_slice %8 {offsets = [0, 0], sizes = [32, 32], strides = [1, 1]} : vector<128x32xbf16> to vector<32x32xbf16>
    %38 = arith.truncf %36 : vector<16x32xf32> to vector<16x32xbf16>
    %cst_21 = arith.constant dense<0.000000e+00> : vector<16x32xf32>
    %39 = tpu.matmul %38, %37, %cst_21 {dimension_numbers = #tpu.dot_dimension_numbers<[1], [0], [0], [1], [0, 0, 1, 1], [], []>} : vector<16x32xbf16>, vector<32x32xbf16>, vector<16x32xf32> -> vector<16x32xf32>
    %40 = vector.extract_strided_slice %9 {offsets = [0, 0], sizes = [1, 32], strides = [1, 1]} : vector<5x32xf32> to vector<1x32xf32>
    %41 = vector.broadcast %40 : vector<1x32xf32> to vector<16x32xf32>
    %42 = arith.addf %39, %41 : vector<16x32xf32>
    %43 = vector.extract_strided_slice %8 {offsets = [32, 0], sizes = [32, 32], strides = [1, 1]} : vector<128x32xbf16> to vector<32x32xbf16>
    %44 = arith.truncf %36 : vector<16x32xf32> to vector<16x32xbf16>
    %cst_22 = arith.constant dense<0.000000e+00> : vector<16x32xf32>
    %45 = tpu.matmul %44, %43, %cst_22 {dimension_numbers = #tpu.dot_dimension_numbers<[1], [0], [0], [1], [0, 0, 1, 1], [], []>} : vector<16x32xbf16>, vector<32x32xbf16>, vector<16x32xf32> -> vector<16x32xf32>
    %46 = vector.extract_strided_slice %9 {offsets = [1, 0], sizes = [1, 32], strides = [1, 1]} : vector<5x32xf32> to vector<1x32xf32>
    %47 = vector.broadcast %46 : vector<1x32xf32> to vector<16x32xf32>
    %48 = arith.addf %45, %47 : vector<16x32xf32>
    %49 = vector.extract_strided_slice %8 {offsets = [64, 0], sizes = [32, 32], strides = [1, 1]} : vector<128x32xbf16> to vector<32x32xbf16>
    %50 = arith.truncf %36 : vector<16x32xf32> to vector<16x32xbf16>
    %cst_23 = arith.constant dense<0.000000e+00> : vector<16x32xf32>
    %51 = tpu.matmul %50, %49, %cst_23 {dimension_numbers = #tpu.dot_dimension_numbers<[1], [0], [0], [1], [0, 0, 1, 1], [], []>} : vector<16x32xbf16>, vector<32x32xbf16>, vector<16x32xf32> -> vector<16x32xf32>
    %52 = vector.extract_strided_slice %9 {offsets = [2, 0], sizes = [1, 32], strides = [1, 1]} : vector<5x32xf32> to vector<1x32xf32>
    %53 = vector.broadcast %52 : vector<1x32xf32> to vector<16x32xf32>
    %54 = arith.addf %51, %53 : vector<16x32xf32>
    %55 = vector.extract_strided_slice %8 {offsets = [96, 0], sizes = [32, 32], strides = [1, 1]} : vector<128x32xbf16> to vector<32x32xbf16>
    %56 = vector.extract_strided_slice %9 {offsets = [3, 0], sizes = [1, 32], strides = [1, 1]} : vector<5x32xf32> to vector<1x32xf32>
    %57 = vector.shape_cast %42 : vector<16x32xf32> to vector<2x1x8x32xf32>
    %58 = vector.shape_cast %0 : vector<4x32xf32> to vector<1x4x1x32xf32>
    %59 = vector.broadcast %57 : vector<2x1x8x32xf32> to vector<2x4x8x32xf32>
    %60 = vector.broadcast %58 : vector<1x4x1x32xf32> to vector<2x4x8x32xf32>
    %61 = arith.mulf %59, %60 : vector<2x4x8x32xf32>
    %62 = vector.shape_cast %61 : vector<2x4x8x32xf32> to vector<2x32x32xf32>
    %63 = arith.truncf %62 : vector<2x32x32xf32> to vector<2x32x32xbf16>
    %64 = vector.shape_cast %48 : vector<16x32xf32> to vector<2x8x32xf32>
    %65 = arith.truncf %64 : vector<2x8x32xf32> to vector<2x8x32xbf16>
    %66 = vector.shape_cast %54 : vector<16x32xf32> to vector<2x8x32xf32>
    %67 = arith.truncf %66 : vector<2x8x32xf32> to vector<2x8x32xbf16>
    "tpu.trace_start"() <{level = 10 : i32, message = "bqd,bkd->bqk"}> : () -> ()
    %cst_24 = arith.constant dense<0.000000e+00> : vector<2x32x8xf32>
    %68 = tpu.matmul %63, %65, %cst_24 {dimension_numbers = #tpu.dot_dimension_numbers<[2], [2], [1], [1], [0, 0, 0, 1, 1, 1], [0], [0]>} : vector<2x32x32xbf16>, vector<2x8x32xbf16>, vector<2x32x8xf32> -> vector<2x32x8xf32>
    "tpu.trace_stop"() : () -> ()
    %cst_25 = arith.constant dense<0xFF800000> : vector<2x32xf32>
    %69 = vector.multi_reduction <maximumf>, %68, %cst_25 [2] : vector<2x32x8xf32> to vector<2x32xf32>
    %70 = vector.shape_cast %69 : vector<2x32xf32> to vector<2x32x1xf32>
    %71 = vector.broadcast %70 : vector<2x32x1xf32> to vector<2x32x8xf32>
    %72 = arith.subf %68, %71 : vector<2x32x8xf32>
    %73 = math.exp %72 : vector<2x32x8xf32>
    %cst_26 = arith.constant dense<0.000000e+00> : vector<2x32xf32>
    %74 = vector.multi_reduction <add>, %73, %cst_26 [2] : vector<2x32x8xf32> to vector<2x32xf32>
    %75 = vector.shape_cast %74 : vector<2x32xf32> to vector<2x32x1xf32>
    %76 = tpu.reciprocal %75 {approx = true} : vector<2x32x1xf32> -> vector<2x32x1xf32>
    %77 = vector.broadcast %76 : vector<2x32x1xf32> to vector<2x32x8xf32>
    %78 = arith.mulf %73, %77 : vector<2x32x8xf32>
    %79 = arith.truncf %78 : vector<2x32x8xf32> to vector<2x32x8xbf16>
    "tpu.trace_start"() <{level = 10 : i32, message = "bqk,bkd->bqd"}> : () -> ()
    %cst_27 = arith.constant dense<0.000000e+00> : vector<2x32x32xf32>
    %80 = tpu.matmul %79, %67, %cst_27 {dimension_numbers = #tpu.dot_dimension_numbers<[2], [1], [1], [2], [0, 0, 0, 1, 1, 2], [0], [0]>} : vector<2x32x8xbf16>, vector<2x8x32xbf16>, vector<2x32x32xf32> -> vector<2x32x32xf32>
    "tpu.trace_stop"() : () -> ()
    %81 = vector.shape_cast %80 : vector<2x32x32xf32> to vector<2x4x8x32xf32>
    %82 = vector.shape_cast %0 : vector<4x32xf32> to vector<1x4x1x32xf32>
    %83 = vector.broadcast %82 : vector<1x4x1x32xf32> to vector<2x4x8x32xf32>
    %84 = arith.mulf %81, %83 : vector<2x4x8x32xf32>
    %cst_28 = arith.constant dense<0.000000e+00> : vector<2x8x32xf32>
    %85 = vector.multi_reduction <add>, %84, %cst_28 [1] : vector<2x4x8x32xf32> to vector<2x8x32xf32>
    %86 = vector.shape_cast %85 : vector<2x8x32xf32> to vector<16x32xf32>
    %87 = arith.truncf %86 : vector<16x32xf32> to vector<16x32xbf16>
    %cst_29 = arith.constant dense<0.000000e+00> : vector<16x32xf32>
    %88 = tpu.matmul %87, %55, %cst_29 {dimension_numbers = #tpu.dot_dimension_numbers<[1], [0], [0], [1], [0, 0, 1, 1], [], []>} : vector<16x32xbf16>, vector<32x32xbf16>, vector<16x32xf32> -> vector<16x32xf32>
    %89 = vector.broadcast %56 : vector<1x32xf32> to vector<16x32xf32>
    %90 = arith.addf %88, %89 : vector<16x32xf32>
    %91 = arith.addf %6, %90 : vector<16x32xf32>
    %92 = vector.extract_strided_slice %7 {offsets = [2, 0], sizes = [1, 32], strides = [1, 1]} : vector<6x32xf32> to vector<1x32xf32>
    %93 = vector.extract_strided_slice %7 {offsets = [3, 0], sizes = [1, 32], strides = [1, 1]} : vector<6x32xf32> to vector<1x32xf32>
    %cst_30 = arith.constant dense<0.000000e+00> : vector<16xf32>
    %94 = vector.multi_reduction <add>, %91, %cst_30 [1] : vector<16x32xf32> to vector<16xf32>
    %95 = vector.shape_cast %94 : vector<16xf32> to vector<16x1xf32>
    %cst_31 = arith.constant 3.200000e+01 : f32
    %96 = vector.broadcast %cst_31 : f32 to vector<16x1xf32>
    %97 = arith.divf %95, %96 : vector<16x1xf32>
    %98 = vector.broadcast %97 : vector<16x1xf32> to vector<16x32xf32>
    %99 = arith.subf %91, %98 : vector<16x32xf32>
    %100 = arith.mulf %99, %99 : vector<16x32xf32>
    %cst_32 = arith.constant dense<0.000000e+00> : vector<16xf32>
    %101 = vector.multi_reduction <add>, %100, %cst_32 [1] : vector<16x32xf32> to vector<16xf32>
    %102 = vector.shape_cast %101 : vector<16xf32> to vector<16x1xf32>
    %cst_33 = arith.constant 3.200000e+01 : f32
    %103 = vector.broadcast %cst_33 : f32 to vector<16x1xf32>
    %104 = arith.divf %102, %103 : vector<16x1xf32>
    %105 = vector.broadcast %97 : vector<16x1xf32> to vector<16x32xf32>
    %106 = arith.subf %91, %105 : vector<16x32xf32>
    %cst_34 = arith.constant 9.99999997E-7 : f32
    %107 = vector.broadcast %cst_34 : f32 to vector<16x1xf32>
    %108 = arith.addf %104, %107 : vector<16x1xf32>
    %109 = math.rsqrt %108 : vector<16x1xf32>
    %110 = vector.broadcast %109 : vector<16x1xf32> to vector<16x32xf32>
    %111 = arith.mulf %106, %110 : vector<16x32xf32>
    %112 = vector.broadcast %92 : vector<1x32xf32> to vector<16x32xf32>
    %113 = arith.mulf %111, %112 : vector<16x32xf32>
    %114 = vector.broadcast %93 : vector<1x32xf32> to vector<16x32xf32>
    %115 = arith.addf %113, %114 : vector<16x32xf32>
    %116 = arith.truncf %115 : vector<16x32xf32> to vector<16x32xbf16>
    %cst_35 = arith.constant dense<0.000000e+00> : vector<16x128xf32>
    %117 = tpu.matmul %116, %10, %cst_35 {dimension_numbers = #tpu.dot_dimension_numbers<[1], [0], [0], [1], [0, 0, 1, 1], [], []>} : vector<16x32xbf16>, vector<32x128xbf16>, vector<16x128xf32> -> vector<16x128xf32>
    %118 = vector.broadcast %11 : vector<1x128xf32> to vector<16x128xf32>
    %119 = arith.addf %117, %118 : vector<16x128xf32>
    %120 = arith.mulf %119, %119 : vector<16x128xf32>
    %121 = arith.mulf %119, %120 : vector<16x128xf32>
    %cst_36 = arith.constant 4.471500e-02 : f32
    %122 = vector.broadcast %cst_36 : f32 to vector<16x128xf32>
    %123 = arith.mulf %122, %121 : vector<16x128xf32>
    %124 = arith.addf %119, %123 : vector<16x128xf32>
    %cst_37 = arith.constant 0.797884583 : f32
    %125 = vector.broadcast %cst_37 : f32 to vector<16x128xf32>
    %126 = arith.mulf %125, %124 : vector<16x128xf32>
    %127 = math.tanh %126 : vector<16x128xf32>
    %cst_38 = arith.constant 1.000000e+00 : f32
    %128 = vector.broadcast %cst_38 : f32 to vector<16x128xf32>
    %129 = arith.addf %128, %127 : vector<16x128xf32>
    %cst_39 = arith.constant 5.000000e-01 : f32
    %130 = vector.broadcast %cst_39 : f32 to vector<16x128xf32>
    %131 = arith.mulf %130, %129 : vector<16x128xf32>
    %132 = arith.mulf %119, %131 : vector<16x128xf32>
    %133 = arith.truncf %132 : vector<16x128xf32> to vector<16x128xbf16>
    %cst_40 = arith.constant dense<0.000000e+00> : vector<16x32xf32>
    %134 = tpu.matmul %133, %12, %cst_40 {dimension_numbers = #tpu.dot_dimension_numbers<[1], [0], [0], [1], [0, 0, 1, 1], [], []>} : vector<16x128xbf16>, vector<128x32xbf16>, vector<16x32xf32> -> vector<16x32xf32>
    %135 = arith.addf %91, %134 : vector<16x32xf32>
    %136 = vector.extract_strided_slice %9 {offsets = [4, 0], sizes = [1, 32], strides = [1, 1]} : vector<5x32xf32> to vector<1x32xf32>
    %137 = vector.broadcast %136 : vector<1x32xf32> to vector<16x32xf32>
    %138 = arith.addf %135, %137 : vector<16x32xf32>
    %139 = vector.extract_strided_slice %7 {offsets = [4, 0], sizes = [1, 32], strides = [1, 1]} : vector<6x32xf32> to vector<1x32xf32>
    %140 = vector.extract_strided_slice %7 {offsets = [5, 0], sizes = [1, 32], strides = [1, 1]} : vector<6x32xf32> to vector<1x32xf32>
    %cst_41 = arith.constant dense<0.000000e+00> : vector<16xf32>
    %141 = vector.multi_reduction <add>, %138, %cst_41 [1] : vector<16x32xf32> to vector<16xf32>
    %142 = vector.shape_cast %141 : vector<16xf32> to vector<16x1xf32>
    %cst_42 = arith.constant 3.200000e+01 : f32
    %143 = vector.broadcast %cst_42 : f32 to vector<16x1xf32>
    %144 = arith.divf %142, %143 : vector<16x1xf32>
    %145 = vector.broadcast %144 : vector<16x1xf32> to vector<16x32xf32>
    %146 = arith.subf %138, %145 : vector<16x32xf32>
    %147 = arith.mulf %146, %146 : vector<16x32xf32>
    %cst_43 = arith.constant dense<0.000000e+00> : vector<16xf32>
    %148 = vector.multi_reduction <add>, %147, %cst_43 [1] : vector<16x32xf32> to vector<16xf32>
    %149 = vector.shape_cast %148 : vector<16xf32> to vector<16x1xf32>
    %cst_44 = arith.constant 3.200000e+01 : f32
    %150 = vector.broadcast %cst_44 : f32 to vector<16x1xf32>
    %151 = arith.divf %149, %150 : vector<16x1xf32>
    %152 = vector.broadcast %144 : vector<16x1xf32> to vector<16x32xf32>
    %153 = arith.subf %138, %152 : vector<16x32xf32>
    %cst_45 = arith.constant 9.99999997E-7 : f32
    %154 = vector.broadcast %cst_45 : f32 to vector<16x1xf32>
    %155 = arith.addf %151, %154 : vector<16x1xf32>
    %156 = math.rsqrt %155 : vector<16x1xf32>
    %157 = vector.broadcast %156 : vector<16x1xf32> to vector<16x32xf32>
    %158 = arith.mulf %153, %157 : vector<16x32xf32>
    %159 = vector.broadcast %139 : vector<1x32xf32> to vector<16x32xf32>
    %160 = arith.mulf %158, %159 : vector<16x32xf32>
    %161 = vector.broadcast %140 : vector<1x32xf32> to vector<16x32xf32>
    %162 = arith.addf %160, %161 : vector<16x32xf32>
    %c0_46 = arith.constant 0 : index
    %c0_47 = arith.constant 0 : index
    %163 = vector.load %arg1[%c0_46, %c0_47] : memref<16x32xf32, #tpu.memory_space<vmem>>, vector<16x32xf32>
    %c16 = arith.constant 16 : index
    %c0_48 = arith.constant 0 : index
    %164 = vector.load %arg10[%c16, %c0_48] : memref<56x32xf32, #tpu.memory_space<vmem>>, vector<6x32xf32>
    %c24 = arith.constant 24 : index
    %c0_49 = arith.constant 0 : index
    %165 = vector.load %arg10[%c24, %c0_49] : memref<56x32xf32, #tpu.memory_space<vmem>>, vector<5x32xf32>
    %c448 = arith.constant 448 : index
    %c0_50 = arith.constant 0 : index
    %166 = vector.load %arg8[%c448, %c0_50] : memref<992x32xbf16, #tpu.memory_space<vmem>>, vector<128x32xbf16>
    %167 = vector.extract_strided_slice %164 {offsets = [0, 0], sizes = [1, 32], strides = [1, 1]} : vector<6x32xf32> to vector<1x32xf32>
    %168 = vector.extract_strided_slice %164 {offsets = [1, 0], sizes = [1, 32], strides = [1, 1]} : vector<6x32xf32> to vector<1x32xf32>
    %cst_51 = arith.constant dense<0.000000e+00> : vector<16xf32>
    %169 = vector.multi_reduction <add>, %163, %cst_51 [1] : vector<16x32xf32> to vector<16xf32>
    %170 = vector.shape_cast %169 : vector<16xf32> to vector<16x1xf32>
    %cst_52 = arith.constant 3.200000e+01 : f32
    %171 = vector.broadcast %cst_52 : f32 to vector<16x1xf32>
    %172 = arith.divf %170, %171 : vector<16x1xf32>
    %173 = vector.broadcast %172 : vector<16x1xf32> to vector<16x32xf32>
    %174 = arith.subf %163, %173 : vector<16x32xf32>
    %175 = arith.mulf %174, %174 : vector<16x32xf32>
    %cst_53 = arith.constant dense<0.000000e+00> : vector<16xf32>
    %176 = vector.multi_reduction <add>, %175, %cst_53 [1] : vector<16x32xf32> to vector<16xf32>
    %177 = vector.shape_cast %176 : vector<16xf32> to vector<16x1xf32>
    %cst_54 = arith.constant 3.200000e+01 : f32
    %178 = vector.broadcast %cst_54 : f32 to vector<16x1xf32>
    %179 = arith.divf %177, %178 : vector<16x1xf32>
    %180 = vector.broadcast %172 : vector<16x1xf32> to vector<16x32xf32>
    %181 = arith.subf %163, %180 : vector<16x32xf32>
    %cst_55 = arith.constant 9.99999997E-7 : f32
    %182 = vector.broadcast %cst_55 : f32 to vector<16x1xf32>
    %183 = arith.addf %179, %182 : vector<16x1xf32>
    %184 = math.rsqrt %183 : vector<16x1xf32>
    %185 = vector.broadcast %184 : vector<16x1xf32> to vector<16x32xf32>
    %186 = arith.mulf %181, %185 : vector<16x32xf32>
    %187 = vector.broadcast %167 : vector<1x32xf32> to vector<16x32xf32>
    %188 = arith.mulf %186, %187 : vector<16x32xf32>
    %189 = vector.broadcast %168 : vector<1x32xf32> to vector<16x32xf32>
    %190 = arith.addf %188, %189 : vector<16x32xf32>
    %191 = vector.extract_strided_slice %164 {offsets = [2, 0], sizes = [1, 32], strides = [1, 1]} : vector<6x32xf32> to vector<1x32xf32>
    %192 = vector.extract_strided_slice %164 {offsets = [3, 0], sizes = [1, 32], strides = [1, 1]} : vector<6x32xf32> to vector<1x32xf32>
    %cst_56 = arith.constant dense<0.000000e+00> : vector<16xf32>
    %193 = vector.multi_reduction <add>, %162, %cst_56 [1] : vector<16x32xf32> to vector<16xf32>
    %194 = vector.shape_cast %193 : vector<16xf32> to vector<16x1xf32>
    %cst_57 = arith.constant 3.200000e+01 : f32
    %195 = vector.broadcast %cst_57 : f32 to vector<16x1xf32>
    %196 = arith.divf %194, %195 : vector<16x1xf32>
    %197 = vector.broadcast %196 : vector<16x1xf32> to vector<16x32xf32>
    %198 = arith.subf %162, %197 : vector<16x32xf32>
    %199 = arith.mulf %198, %198 : vector<16x32xf32>
    %cst_58 = arith.constant dense<0.000000e+00> : vector<16xf32>
    %200 = vector.multi_reduction <add>, %199, %cst_58 [1] : vector<16x32xf32> to vector<16xf32>
    %201 = vector.shape_cast %200 : vector<16xf32> to vector<16x1xf32>
    %cst_59 = arith.constant 3.200000e+01 : f32
    %202 = vector.broadcast %cst_59 : f32 to vector<16x1xf32>
    %203 = arith.divf %201, %202 : vector<16x1xf32>
    %204 = vector.broadcast %196 : vector<16x1xf32> to vector<16x32xf32>
    %205 = arith.subf %162, %204 : vector<16x32xf32>
    %cst_60 = arith.constant 9.99999997E-7 : f32
    %206 = vector.broadcast %cst_60 : f32 to vector<16x1xf32>
    %207 = arith.addf %203, %206 : vector<16x1xf32>
    %208 = math.rsqrt %207 : vector<16x1xf32>
    %209 = vector.broadcast %208 : vector<16x1xf32> to vector<16x32xf32>
    %210 = arith.mulf %205, %209 : vector<16x32xf32>
    %211 = vector.broadcast %191 : vector<1x32xf32> to vector<16x32xf32>
    %212 = arith.mulf %210, %211 : vector<16x32xf32>
    %213 = vector.broadcast %192 : vector<1x32xf32> to vector<16x32xf32>
    %214 = arith.addf %212, %213 : vector<16x32xf32>
    %215 = vector.extract_strided_slice %166 {offsets = [0, 0], sizes = [32, 32], strides = [1, 1]} : vector<128x32xbf16> to vector<32x32xbf16>
    %216 = arith.truncf %190 : vector<16x32xf32> to vector<16x32xbf16>
    %cst_61 = arith.constant dense<0.000000e+00> : vector<16x32xf32>
    %217 = tpu.matmul %216, %215, %cst_61 {dimension_numbers = #tpu.dot_dimension_numbers<[1], [0], [0], [1], [0, 0, 1, 1], [], []>} : vector<16x32xbf16>, vector<32x32xbf16>, vector<16x32xf32> -> vector<16x32xf32>
    %218 = vector.extract_strided_slice %165 {offsets = [0, 0], sizes = [1, 32], strides = [1, 1]} : vector<5x32xf32> to vector<1x32xf32>
    %219 = vector.broadcast %218 : vector<1x32xf32> to vector<16x32xf32>
    %220 = arith.addf %217, %219 : vector<16x32xf32>
    %221 = vector.extract_strided_slice %166 {offsets = [32, 0], sizes = [32, 32], strides = [1, 1]} : vector<128x32xbf16> to vector<32x32xbf16>
    %222 = arith.truncf %214 : vector<16x32xf32> to vector<16x32xbf16>
    %cst_62 = arith.constant dense<0.000000e+00> : vector<16x32xf32>
    %223 = tpu.matmul %222, %221, %cst_62 {dimension_numbers = #tpu.dot_dimension_numbers<[1], [0], [0], [1], [0, 0, 1, 1], [], []>} : vector<16x32xbf16>, vector<32x32xbf16>, vector<16x32xf32> -> vector<16x32xf32>
    %224 = vector.extract_strided_slice %165 {offsets = [1, 0], sizes = [1, 32], strides = [1, 1]} : vector<5x32xf32> to vector<1x32xf32>
    %225 = vector.broadcast %224 : vector<1x32xf32> to vector<16x32xf32>
    %226 = arith.addf %223, %225 : vector<16x32xf32>
    %227 = vector.extract_strided_slice %166 {offsets = [64, 0], sizes = [32, 32], strides = [1, 1]} : vector<128x32xbf16> to vector<32x32xbf16>
    %228 = arith.truncf %214 : vector<16x32xf32> to vector<16x32xbf16>
    %cst_63 = arith.constant dense<0.000000e+00> : vector<16x32xf32>
    %229 = tpu.matmul %228, %227, %cst_63 {dimension_numbers = #tpu.dot_dimension_numbers<[1], [0], [0], [1], [0, 0, 1, 1], [], []>} : vector<16x32xbf16>, vector<32x32xbf16>, vector<16x32xf32> -> vector<16x32xf32>
    %230 = vector.extract_strided_slice %165 {offsets = [2, 0], sizes = [1, 32], strides = [1, 1]} : vector<5x32xf32> to vector<1x32xf32>
    %231 = vector.broadcast %230 : vector<1x32xf32> to vector<16x32xf32>
    %232 = arith.addf %229, %231 : vector<16x32xf32>
    %233 = vector.extract_strided_slice %166 {offsets = [96, 0], sizes = [32, 32], strides = [1, 1]} : vector<128x32xbf16> to vector<32x32xbf16>
    %234 = vector.extract_strided_slice %165 {offsets = [3, 0], sizes = [1, 32], strides = [1, 1]} : vector<5x32xf32> to vector<1x32xf32>
    %235 = vector.shape_cast %220 : vector<16x32xf32> to vector<2x1x8x32xf32>
    %236 = vector.shape_cast %0 : vector<4x32xf32> to vector<1x4x1x32xf32>
    %237 = vector.broadcast %235 : vector<2x1x8x32xf32> to vector<2x4x8x32xf32>
    %238 = vector.broadcast %236 : vector<1x4x1x32xf32> to vector<2x4x8x32xf32>
    %239 = arith.mulf %237, %238 : vector<2x4x8x32xf32>
    %240 = vector.shape_cast %239 : vector<2x4x8x32xf32> to vector<2x32x32xf32>
    %241 = arith.truncf %240 : vector<2x32x32xf32> to vector<2x32x32xbf16>
    %242 = vector.shape_cast %226 : vector<16x32xf32> to vector<2x8x32xf32>
    %243 = arith.truncf %242 : vector<2x8x32xf32> to vector<2x8x32xbf16>
    %244 = vector.shape_cast %232 : vector<16x32xf32> to vector<2x8x32xf32>
    %245 = arith.truncf %244 : vector<2x8x32xf32> to vector<2x8x32xbf16>
    "tpu.trace_start"() <{level = 10 : i32, message = "bqd,bkd->bqk"}> : () -> ()
    %cst_64 = arith.constant dense<0.000000e+00> : vector<2x32x8xf32>
    %246 = tpu.matmul %241, %243, %cst_64 {dimension_numbers = #tpu.dot_dimension_numbers<[2], [2], [1], [1], [0, 0, 0, 1, 1, 1], [0], [0]>} : vector<2x32x32xbf16>, vector<2x8x32xbf16>, vector<2x32x8xf32> -> vector<2x32x8xf32>
    "tpu.trace_stop"() : () -> ()
    %cst_65 = arith.constant dense<0xFF800000> : vector<2x32xf32>
    %247 = vector.multi_reduction <maximumf>, %246, %cst_65 [2] : vector<2x32x8xf32> to vector<2x32xf32>
    %248 = vector.shape_cast %247 : vector<2x32xf32> to vector<2x32x1xf32>
    %249 = vector.broadcast %248 : vector<2x32x1xf32> to vector<2x32x8xf32>
    %250 = arith.subf %246, %249 : vector<2x32x8xf32>
    %251 = math.exp %250 : vector<2x32x8xf32>
    %cst_66 = arith.constant dense<0.000000e+00> : vector<2x32xf32>
    %252 = vector.multi_reduction <add>, %251, %cst_66 [2] : vector<2x32x8xf32> to vector<2x32xf32>
    %253 = vector.shape_cast %252 : vector<2x32xf32> to vector<2x32x1xf32>
    %254 = tpu.reciprocal %253 {approx = true} : vector<2x32x1xf32> -> vector<2x32x1xf32>
    %255 = vector.broadcast %254 : vector<2x32x1xf32> to vector<2x32x8xf32>
    %256 = arith.mulf %251, %255 : vector<2x32x8xf32>
    %257 = arith.truncf %256 : vector<2x32x8xf32> to vector<2x32x8xbf16>
    "tpu.trace_start"() <{level = 10 : i32, message = "bqk,bkd->bqd"}> : () -> ()
    %cst_67 = arith.constant dense<0.000000e+00> : vector<2x32x32xf32>
    %258 = tpu.matmul %257, %245, %cst_67 {dimension_numbers = #tpu.dot_dimension_numbers<[2], [1], [1], [2], [0, 0, 0, 1, 1, 2], [0], [0]>} : vector<2x32x8xbf16>, vector<2x8x32xbf16>, vector<2x32x32xf32> -> vector<2x32x32xf32>
    "tpu.trace_stop"() : () -> ()
    %259 = vector.shape_cast %258 : vector<2x32x32xf32> to vector<2x4x8x32xf32>
    %260 = vector.shape_cast %0 : vector<4x32xf32> to vector<1x4x1x32xf32>
    %261 = vector.broadcast %260 : vector<1x4x1x32xf32> to vector<2x4x8x32xf32>
    %262 = arith.mulf %259, %261 : vector<2x4x8x32xf32>
    %cst_68 = arith.constant dense<0.000000e+00> : vector<2x8x32xf32>
    %263 = vector.multi_reduction <add>, %262, %cst_68 [1] : vector<2x4x8x32xf32> to vector<2x8x32xf32>
    %264 = vector.shape_cast %263 : vector<2x8x32xf32> to vector<16x32xf32>
    %265 = arith.truncf %264 : vector<16x32xf32> to vector<16x32xbf16>
    %cst_69 = arith.constant dense<0.000000e+00> : vector<16x32xf32>
    %266 = tpu.matmul %265, %233, %cst_69 {dimension_numbers = #tpu.dot_dimension_numbers<[1], [0], [0], [1], [0, 0, 1, 1], [], []>} : vector<16x32xbf16>, vector<32x32xbf16>, vector<16x32xf32> -> vector<16x32xf32>
    %267 = vector.broadcast %234 : vector<1x32xf32> to vector<16x32xf32>
    %268 = arith.addf %266, %267 : vector<16x32xf32>
    %269 = arith.addf %163, %268 : vector<16x32xf32>
    %270 = vector.extract_strided_slice %164 {offsets = [4, 0], sizes = [1, 32], strides = [1, 1]} : vector<6x32xf32> to vector<1x32xf32>
    %271 = vector.extract_strided_slice %164 {offsets = [5, 0], sizes = [1, 32], strides = [1, 1]} : vector<6x32xf32> to vector<1x32xf32>
    %cst_70 = arith.constant dense<0.000000e+00> : vector<16xf32>
    %272 = vector.multi_reduction <add>, %269, %cst_70 [1] : vector<16x32xf32> to vector<16xf32>
    %273 = vector.shape_cast %272 : vector<16xf32> to vector<16x1xf32>
    %cst_71 = arith.constant 3.200000e+01 : f32
    %274 = vector.broadcast %cst_71 : f32 to vector<16x1xf32>
    %275 = arith.divf %273, %274 : vector<16x1xf32>
    %276 = vector.broadcast %275 : vector<16x1xf32> to vector<16x32xf32>
    %277 = arith.subf %269, %276 : vector<16x32xf32>
    %278 = arith.mulf %277, %277 : vector<16x32xf32>
    %cst_72 = arith.constant dense<0.000000e+00> : vector<16xf32>
    %279 = vector.multi_reduction <add>, %278, %cst_72 [1] : vector<16x32xf32> to vector<16xf32>
    %280 = vector.shape_cast %279 : vector<16xf32> to vector<16x1xf32>
    %cst_73 = arith.constant 3.200000e+01 : f32
    %281 = vector.broadcast %cst_73 : f32 to vector<16x1xf32>
    %282 = arith.divf %280, %281 : vector<16x1xf32>
    %283 = vector.broadcast %275 : vector<16x1xf32> to vector<16x32xf32>
    %284 = arith.subf %269, %283 : vector<16x32xf32>
    %cst_74 = arith.constant 9.99999997E-7 : f32
    %285 = vector.broadcast %cst_74 : f32 to vector<16x1xf32>
    %286 = arith.addf %282, %285 : vector<16x1xf32>
    %287 = math.rsqrt %286 : vector<16x1xf32>
    %288 = vector.broadcast %287 : vector<16x1xf32> to vector<16x32xf32>
    %289 = arith.mulf %284, %288 : vector<16x32xf32>
    %290 = vector.broadcast %270 : vector<1x32xf32> to vector<16x32xf32>
    %291 = arith.mulf %289, %290 : vector<16x32xf32>
    %292 = vector.broadcast %271 : vector<1x32xf32> to vector<16x32xf32>
    %293 = arith.addf %291, %292 : vector<16x32xf32>
    %c32 = arith.constant 32 : index
    %c0_75 = arith.constant 0 : index
    %294 = vector.load %arg9[%c32, %c0_75] : memref<128x128xbf16, #tpu.memory_space<vmem>>, vector<32x128xbf16>
    %295 = arith.truncf %293 : vector<16x32xf32> to vector<16x32xbf16>
    %cst_76 = arith.constant dense<0.000000e+00> : vector<16x128xf32>
    %296 = tpu.matmul %295, %294, %cst_76 {dimension_numbers = #tpu.dot_dimension_numbers<[1], [0], [0], [1], [0, 0, 1, 1], [], []>} : vector<16x32xbf16>, vector<32x128xbf16>, vector<16x128xf32> -> vector<16x128xf32>
    %c8_77 = arith.constant 8 : index
    %c0_78 = arith.constant 0 : index
    %297 = vector.load %arg11[%c8_77, %c0_78] : memref<24x128xf32, #tpu.memory_space<vmem>>, vector<1x128xf32>
    %298 = vector.broadcast %297 : vector<1x128xf32> to vector<16x128xf32>
    %299 = arith.addf %296, %298 : vector<16x128xf32>
    %300 = arith.mulf %299, %299 : vector<16x128xf32>
    %301 = arith.mulf %299, %300 : vector<16x128xf32>
    %cst_79 = arith.constant 4.471500e-02 : f32
    %302 = vector.broadcast %cst_79 : f32 to vector<16x128xf32>
    %303 = arith.mulf %302, %301 : vector<16x128xf32>
    %304 = arith.addf %299, %303 : vector<16x128xf32>
    %cst_80 = arith.constant 0.797884583 : f32
    %305 = vector.broadcast %cst_80 : f32 to vector<16x128xf32>
    %306 = arith.mulf %305, %304 : vector<16x128xf32>
    %307 = math.tanh %306 : vector<16x128xf32>
    %cst_81 = arith.constant 1.000000e+00 : f32
    %308 = vector.broadcast %cst_81 : f32 to vector<16x128xf32>
    %309 = arith.addf %308, %307 : vector<16x128xf32>
    %cst_82 = arith.constant 5.000000e-01 : f32
    %310 = vector.broadcast %cst_82 : f32 to vector<16x128xf32>
    %311 = arith.mulf %310, %309 : vector<16x128xf32>
    %312 = arith.mulf %299, %311 : vector<16x128xf32>
    %c576 = arith.constant 576 : index
    %c0_83 = arith.constant 0 : index
    %313 = vector.load %arg8[%c576, %c0_83] : memref<992x32xbf16, #tpu.memory_space<vmem>>, vector<128x32xbf16>
    %314 = arith.truncf %312 : vector<16x128xf32> to vector<16x128xbf16>
    %cst_84 = arith.constant dense<0.000000e+00> : vector<16x32xf32>
    %315 = tpu.matmul %314, %313, %cst_84 {dimension_numbers = #tpu.dot_dimension_numbers<[1], [0], [0], [1], [0, 0, 1, 1], [], []>} : vector<16x128xbf16>, vector<128x32xbf16>, vector<16x32xf32> -> vector<16x32xf32>
    %316 = arith.addf %269, %315 : vector<16x32xf32>
    %317 = vector.extract_strided_slice %165 {offsets = [4, 0], sizes = [1, 32], strides = [1, 1]} : vector<5x32xf32> to vector<1x32xf32>
    %318 = vector.broadcast %317 : vector<1x32xf32> to vector<16x32xf32>
    %319 = arith.addf %316, %318 : vector<16x32xf32>
    %c704 = arith.constant 704 : index
    %c0_85 = arith.constant 0 : index
    %320 = vector.load %arg8[%c704, %c0_85] : memref<992x32xbf16, #tpu.memory_space<vmem>>, vector<32x32xbf16>
    %321 = arith.truncf %319 : vector<16x32xf32> to vector<16x32xbf16>
    %cst_86 = arith.constant dense<0.000000e+00> : vector<16x32xf32>
    %322 = tpu.matmul %321, %320, %cst_86 {dimension_numbers = #tpu.dot_dimension_numbers<[1], [0], [0], [1], [0, 0, 1, 1], [], []>} : vector<16x32xbf16>, vector<32x32xbf16>, vector<16x32xf32> -> vector<16x32xf32>
    %c48 = arith.constant 48 : index
    %c0_87 = arith.constant 0 : index
    %323 = vector.load %arg10[%c48, %c0_87] : memref<56x32xf32, #tpu.memory_space<vmem>>, vector<1x32xf32>
    %324 = vector.broadcast %323 : vector<1x32xf32> to vector<16x32xf32>
    %325 = arith.addf %322, %324 : vector<16x32xf32>
    %326 = vector.shape_cast %325 : vector<16x32xf32> to vector<2x8x32xf32>
    %c0_88 = arith.constant 0 : index
    %c0_89 = arith.constant 0 : index
    %c0_90 = arith.constant 0 : index
    %327 = vector.load %arg2[%c0_88, %c0_89, %c0_90] : memref<2x8x32xf32, #tpu.memory_space<vmem>>, vector<2x8x32xf32>
    %328 = tpu.concatenate %326, %327 in 1 : vector<2x8x32xf32>, vector<2x8x32xf32> -> vector<2x16x32xf32>
    %329 = vector.shape_cast %328 : vector<2x16x32xf32> to vector<32x32xf32>
    %c32_91 = arith.constant 32 : index
    %c0_92 = arith.constant 0 : index
    %330 = vector.load %arg10[%c32_91, %c0_92] : memref<56x32xf32, #tpu.memory_space<vmem>>, vector<6x32xf32>
    %c736 = arith.constant 736 : index
    %c0_93 = arith.constant 0 : index
    %331 = vector.load %arg8[%c736, %c0_93] : memref<992x32xbf16, #tpu.memory_space<vmem>>, vector<128x32xbf16>
    %c40 = arith.constant 40 : index
    %c0_94 = arith.constant 0 : index
    %332 = vector.load %arg10[%c40, %c0_94] : memref<56x32xf32, #tpu.memory_space<vmem>>, vector<5x32xf32>
    %c64 = arith.constant 64 : index
    %c0_95 = arith.constant 0 : index
    %333 = vector.load %arg9[%c64, %c0_95] : memref<128x128xbf16, #tpu.memory_space<vmem>>, vector<32x128xbf16>
    %c16_96 = arith.constant 16 : index
    %c0_97 = arith.constant 0 : index
    %334 = vector.load %arg11[%c16_96, %c0_97] : memref<24x128xf32, #tpu.memory_space<vmem>>, vector<1x128xf32>
    %c864 = arith.constant 864 : index
    %c0_98 = arith.constant 0 : index
    %335 = vector.load %arg8[%c864, %c0_98] : memref<992x32xbf16, #tpu.memory_space<vmem>>, vector<128x32xbf16>
    %c0_99 = arith.constant 0 : index
    %c0_100 = arith.constant 0 : index
    %c0_101 = arith.constant 0 : index
    %336 = vector.load %arg3[%c0_99, %c0_100, %c0_101] : memref<2x64x16xf32, #tpu.memory_space<vmem>>, vector<2x64x16xf32>
    %337 = vector.extract_strided_slice %330 {offsets = [0, 0], sizes = [1, 32], strides = [1, 1]} : vector<6x32xf32> to vector<1x32xf32>
    %338 = vector.extract_strided_slice %330 {offsets = [1, 0], sizes = [1, 32], strides = [1, 1]} : vector<6x32xf32> to vector<1x32xf32>
    %cst_102 = arith.constant dense<0.000000e+00> : vector<32xf32>
    %339 = vector.multi_reduction <add>, %329, %cst_102 [1] : vector<32x32xf32> to vector<32xf32>
    %340 = vector.shape_cast %339 : vector<32xf32> to vector<32x1xf32>
    %cst_103 = arith.constant 3.200000e+01 : f32
    %341 = vector.broadcast %cst_103 : f32 to vector<32x1xf32>
    %342 = arith.divf %340, %341 : vector<32x1xf32>
    %343 = vector.broadcast %342 : vector<32x1xf32> to vector<32x32xf32>
    %344 = arith.subf %329, %343 : vector<32x32xf32>
    %345 = arith.mulf %344, %344 : vector<32x32xf32>
    %cst_104 = arith.constant dense<0.000000e+00> : vector<32xf32>
    %346 = vector.multi_reduction <add>, %345, %cst_104 [1] : vector<32x32xf32> to vector<32xf32>
    %347 = vector.shape_cast %346 : vector<32xf32> to vector<32x1xf32>
    %cst_105 = arith.constant 3.200000e+01 : f32
    %348 = vector.broadcast %cst_105 : f32 to vector<32x1xf32>
    %349 = arith.divf %347, %348 : vector<32x1xf32>
    %350 = vector.broadcast %342 : vector<32x1xf32> to vector<32x32xf32>
    %351 = arith.subf %329, %350 : vector<32x32xf32>
    %cst_106 = arith.constant 9.99999974E-6 : f32
    %352 = vector.broadcast %cst_106 : f32 to vector<32x1xf32>
    %353 = arith.addf %349, %352 : vector<32x1xf32>
    %354 = math.rsqrt %353 : vector<32x1xf32>
    %355 = vector.broadcast %354 : vector<32x1xf32> to vector<32x32xf32>
    %356 = arith.mulf %351, %355 : vector<32x32xf32>
    %357 = vector.broadcast %337 : vector<1x32xf32> to vector<32x32xf32>
    %358 = arith.mulf %356, %357 : vector<32x32xf32>
    %359 = vector.broadcast %338 : vector<1x32xf32> to vector<32x32xf32>
    %360 = arith.addf %358, %359 : vector<32x32xf32>
    %361 = vector.extract_strided_slice %331 {offsets = [0, 0], sizes = [32, 32], strides = [1, 1]} : vector<128x32xbf16> to vector<32x32xbf16>
    %362 = arith.truncf %360 : vector<32x32xf32> to vector<32x32xbf16>
    %cst_107 = arith.constant dense<0.000000e+00> : vector<32x32xf32>
    %363 = tpu.matmul %362, %361, %cst_107 {dimension_numbers = #tpu.dot_dimension_numbers<[1], [0], [0], [1], [0, 0, 1, 1], [], []>} : vector<32x32xbf16>, vector<32x32xbf16>, vector<32x32xf32> -> vector<32x32xf32>
    %364 = vector.extract_strided_slice %332 {offsets = [0, 0], sizes = [1, 32], strides = [1, 1]} : vector<5x32xf32> to vector<1x32xf32>
    %365 = vector.broadcast %364 : vector<1x32xf32> to vector<32x32xf32>
    %366 = arith.addf %363, %365 : vector<32x32xf32>
    %367 = vector.extract_strided_slice %331 {offsets = [32, 0], sizes = [32, 32], strides = [1, 1]} : vector<128x32xbf16> to vector<32x32xbf16>
    %368 = arith.truncf %360 : vector<32x32xf32> to vector<32x32xbf16>
    %cst_108 = arith.constant dense<0.000000e+00> : vector<32x32xf32>
    %369 = tpu.matmul %368, %367, %cst_108 {dimension_numbers = #tpu.dot_dimension_numbers<[1], [0], [0], [1], [0, 0, 1, 1], [], []>} : vector<32x32xbf16>, vector<32x32xbf16>, vector<32x32xf32> -> vector<32x32xf32>
    %370 = vector.extract_strided_slice %332 {offsets = [1, 0], sizes = [1, 32], strides = [1, 1]} : vector<5x32xf32> to vector<1x32xf32>
    %371 = vector.broadcast %370 : vector<1x32xf32> to vector<32x32xf32>
    %372 = arith.addf %369, %371 : vector<32x32xf32>
    %373 = vector.extract_strided_slice %331 {offsets = [64, 0], sizes = [32, 32], strides = [1, 1]} : vector<128x32xbf16> to vector<32x32xbf16>
    %374 = arith.truncf %360 : vector<32x32xf32> to vector<32x32xbf16>
    %cst_109 = arith.constant dense<0.000000e+00> : vector<32x32xf32>
    %375 = tpu.matmul %374, %373, %cst_109 {dimension_numbers = #tpu.dot_dimension_numbers<[1], [0], [0], [1], [0, 0, 1, 1], [], []>} : vector<32x32xbf16>, vector<32x32xbf16>, vector<32x32xf32> -> vector<32x32xf32>
    %376 = vector.extract_strided_slice %332 {offsets = [2, 0], sizes = [1, 32], strides = [1, 1]} : vector<5x32xf32> to vector<1x32xf32>
    %377 = vector.broadcast %376 : vector<1x32xf32> to vector<32x32xf32>
    %378 = arith.addf %375, %377 : vector<32x32xf32>
    %379 = vector.extract_strided_slice %331 {offsets = [96, 0], sizes = [32, 32], strides = [1, 1]} : vector<128x32xbf16> to vector<32x32xbf16>
    %380 = vector.extract_strided_slice %332 {offsets = [3, 0], sizes = [1, 32], strides = [1, 1]} : vector<5x32xf32> to vector<1x32xf32>
    %381 = vector.shape_cast %366 : vector<32x32xf32> to vector<2x1x16x32xf32>
    %382 = vector.shape_cast %0 : vector<4x32xf32> to vector<1x4x1x32xf32>
    %383 = vector.broadcast %381 : vector<2x1x16x32xf32> to vector<2x4x16x32xf32>
    %384 = vector.broadcast %382 : vector<1x4x1x32xf32> to vector<2x4x16x32xf32>
    %385 = arith.mulf %383, %384 : vector<2x4x16x32xf32>
    %386 = vector.shape_cast %385 : vector<2x4x16x32xf32> to vector<2x64x32xf32>
    %387 = arith.truncf %386 : vector<2x64x32xf32> to vector<2x64x32xbf16>
    %388 = vector.shape_cast %372 : vector<32x32xf32> to vector<2x16x32xf32>
    %389 = arith.truncf %388 : vector<2x16x32xf32> to vector<2x16x32xbf16>
    %390 = vector.shape_cast %378 : vector<32x32xf32> to vector<2x16x32xf32>
    %391 = arith.truncf %390 : vector<2x16x32xf32> to vector<2x16x32xbf16>
    "tpu.trace_start"() <{level = 10 : i32, message = "bqd,bkd->bqk"}> : () -> ()
    %cst_110 = arith.constant dense<0.000000e+00> : vector<2x64x16xf32>
    %392 = tpu.matmul %387, %389, %cst_110 {dimension_numbers = #tpu.dot_dimension_numbers<[2], [2], [1], [1], [0, 0, 0, 1, 1, 1], [0], [0]>} : vector<2x64x32xbf16>, vector<2x16x32xbf16>, vector<2x64x16xf32> -> vector<2x64x16xf32>
    "tpu.trace_stop"() : () -> ()
    %393 = arith.addf %392, %336 : vector<2x64x16xf32>
    %cst_111 = arith.constant dense<0xFF800000> : vector<2x64xf32>
    %394 = vector.multi_reduction <maximumf>, %393, %cst_111 [2] : vector<2x64x16xf32> to vector<2x64xf32>
    %395 = vector.shape_cast %394 : vector<2x64xf32> to vector<2x64x1xf32>
    %396 = vector.broadcast %395 : vector<2x64x1xf32> to vector<2x64x16xf32>
    %397 = arith.subf %393, %396 : vector<2x64x16xf32>
    %398 = math.exp %397 : vector<2x64x16xf32>
    %cst_112 = arith.constant dense<0.000000e+00> : vector<2x64xf32>
    %399 = vector.multi_reduction <add>, %398, %cst_112 [2] : vector<2x64x16xf32> to vector<2x64xf32>
    %400 = vector.shape_cast %399 : vector<2x64xf32> to vector<2x64x1xf32>
    %401 = tpu.reciprocal %400 {approx = true} : vector<2x64x1xf32> -> vector<2x64x1xf32>
    %402 = vector.broadcast %401 : vector<2x64x1xf32> to vector<2x64x16xf32>
    %403 = arith.mulf %398, %402 : vector<2x64x16xf32>
    %404 = arith.truncf %403 : vector<2x64x16xf32> to vector<2x64x16xbf16>
    "tpu.trace_start"() <{level = 10 : i32, message = "bqk,bkd->bqd"}> : () -> ()
    %cst_113 = arith.constant dense<0.000000e+00> : vector<2x64x32xf32>
    %405 = tpu.matmul %404, %391, %cst_113 {dimension_numbers = #tpu.dot_dimension_numbers<[2], [1], [1], [2], [0, 0, 0, 1, 1, 2], [0], [0]>} : vector<2x64x16xbf16>, vector<2x16x32xbf16>, vector<2x64x32xf32> -> vector<2x64x32xf32>
    "tpu.trace_stop"() : () -> ()
    %406 = vector.shape_cast %405 : vector<2x64x32xf32> to vector<2x4x16x32xf32>
    %407 = vector.shape_cast %0 : vector<4x32xf32> to vector<1x4x1x32xf32>
    %408 = vector.broadcast %407 : vector<1x4x1x32xf32> to vector<2x4x16x32xf32>
    %409 = arith.mulf %406, %408 : vector<2x4x16x32xf32>
    %cst_114 = arith.constant dense<0.000000e+00> : vector<2x16x32xf32>
    %410 = vector.multi_reduction <add>, %409, %cst_114 [1] : vector<2x4x16x32xf32> to vector<2x16x32xf32>
    %411 = vector.shape_cast %410 : vector<2x16x32xf32> to vector<32x32xf32>
    %412 = arith.truncf %411 : vector<32x32xf32> to vector<32x32xbf16>
    %cst_115 = arith.constant dense<0.000000e+00> : vector<32x32xf32>
    %413 = tpu.matmul %412, %379, %cst_115 {dimension_numbers = #tpu.dot_dimension_numbers<[1], [0], [0], [1], [0, 0, 1, 1], [], []>} : vector<32x32xbf16>, vector<32x32xbf16>, vector<32x32xf32> -> vector<32x32xf32>
    %414 = vector.broadcast %380 : vector<1x32xf32> to vector<32x32xf32>
    %415 = arith.addf %413, %414 : vector<32x32xf32>
    %416 = arith.addf %329, %415 : vector<32x32xf32>
    %417 = vector.extract_strided_slice %330 {offsets = [2, 0], sizes = [1, 32], strides = [1, 1]} : vector<6x32xf32> to vector<1x32xf32>
    %418 = vector.extract_strided_slice %330 {offsets = [3, 0], sizes = [1, 32], strides = [1, 1]} : vector<6x32xf32> to vector<1x32xf32>
    %cst_116 = arith.constant dense<0.000000e+00> : vector<32xf32>
    %419 = vector.multi_reduction <add>, %416, %cst_116 [1] : vector<32x32xf32> to vector<32xf32>
    %420 = vector.shape_cast %419 : vector<32xf32> to vector<32x1xf32>
    %cst_117 = arith.constant 3.200000e+01 : f32
    %421 = vector.broadcast %cst_117 : f32 to vector<32x1xf32>
    %422 = arith.divf %420, %421 : vector<32x1xf32>
    %423 = vector.broadcast %422 : vector<32x1xf32> to vector<32x32xf32>
    %424 = arith.subf %416, %423 : vector<32x32xf32>
    %425 = arith.mulf %424, %424 : vector<32x32xf32>
    %cst_118 = arith.constant dense<0.000000e+00> : vector<32xf32>
    %426 = vector.multi_reduction <add>, %425, %cst_118 [1] : vector<32x32xf32> to vector<32xf32>
    %427 = vector.shape_cast %426 : vector<32xf32> to vector<32x1xf32>
    %cst_119 = arith.constant 3.200000e+01 : f32
    %428 = vector.broadcast %cst_119 : f32 to vector<32x1xf32>
    %429 = arith.divf %427, %428 : vector<32x1xf32>
    %430 = vector.broadcast %422 : vector<32x1xf32> to vector<32x32xf32>
    %431 = arith.subf %416, %430 : vector<32x32xf32>
    %cst_120 = arith.constant 9.99999974E-6 : f32
    %432 = vector.broadcast %cst_120 : f32 to vector<32x1xf32>
    %433 = arith.addf %429, %432 : vector<32x1xf32>
    %434 = math.rsqrt %433 : vector<32x1xf32>
    %435 = vector.broadcast %434 : vector<32x1xf32> to vector<32x32xf32>
    %436 = arith.mulf %431, %435 : vector<32x32xf32>
    %437 = vector.broadcast %417 : vector<1x32xf32> to vector<32x32xf32>
    %438 = arith.mulf %436, %437 : vector<32x32xf32>
    %439 = vector.broadcast %418 : vector<1x32xf32> to vector<32x32xf32>
    %440 = arith.addf %438, %439 : vector<32x32xf32>
    %441 = arith.truncf %440 : vector<32x32xf32> to vector<32x32xbf16>
    %cst_121 = arith.constant dense<0.000000e+00> : vector<32x128xf32>
    %442 = tpu.matmul %441, %333, %cst_121 {dimension_numbers = #tpu.dot_dimension_numbers<[1], [0], [0], [1], [0, 0, 1, 1], [], []>} : vector<32x32xbf16>, vector<32x128xbf16>, vector<32x128xf32> -> vector<32x128xf32>
    %443 = vector.broadcast %334 : vector<1x128xf32> to vector<32x128xf32>
    %444 = arith.addf %442, %443 : vector<32x128xf32>
    %445 = arith.mulf %444, %444 : vector<32x128xf32>
    %446 = arith.mulf %444, %445 : vector<32x128xf32>
    %cst_122 = arith.constant 4.471500e-02 : f32
    %447 = vector.broadcast %cst_122 : f32 to vector<32x128xf32>
    %448 = arith.mulf %447, %446 : vector<32x128xf32>
    %449 = arith.addf %444, %448 : vector<32x128xf32>
    %cst_123 = arith.constant 0.797884583 : f32
    %450 = vector.broadcast %cst_123 : f32 to vector<32x128xf32>
    %451 = arith.mulf %450, %449 : vector<32x128xf32>
    %452 = math.tanh %451 : vector<32x128xf32>
    %cst_124 = arith.constant 1.000000e+00 : f32
    %453 = vector.broadcast %cst_124 : f32 to vector<32x128xf32>
    %454 = arith.addf %453, %452 : vector<32x128xf32>
    %cst_125 = arith.constant 5.000000e-01 : f32
    %455 = vector.broadcast %cst_125 : f32 to vector<32x128xf32>
    %456 = arith.mulf %455, %454 : vector<32x128xf32>
    %457 = arith.mulf %444, %456 : vector<32x128xf32>
    %458 = arith.truncf %457 : vector<32x128xf32> to vector<32x128xbf16>
    %cst_126 = arith.constant dense<0.000000e+00> : vector<32x32xf32>
    %459 = tpu.matmul %458, %335, %cst_126 {dimension_numbers = #tpu.dot_dimension_numbers<[1], [0], [0], [1], [0, 0, 1, 1], [], []>} : vector<32x128xbf16>, vector<128x32xbf16>, vector<32x32xf32> -> vector<32x32xf32>
    %460 = arith.addf %416, %459 : vector<32x32xf32>
    %461 = vector.extract_strided_slice %332 {offsets = [4, 0], sizes = [1, 32], strides = [1, 1]} : vector<5x32xf32> to vector<1x32xf32>
    %462 = vector.broadcast %461 : vector<1x32xf32> to vector<32x32xf32>
    %463 = arith.addf %460, %462 : vector<32x32xf32>
    %464 = vector.extract_strided_slice %330 {offsets = [4, 0], sizes = [1, 32], strides = [1, 1]} : vector<6x32xf32> to vector<1x32xf32>
    %465 = vector.extract_strided_slice %330 {offsets = [5, 0], sizes = [1, 32], strides = [1, 1]} : vector<6x32xf32> to vector<1x32xf32>
    %cst_127 = arith.constant dense<0.000000e+00> : vector<32xf32>
    %466 = vector.multi_reduction <add>, %463, %cst_127 [1] : vector<32x32xf32> to vector<32xf32>
    %467 = vector.shape_cast %466 : vector<32xf32> to vector<32x1xf32>
    %cst_128 = arith.constant 3.200000e+01 : f32
    %468 = vector.broadcast %cst_128 : f32 to vector<32x1xf32>
    %469 = arith.divf %467, %468 : vector<32x1xf32>
    %470 = vector.broadcast %469 : vector<32x1xf32> to vector<32x32xf32>
    %471 = arith.subf %463, %470 : vector<32x32xf32>
    %472 = arith.mulf %471, %471 : vector<32x32xf32>
    %cst_129 = arith.constant dense<0.000000e+00> : vector<32xf32>
    %473 = vector.multi_reduction <add>, %472, %cst_129 [1] : vector<32x32xf32> to vector<32xf32>
    %474 = vector.shape_cast %473 : vector<32xf32> to vector<32x1xf32>
    %cst_130 = arith.constant 3.200000e+01 : f32
    %475 = vector.broadcast %cst_130 : f32 to vector<32x1xf32>
    %476 = arith.divf %474, %475 : vector<32x1xf32>
    %477 = vector.broadcast %469 : vector<32x1xf32> to vector<32x32xf32>
    %478 = arith.subf %463, %477 : vector<32x32xf32>
    %cst_131 = arith.constant 9.99999974E-6 : f32
    %479 = vector.broadcast %cst_131 : f32 to vector<32x1xf32>
    %480 = arith.addf %476, %479 : vector<32x1xf32>
    %481 = math.rsqrt %480 : vector<32x1xf32>
    %482 = vector.broadcast %481 : vector<32x1xf32> to vector<32x32xf32>
    %483 = arith.mulf %478, %482 : vector<32x32xf32>
    %484 = vector.broadcast %464 : vector<1x32xf32> to vector<32x32xf32>
    %485 = arith.mulf %483, %484 : vector<32x32xf32>
    %486 = vector.broadcast %465 : vector<1x32xf32> to vector<32x32xf32>
    %487 = arith.addf %485, %486 : vector<32x32xf32>
    %c96 = arith.constant 96 : index
    %c0_132 = arith.constant 0 : index
    %488 = vector.load %arg9[%c96, %c0_132] : memref<128x128xbf16, #tpu.memory_space<vmem>>, vector<32x128xbf16>
    %489 = arith.truncf %487 : vector<32x32xf32> to vector<32x32xbf16>
    %cst_133 = arith.constant dense<0.000000e+00> : vector<32x128xf32>
    %490 = tpu.matmul %489, %488, %cst_133 {dimension_numbers = #tpu.dot_dimension_numbers<[1], [0], [0], [1], [0, 0, 1, 1], [], []>} : vector<32x32xbf16>, vector<32x128xbf16>, vector<32x128xf32> -> vector<32x128xf32>
    %cst_134 = arith.constant dense<0xFF800000> : vector<32xf32>
    %491 = vector.multi_reduction <maximumf>, %490, %cst_134 [1] : vector<32x128xf32> to vector<32xf32>
    %492 = vector.shape_cast %491 : vector<32xf32> to vector<32x1xf32>
    %493 = vector.broadcast %492 : vector<32x1xf32> to vector<32x128xf32>
    %494 = arith.subf %490, %493 : vector<32x128xf32>
    %495 = math.exp %494 : vector<32x128xf32>
    %cst_135 = arith.constant dense<0.000000e+00> : vector<32xf32>
    %496 = vector.multi_reduction <add>, %495, %cst_135 [1] : vector<32x128xf32> to vector<32xf32>
    %497 = vector.shape_cast %496 : vector<32xf32> to vector<32x1xf32>
    %498 = math.log %497 : vector<32x1xf32>
    %499 = arith.addf %498, %492 : vector<32x1xf32>
    %500 = tpu.iota {dimensions = array<i32: 1>} : vector<32x128xi32>
    %c0_136 = arith.constant 0 : index
    %c0_137 = arith.constant 0 : index
    %501 = vector.load %arg4[%c0_136, %c0_137] : memref<32x1xi32, #tpu.memory_space<vmem>>, vector<32x1xi32>
    %502 = vector.broadcast %501 : vector<32x1xi32> to vector<32x128xi32>
    %503 = arith.cmpi eq, %500, %502 : vector<32x128xi32>
    %cst_138 = arith.constant 0.000000e+00 : f32
    %504 = vector.broadcast %cst_138 : f32 to vector<32x128xf32>
    %505 = arith.select %503, %490, %504 : vector<32x128xi1>, vector<32x128xf32>
    %cst_139 = arith.constant dense<0.000000e+00> : vector<32xf32>
    %506 = vector.multi_reduction <add>, %505, %cst_139 [1] : vector<32x128xf32> to vector<32xf32>
    %507 = vector.shape_cast %506 : vector<32xf32> to vector<32x1xf32>
    %c0_140 = arith.constant 0 : index
    %c0_141 = arith.constant 0 : index
    %508 = vector.load %arg5[%c0_140, %c0_141] : memref<32x1xf32, #tpu.memory_space<vmem>>, vector<32x1xf32>
    %509 = arith.subf %499, %507 : vector<32x1xf32>
    %510 = arith.mulf %509, %508 : vector<32x1xf32>
    %511 = vector.shape_cast %510 : vector<32x1xf32> to vector<1x32x1xf32>
    %cst_142 = arith.constant dense<0.000000e+00> : vector<1xf32>
    %512 = vector.multi_reduction <add>, %511, %cst_142 [1, 2] : vector<1x32x1xf32> to vector<1xf32>
    %513 = vector.shape_cast %512 : vector<1xf32> to vector<1x1x1xf32>
    %514 = vector.extract %513[0, 0, 0] : f32 from vector<1x1x1xf32>
    %515 = vector.shape_cast %508 : vector<32x1xf32> to vector<1x32x1xf32>
    %cst_143 = arith.constant dense<0.000000e+00> : vector<1xf32>
    %516 = vector.multi_reduction <add>, %515, %cst_143 [1, 2] : vector<1x32x1xf32> to vector<1xf32>
    %517 = vector.shape_cast %516 : vector<1xf32> to vector<1x1x1xf32>
    %518 = vector.extract %517[0, 0, 0] : f32 from vector<1x1x1xf32>
    %cst_144 = arith.constant 1.000000e+00 : f32
    %519 = arith.maximumf %518, %cst_144 : f32
    %520 = arith.divf %514, %519 : f32
    %521 = vector.broadcast %520 : f32 to vector<1x1xf32>
    %c0_145 = arith.constant 0 : index
    %c0_146 = arith.constant 0 : index
    %522 = vector.load %arg12[%c0_145, %c0_146] : memref<1x1xf32, #tpu.memory_space<vmem>>, vector<1x1xf32>
    tpu.vector_store %arg12[%c0_145, %c0_146], %521 {strides = array<i32>} : memref<1x1xf32, #tpu.memory_space<vmem>>, vector<1x1xf32>,
    return
  }
}

</mosaic_0001>

<bundles_post_ra>
// kernel: forward.1
= control target key start
LH: loop header
LB: loop body
LE: loop exit
PB: predicated region body
PF: predicated region fallthrough
CT: control target
= control target key end

     0   :  { %v4594_v1 = vmov 0   ;;  %vm148_vm0 = vcmask 523264   ;;  %s5710_s0 = inlined_call_operand.vmem [shape: f32[16,192], index: 0, kind: input, shape index: {}]   ;;  %s5711_s1 = inlined_call_operand.vmem [shape: f32[16,32], index: 1, kind: input, shape index: {}]   ;;  %s5712_s2 = inlined_call_operand.vmem [shape: f32[2,8,32], index: 2, kind: input, shape index: {}]   ;;  %s5713_s3 = inlined_call_operand.vmem [shape: f32[2,64,16], index: 3, kind: input, shape index: {}]   ;;  %s5714_s4 = inlined_call_operand.vmem [shape: s32[32,1], index: 4, kind: input, shape index: {}]   ;;  %s5715_s5 = inlined_call_operand.vmem [shape: f32[32,1], index: 5, kind: input, shape index: {}]   ;;  %s5716_s6 = inlined_call_operand.vmem [shape: f32[4,32], index: 6, kind: input, shape index: {}]   ;;  %s5717_s7 = inlined_call_operand.vmem [shape: f32[16,32], index: 7, kind: input, shape index: {}]   ;;  %s5718_s8 = inlined_call_operand.vmem [shape: bf16[992,32], index: 8, kind: input, shape index: {}]   ;;  %s5719_s9 = inlined_call_operand.vmem [shape: bf16[128,128], index: 9, kind: input, shape index: {}]   ;;  %s5720_s10 = inlined_call_operand.vmem [shape: f32[56,32], index: 10, kind: input, shape index: {}]   ;;  %s5721_s11 = inlined_call_operand.vmem [shape: f32[24,128], index: 11, kind: input, shape index: {}]   ;;  %s5722_s12 = inlined_call_operand.hbm [shape: f32[1,1], index: 12, kind: output, shape index: {}]  }
   0x1   :  { %v4288_v0 = vld [vmem:[%s5718_s8 + $0x38] sm:$0xff]   ;;  %152 = vmatprep.subr.bf16.mxu0 %v4594_v1  ;;  %4287 = vset.pattern.permute.xlu1 %v4594_v1  ;;  %v4289_v2 = vld [vmem:[%s5718_s8 + $0x30] sm:$0xff]   ;;  %v4290_v3 = vld [vmem:[%s5718_s8 + $0x28] sm:$0xff]  }
   0x2   :  { %153 = vmatpush1.bf16.msra.mxu0 %v4288_v0  ;;  %4286 = vset.pattern.permute.xlu0 %v4594_v1  ;;  %v4291_v4 = vld [vmem:[%s5718_s8 + $0x20] sm:$0xff]   ;;  %v45_v5 = vld [vmem:[%s5710_s0 + $0x8] sm:$0xff]  ;;  %v47_v6 = vld [vmem:[%s5710_s0 + $0x18] sm:$0xff] }
   0x3   :  { %154 = vmatprep.subr.bf16.mxu0 %v4594_v1  ;;  %v4292_v7 = vld [vmem:[%s5718_s8 + $0x18] sm:$0xff]   ;;  %v73_v8 = vpack.c.bf16 %v47_v6, %v45_v5  ;;  %v4293_v9 = vld [vmem:[%s5718_s8 + $0x10] sm:$0xff]   ;;  %v4294_v10 = vld [vmem:[%s5718_s8 + $0x8] sm:$0xff]  }
   0x4   :  { %v4295_v11 = vld [vmem:[%s5718_s8] sm:$0xff]   ;;  %v4296_v12 = vld [vmem:[%s5718_s8 + $0x58] sm:$0xff]   ;;  %v4297_v13 = vld [vmem:[%s5718_s8 + $0x50] sm:$0xff]  }
   0x5   :  { %3732 = vmatprep.mubr.msk.bf16.mxu0 %vm148_vm0, %v73_v8  ;;  %v4298_v14 = vld [vmem:[%s5718_s8 + $0x48] sm:$0xff]   ;;  %v4299_v15 = vld [vmem:[%s5718_s8 + $0x40] sm:$0xff]   ;;  %v46_v17 = vld [vmem:[%s5710_s0 + $0x10] sm:$0xff] }
   0x6   :  { %155 = vmatpush1.bf16.msra.mxu0 %v4289_v2  ;;  %v44_v16 = vld [vmem:[%s5710_s0] sm:$0xff] }
   0x7   :  { %156 = vmatprep.subr.bf16.mxu0 %v4594_v1  ;;  %v72_v18 = vpack.c.bf16 %v46_v17, %v44_v16 }
   0xa   :  { %157 = vmatpush1.bf16.msra.mxu0 %v4290_v3 }
   0xb   :  { %158 = vmatprep.subr.bf16.mxu0 %v4594_v1 }
   0xe   :  { %159 = vmatpush1.bf16.msra.mxu0 %v4291_v4 }
   0xf   :  { %160 = vmatprep.subr.bf16.mxu0 %v4594_v1 }
  0x12   :  { %161 = vmatpush1.bf16.msra.mxu0 %v4292_v7 }
  0x13   :  { %162 = vmatprep.subr.bf16.mxu0 %v4594_v1 }
  0x16   :  { %163 = vmatpush1.bf16.msra.mxu0 %v4293_v9 }
  0x17   :  { %164 = vmatprep.subr.bf16.mxu0 %v4594_v1 }
  0x1a   :  { %165 = vmatpush1.bf16.msra.mxu0 %v4294_v10 }
  0x1b   :  { %166 = vmatprep.subr.bf16.mxu0 %v4594_v1 }
  0x1e   :  { %167 = vmatpush1.bf16.msra.mxu0 %v4295_v11 }
  0x1f   :  { %176 = vmatprep.subr.bf16.mxu0 %v4594_v1 }
  0x22   :  { %177 = vmatpush2.bf16.msra.mxu0 %v4296_v12 }
  0x23   :  { %178 = vmatprep.subr.bf16.mxu0 %v4594_v1 }
  0x26   :  { %179 = vmatpush2.bf16.msra.mxu0 %v4297_v13 }
  0x27   :  { %180 = vmatprep.subr.bf16.mxu0 %v4594_v1 }
  0x2a   :  { %181 = vmatpush2.bf16.msra.mxu0 %v4298_v14 }
  0x2b   :  { %182 = vmatprep.subr.bf16.mxu0 %v4594_v1 }
  0x2e   :  { %183 = vmatpush2.bf16.msra.mxu0 %v4299_v15 }
  0x31   :  { %185 = vmatmul.mubr.bf16.vlgmr.msra.gmra.mxu0 %v72_v18 }
  0x32   :  { %17 = vsyncpa [#allocation3], 0  ;;  %v74_v19 = vld [vmem:[%s5717_s7] sm:$0xff]  ;;  %vm232_vm1 = vcmask 261120   ;;  %v75_v23 = vld [vmem:[%s5717_s7 + $0x8] sm:$0xff]  ;;  %v4595_v40 = vmov 0.0   ;;  %v260_v48 = vlaneseq }
  0x33   :  { %v4300_v39 = vld [vmem:[%s5718_s8 + $0x68] sm:$0xff]   ;;  %3980 = vmatprep.subr.bf16.mxu1 %v4595_v40  ;;  %vm4596_vm2 = vmmov 0   ;;  %v4301_v41 = vld [vmem:[%s5718_s8 + $0x60] sm:$0xff]   ;;  %v4302_v63 = vld [vmem:[%s5718_s8 + $0x78] sm:$0xff]   ;;  %v4597_v4 = vmov 1966171168  }
  0x34   :  { %3984 = vmatprep.mubr.msk.bf16.mxu1 %vm4596_vm2, %v4595_v40  ;;  %3981 = vmatpush3.bf16.msra.mxu1 %v4300_v39  ;;  %v4743_v49 = vshrl.u32 %v260_v48, 7  ;;  %v4751_v51 = vld [vmem:[%s5720_s10] sm:$0x3f]  ;;  %v4303_v1 = vld [vmem:[%s5718_s8 + $0x70] sm:$0xff]   ;;  %v4304_v2 = vld [vmem:[%s5718_s8 + $0x88] sm:$0xff]   ;;  %v457_v5 = vunpack.c.l.s4 %v4597_v4  ;;  %vm723_vm3 = vcmask 1043456  }
  0x35   :  { %3982 = vmatprep.subr.bf16.mxu1 %v4595_v40  ;;  %v4305_v3 = vld [vmem:[%s5718_s8 + $0x80] sm:$0xff]   ;;  %v4789_v10 = vld [vmem:[%s5720_s10 + $0x8] sm:$0x1f]  ;;  %vm624_vm4 = vcmask 64512   ;;  %vm2690_vm5 = vcmask 130048   ;;  %vm3665_vm10 = vcmask 7168  }
  0x36   :  { %v4746_v50 = vsub.s32 0, %v4743_v49  ;;  %v4756_v55 = vsub.s32 1, %v4743_v49  ;;  %v458_v6 = vunpack.c.0.s8 %v457_v5  ;;  %v3742_v7 = vld.sshfl [vmem:[%s5716_s6] sm:$0x33 pattern:$0x75316420] }
  0x37   :  { %v455_v8 = vcombine.high %v3742_v7, %v3742_v7  ;;  %s4598_s6 = smov 1.0   ;;  %s4599_s20 = smov [#allocation2]   ;;  %vm3704_vm11 = vcmask 0  }
  0x38   :  { %3983 = vmatpush3.bf16.msra.mxu1 %v4301_v41  ;;  %v263_v54 = vrot.slane %v4751_v51, %v4746_v50  ;;  %v269_v59 = vrot.slane %v4751_v51, %v4756_v55  ;;  %v461_v9 = vsub.s32 %v458_v6, %v4743_v49  ;;  %v276_v13 = vrot.slane %v4789_v10, %v4746_v50  ;;  %s3712_s0 = sshll.u32 %s4599_s20, 4  ;;  %s3713_s0 = int_to_ptr.vmem [resolvable:$true] %s3712_s0 }
  0x39   :  { %3988 = vmatprep.subr.bf16.mxu1 %v4595_v40  ;;  %p4577_p1 = scmp.lt.s32.totalorder %s3713_s0, %s3713_s0 }
  0x3a   :  { %v462_v11 = vrot.slane %v3742_v7, %v461_v9  ;;  %v469_v12 = vrot.slane %v455_v8, %v461_v9 }
  0x3c   :  { %v4794_v14 = vrot.slane %v462_v11, %v4746_v50  ;;  %v4797_v15 = vrot.slane %v469_v12, %v4746_v50 }
  0xf1   :  { %v186_v20 = vpop.f32.mrf.mxu0 }
  0xf2   :  { %v4716_v21 = vadd.f32 %v186_v20, %v74_v19 }
  0xf3   :  { %v188_v22 = vpop.f32.mrf.mxu0 }
  0xf4   :  { %v233_v24 = vsel %vm232_vm1, %v4716_v21, 0.0 }
  0xf5   :  { %v189_v25 = vpop.f32.mrf.mxu0  ;;  %234 = vadd.xlane.f32.xlu0 %v233_v24  ;;  %v336_v24 = vrot.slane %v4789_v10, %v4756_v55 }
  0xf6   :  { %v4723_v26 = vadd.f32 %v189_v25, %v75_v23 }
  0xf7   :  { %v191_v27 = vpop.f32.mrf.mxu0 }
  0xf8   :  { %v236_v28 = vsel %vm232_vm1, %v4723_v26, 0.0  ;;  %v470_v27 = vcombine.high %v462_v11, %v462_v11 }
  0xf9   :  { %237 = vadd.xlane.f32.xlu0 %v236_v28  ;;  %v471_v28 = vcombine.high %v469_v12, %v469_v12 }
 0x17e   :  { %v235_v29 = vpop.xlane.xlu0 %234 }
 0x17f   :  { %v240_v30 = vmul.f32 0.03125, %v235_v29 }
 0x181   :  { %v242_v31 = vsub.f32 %v4716_v21, %v240_v30 }
 0x182   :  { %v238_v32 = vpop.xlane.xlu0 %237 }
 0x183   :  { %v241_v33 = vmul.f32 0.03125, %v238_v32  ;;  %v244_v34 = vmul.f32 %v242_v31, %v242_v31 }
 0x185   :  { %v243_v35 = vsub.f32 %v4723_v26, %v241_v33  ;;  %v246_v36 = vsel %vm232_vm1, %v244_v34, 0.0  ;;  %v4808_v33 = vrot.slane %v470_v27, %v4746_v50  ;;  %v4811_v34 = vrot.slane %v471_v28, %v4746_v50 }
 0x186   :  { %247 = vadd.xlane.f32.xlu1 %v246_v36 }
 0x187   :  { %v245_v37 = vmul.f32 %v243_v35, %v243_v35 }
 0x189   :  { %v249_v38 = vsel %vm232_vm1, %v245_v37, 0.0 }
 0x18a   :  { %250 = vadd.xlane.f32.xlu1 %v249_v38 }
 0x20f   :  { %v248_v42 = vpop.xlane.xlu1 %247 }
 0x210   :  { %v252_v43 = vmul.f32 0.03125, %v248_v42 }
 0x212   :  { %v254_v44 = vadd.f32 1e-06, %v252_v43 }
 0x213   :  { %v251_v45 = vpop.xlane.xlu1 %250 }
 0x214   :  { %4358 = vrsqrt.f32 %v254_v44  ;;  %v253_v46 = vmul.f32 0.03125, %v251_v45 }
 0x216   :  { %v255_v47 = vadd.f32 1e-06, %v253_v46 }
 0x218   :  { %4360 = vrsqrt.f32 %v255_v47 }
 0x221   :  { %v4359_v52 = vpop.eup %4358 }
 0x222   :  { %v258_v53 = vmul.f32 %v4359_v52, %v242_v31  ;;  %v4805_v31 = vsub.s32 2, %v4743_v49 }
 0x224   :  { %v264_v58 = vmul.f32 %v263_v54, %v258_v53  ;;  %v393_v41 = vrot.slane %v4789_v10, %v4805_v31 }
 0x225   :  { %v4361_v56 = vpop.eup %4360 }
 0x226   :  { %v259_v57 = vmul.f32 %v4361_v56, %v243_v35  ;;  %v270_v61 = vadd.f32 %v269_v59, %v264_v58 }
 0x228   :  { %v265_v60 = vmul.f32 %v263_v54, %v259_v57 }
 0x22a   :  { %v271_v62 = vadd.f32 %v269_v59, %v265_v60 }
 0x22c   :  { %v272_v0 = vpack.c.bf16 %v271_v62, %v270_v61 }
 0x22e   :  { %3985 = vmatmul.mubr.msk.bf16.vlgmr.msra.gmra.mxu1 %vm232_vm1, %v272_v0 }
 0x22f   :  { %3989 = vmatpush3.bf16.msra.mxu1 %v4302_v63  ;;  %3992 = vmatprep.mubr.msk.bf16.mxu1 %vm4596_vm2, %v4595_v40 }
 0x230   :  { %3990 = vmatprep.subr.bf16.mxu1 %v4595_v40 }
 0x233   :  { %3991 = vmatpush3.bf16.msra.mxu1 %v4303_v1 }
 0x234   :  { %3996 = vmatprep.subr.bf16.mxu1 %v4595_v40 }
 0x236   :  { %3993 = vmatmul.mubr.msk.bf16.vlgmr.msra.gmra.mxu1 %vm232_vm1, %v272_v0 }
 0x237   :  { %3997 = vmatpush3.bf16.msra.mxu1 %v4304_v2  ;;  %4000 = vmatprep.mubr.msk.bf16.mxu1 %vm4596_vm2, %v4595_v40 }
 0x238   :  { %3998 = vmatprep.subr.bf16.mxu1 %v4595_v40 }
 0x23b   :  { %3999 = vmatpush3.bf16.msra.mxu1 %v4305_v3 }
 0x23e   :  { %4001 = vmatmul.mubr.msk.bf16.vlgmr.msra.gmra.mxu1 %vm232_vm1, %v272_v0 }
 0x2ee   :  { %v326_v16 = vpop.f32.mrf.mxu1 }
 0x2ef   :  { %v327_v17 = vadd.f32 %v326_v16, %v276_v13 }
 0x2f0   :  { %v3986_v18 = vpop.f32.mrf.mxu1 }
 0x2f1   :  { %v492_v19 = vmul.f32 %v4794_v14, %v327_v17  ;;  %v493_v20 = vmul.f32 %v4797_v15, %v327_v17  ;;  %v494_v43 = vmul.f32 %v4808_v33, %v327_v17  ;;  %v495_v44 = vmul.f32 %v4811_v34, %v327_v17 }
 0x2f2   :  { %v329_v22 = vpop.f32.mrf.mxu1 }
 0x2f3   :  { %v500_v23 = vpack.c.bf16 %v493_v20, %v492_v19  ;;  %v330_v36 = vadd.f32 %v329_v22, %v276_v13  ;;  %v501_v56 = vpack.c.bf16 %v495_v44, %v494_v43 }
 0x2f4   :  { %v3987_v25 = vpop.f32.mrf.mxu1 }
 0x2f5   :  { %4006 = vmatprep.mubr.msk.bf16.mxu1 %vm232_vm1, %v500_v23  ;;  %v496_v46 = vmul.f32 %v4794_v14, %v330_v36  ;;  %v497_v47 = vmul.f32 %v4797_v15, %v330_v36  ;;  %v498_v63 = vmul.f32 %v4808_v33, %v330_v36  ;;  %v499_v0 = vmul.f32 %v4811_v34, %v330_v36 }
 0x2f6   :  { %v383_v29 = vpop.f32.mrf.mxu1 }
 0x2f7   :  { %v384_v30 = vadd.f32 %v383_v29, %v336_v24  ;;  %v502_v58 = vpack.c.bf16 %v497_v47, %v496_v46  ;;  %v503_v3 = vpack.c.bf16 %v499_v0, %v498_v63 }
 0x2f8   :  { %v3994_v32 = vpop.f32.mrf.mxu1 }
 0x2f9   :  { %v504_v35 = vpack.c.bf16 %v384_v30, %v384_v30 }
 0x2fa   :  { %v386_v37 = vpop.f32.mrf.mxu1 }
 0x2fb   :  { %v515_v38 = vsel %vm232_vm1, %v504_v35, 0  ;;  %v387_v39 = vadd.f32 %v386_v37, %v336_v24  ;;  %4264 = vmatprep.subr.msk.bf16.mxu1 %vm232_vm1, %v504_v35 }
 0x2fc   :  { %v3995_v42 = vpop.f32.mrf.mxu1  ;;  %4005 = vmatpush3.bf16.xpose.msra.mxu1 %v515_v38 }
 0x2fd   :  { %v505_v45 = vpack.c.bf16 %v387_v39, %v387_v39 }
 0x2fe   :  { %v440_v52 = vpop.f32.mrf.mxu1 }
 0x2ff   :  { %v441_v53 = vadd.f32 %v440_v52, %v393_v41  ;;  %4265 = vmatprep.subr.msk.bf16.mxu1 %vm232_vm1, %v505_v45  ;;  %v573_v59 = vsel %vm232_vm1, %v505_v45, 0 }
 0x300   :  { %v4002_v54 = vpop.f32.mrf.mxu1 }
 0x301   :  { %v506_v60 = vpack.c.bf16 %v441_v53, %v441_v53 }
 0x302   :  { %v443_v57 = vpop.f32.mrf.mxu1 }
 0x303   :  { %v444_v61 = vadd.f32 %v443_v57, %v393_v41  ;;  %4007 = vmatmul.mubr.msk.bf16.vlgmr.msra.gmra.mxu1 %vm232_vm1, %v501_v56  ;;  %v725_v4 = vsel %vm723_vm3, %v506_v60, 0 }
 0x304   :  { %v4003_v62 = vpop.f32.mrf.mxu1  ;;  %4011 = vmatpush3.bf16.xpose.msra.mxu1 %v573_v59  ;;  %4012 = vmatprep.mubr.msk.bf16.mxu1 %vm232_vm1, %v502_v58 }
 0x305   :  { %v507_v1 = vpack.c.bf16 %v444_v61, %v444_v61  ;;  %4266 = vmatprep.subr.msk.bf16.mxu1 %vm723_vm3, %v506_v60 }
 0x307   :  { %v783_v2 = vsel %vm723_vm3, %v507_v1, 0  ;;  %4267 = vmatprep.subr.msk.bf16.mxu0 %vm723_vm3, %v507_v1 }
 0x308   :  { %4023 = vmatpush3.bf16.msra.mxu0 %v783_v2 }
 0x309   :  { %4036 = vmatprep.subr.bf16.mxu0 %v4595_v40 }
 0x30b   :  { %4013 = vmatmul.mubr.msk.bf16.vlgmr.msra.gmra.mxu1 %vm232_vm1, %v503_v3 }
 0x30c   :  { %4017 = vmatpush3.bf16.msra.mxu1 %v725_v4 }
 0x30d   :  { %4028 = vmatprep.subr.bf16.mxu1 %v4595_v40 }
 0x3c3   :  { %v4008_v5 = vpop.f32.mrf.mxu1 }
 0x3c4   :  { %v631_v6 = vsel %vm624_vm4, %v4008_v5, -inf }
 0x3c5   :  { %632 = vmax.xlane.f32.xlu0 %v631_v6  ;;  %v551_v7 = vpop.f32.mrf.mxu1 }
 0x3c6   :  { %v625_v9 = vsel %vm624_vm4, %v551_v7, -inf }
 0x3c7   :  { %v4009_v8 = vpop.f32.mrf.mxu1 }
 0x3c8   :  { %v634_v11 = vsel %vm624_vm4, %v4009_v8, -inf }
 0x3c9   :  { %626 = vmax.xlane.f32.xlu0 %v625_v9  ;;  %635 = vmax.xlane.f32.xlu1 %v634_v11  ;;  %v554_v12 = vpop.f32.mrf.mxu1 }
 0x3ca   :  { %v628_v16 = vsel %vm624_vm4, %v554_v12, -inf }
 0x3cb   :  { %v4014_v13 = vpop.f32.mrf.mxu1 }
 0x3cc   :  { %v643_v22 = vsel %vm624_vm4, %v4014_v13, -inf }
 0x3cd   :  { %629 = vmax.xlane.f32.xlu1 %v628_v16  ;;  %v609_v17 = vpop.f32.mrf.mxu1 }
 0x3ce   :  { %v637_v18 = vsel %vm624_vm4, %v609_v17, -inf }
 0x3cf   :  { %638 = vmax.xlane.f32.xlu0 %v637_v18  ;;  %v4015_v19 = vpop.f32.mrf.mxu1 }
 0x3d0   :  { %v646_v24 = vsel %vm624_vm4, %v4015_v19, -inf }
 0x3d1   :  { %v612_v20 = vpop.f32.mrf.mxu1 }
 0x3d2   :  { %v640_v23 = vsel %vm624_vm4, %v612_v20, -inf }
 0x3d3   :  { %644 = vmax.xlane.f32.xlu0 %v643_v22  ;;  %641 = vmax.xlane.f32.xlu1 %v640_v23 }
 0x3d7   :  { %647 = vmax.xlane.f32.xlu1 %v646_v24 }
 0x44e   :  { %v633_v25 = vpop.xlane.xlu0 %632 }
 0x44f   :  { %v651_v27 = vsub.f32 %v4008_v5, %v633_v25 }
 0x451   :  { %v661_v28 = vmul.f32 1.442695, %v651_v27 }
 0x452   :  { %v627_v29 = vpop.xlane.xlu0 %626  ;;  %v636_v30 = vpop.xlane.xlu1 %635 }
 0x453   :  { %4362 = vpow2.f32 %v661_v28  ;;  %v649_v32 = vsub.f32 %v551_v7, %v627_v29  ;;  %v652_v35 = vsub.f32 %v4009_v8, %v636_v30 }
 0x455   :  { %v657_v36 = vmul.f32 1.442695, %v649_v32  ;;  %v663_v37 = vmul.f32 1.442695, %v652_v35 }
 0x456   :  { %v630_v38 = vpop.xlane.xlu1 %629 }
 0x457   :  { %4364 = vpow2.f32 %v657_v36  ;;  %v650_v39 = vsub.f32 %v554_v12, %v630_v38 }
 0x458   :  { %4366 = vpow2.f32 %v663_v37  ;;  %v639_v41 = vpop.xlane.xlu0 %638 }
 0x459   :  { %v659_v42 = vmul.f32 1.442695, %v650_v39  ;;  %v653_v43 = vsub.f32 %v609_v17, %v639_v41 }
 0x45b   :  { %4368 = vpow2.f32 %v659_v42  ;;  %v665_v44 = vmul.f32 1.442695, %v653_v43 }
 0x45c   :  { %v645_v45 = vpop.xlane.xlu0 %644  ;;  %v642_v46 = vpop.xlane.xlu1 %641 }
 0x45d   :  { %4370 = vpow2.f32 %v665_v44  ;;  %v655_v47 = vsub.f32 %v4014_v13, %v645_v45  ;;  %v654_v52 = vsub.f32 %v612_v20, %v642_v46 }
 0x45f   :  { %v669_v53 = vmul.f32 1.442695, %v655_v47  ;;  %v667_v54 = vmul.f32 1.442695, %v654_v52  ;;  %v4306_v52 = vld [vmem:[%s5718_s8 + $0x98] sm:$0xff]  }
 0x460   :  { %v4363_v56 = vpop.eup %4362  ;;  %v648_v57 = vpop.xlane.xlu1 %647 }
 0x461   :  { %4372 = vpow2.f32 %v669_v53  ;;  %v656_v58 = vsub.f32 %v4015_v19, %v648_v57  ;;  %v679_v59 = vsel %vm624_vm4, %v4363_v56, 0.0  ;;  %v4307_v53 = vld [vmem:[%s5718_s8 + $0x90] sm:$0xff]  }
 0x462   :  { %4374 = vpow2.f32 %v667_v54  ;;  %680 = vadd.xlane.f32.xlu0 %v679_v59 }
 0x463   :  { %v671_v60 = vmul.f32 1.442695, %v656_v58 }
 0x464   :  { %v4365_v61 = vpop.eup %4364 }
 0x465   :  { %v4367_v62 = vpop.eup %4366  ;;  %4376 = vpow2.f32 %v671_v60  ;;  %v673_v63 = vsel %vm624_vm4, %v4365_v61, 0.0 }
 0x466   :  { %674 = vadd.xlane.f32.xlu0 %v673_v63  ;;  %v682_v0 = vsel %vm624_vm4, %v4367_v62, 0.0 }
 0x467   :  { %683 = vadd.xlane.f32.xlu1 %v682_v0 }
 0x468   :  { %v4369_v1 = vpop.eup %4368 }
 0x469   :  { %v676_v2 = vsel %vm624_vm4, %v4369_v1, 0.0 }
 0x46a   :  { %v4371_v3 = vpop.eup %4370 }
 0x46b   :  { %677 = vadd.xlane.f32.xlu1 %v676_v2  ;;  %v685_v4 = vsel %vm624_vm4, %v4371_v3, 0.0 }
 0x46c   :  { %686 = vadd.xlane.f32.xlu0 %v685_v4 }
 0x46e   :  { %v4373_v5 = vpop.eup %4372 }
 0x46f   :  { %v4375_v6 = vpop.eup %4374  ;;  %v691_v7 = vsel %vm624_vm4, %v4373_v5, 0.0 }
 0x470   :  { %692 = vadd.xlane.f32.xlu0 %v691_v7  ;;  %v688_v8 = vsel %vm624_vm4, %v4375_v6, 0.0 }
 0x471   :  { %689 = vadd.xlane.f32.xlu1 %v688_v8 }
 0x472   :  { %v4377_v9 = vpop.eup %4376 }
 0x473   :  { %v694_v11 = vsel %vm624_vm4, %v4377_v9, 0.0 }
 0x475   :  { %695 = vadd.xlane.f32.xlu1 %v694_v11 }
 0x4eb   :  { %v681_v12 = vpop.xlane.xlu0 %680 }
 0x4ef   :  { %v675_v13 = vpop.xlane.xlu0 %674 }
 0x4f0   :  { %v684_v16 = vpop.xlane.xlu1 %683 }
 0x4f1   :  { %4378 = vrcp.f32 %v684_v16 }
 0x4f2   :  { %4380 = vrcp.f32 %v675_v13 }
 0x4f3   :  { %4382 = vrcp.f32 %v681_v12 }
 0x4f4   :  { %v678_v17 = vpop.xlane.xlu1 %677 }
 0x4f5   :  { %4384 = vrcp.f32 %v678_v17  ;;  %v687_v18 = vpop.xlane.xlu0 %686 }
 0x4f6   :  { %4386 = vrcp.f32 %v687_v18 }
 0x4f9   :  { %v693_v19 = vpop.xlane.xlu0 %692 }
 0x4fa   :  { %v690_v20 = vpop.xlane.xlu1 %689 }
 0x4fb   :  { %4388 = vrcp.f32 %v690_v20 }
 0x4fc   :  { %4390 = vrcp.f32 %v693_v19 }
 0x4fe   :  { %v696_v22 = vpop.xlane.xlu1 %695  ;;  %v4379_v23 = vpop.eup %4378 }
 0x4ff   :  { %4392 = vrcp.f32 %v696_v22  ;;  %v4381_v24 = vpop.eup %4380  ;;  %v708_v28 = vmul.f32 %v4379_v23, %v4367_v62 }
 0x500   :  { %v4383_v25 = vpop.eup %4382  ;;  %v705_v29 = vmul.f32 %v4381_v24, %v4365_v61 }
 0x501   :  { %v707_v32 = vmul.f32 %v4383_v25, %v4363_v56 }
 0x502   :  { %v4385_v27 = vpop.eup %4384 }
 0x503   :  { %v706_v30 = vmul.f32 %v4385_v27, %v4369_v1  ;;  %v4387_v36 = vpop.eup %4386  ;;  %v714_v37 = vpack.c.bf16 %v708_v28, %v707_v32  ;;  %v4886_v27 = vsub.s32 3, %v4743_v49 }
 0x504   :  { %v709_v39 = vmul.f32 %v4387_v36, %v4371_v3 }
 0x505   :  { %v713_v35 = vpack.c.bf16 %v706_v30, %v705_v29  ;;  %v860_v28 = vrot.slane %v4789_v10, %v4886_v27 }
 0x507   :  { %4018 = vmatprep.mubr.msk.bf16.mxu1 %vm624_vm4, %v713_v35 }
 0x508   :  { %v4389_v38 = vpop.eup %4388  ;;  %4019 = vmatmul.mubr.msk.bf16.vlgmr.msra.gmra.mxu1 %vm624_vm4, %v714_v37 }
 0x509   :  { %v710_v41 = vmul.f32 %v4389_v38, %v4375_v6  ;;  %4032 = vmatprep.mubr.msk.bf16.mxu1 %vm4596_vm2, %v4595_v40  ;;  %v4391_v42 = vpop.eup %4390  ;;  %4029 = vmatpush3.bf16.msra.mxu1 %v4306_v52 }
 0x50a   :  { %v711_v45 = vmul.f32 %v4391_v42, %v4373_v5  ;;  %4030 = vmatprep.subr.bf16.mxu1 %v4595_v40 }
 0x50b   :  { %v715_v43 = vpack.c.bf16 %v710_v41, %v709_v39 }
 0x50c   :  { %v4393_v44 = vpop.eup %4392 }
 0x50d   :  { %4024 = vmatprep.mubr.msk.bf16.mxu0 %vm624_vm4, %v715_v43  ;;  %v712_v46 = vmul.f32 %v4393_v44, %v4377_v9  ;;  %4031 = vmatpush3.bf16.msra.mxu1 %v4307_v53 }
 0x50e   :  { %4044 = vmatprep.subr.bf16.mxu1 %v4595_v40 }
 0x50f   :  { %v716_v47 = vpack.c.bf16 %v712_v46, %v711_v45 }
 0x511   :  { %4025 = vmatmul.mubr.msk.bf16.vlgmr.msra.gmra.mxu0 %vm624_vm4, %v716_v47 }
 0x512   :  { %4040 = vmatprep.mubr.msk.bf16.mxu0 %vm4596_vm2, %v4595_v40 }
 0x5c8   :  { %v4020_v54 = vpop.f32.mrf.mxu1 }
 0x5c9   :  { %v836_v0 = vmul.f32 %v4020_v54, %v4808_v33 }
 0x5ca   :  { %v761_v56 = vpop.f32.mrf.mxu1 }
 0x5cb   :  { %v834_v61 = vmul.f32 %v761_v56, %v4794_v14  ;;  %v845_v8 = vsel %vm232_vm1, %v836_v0, 0.0  ;;  %v4308_v56 = vld [vmem:[%s5719_s9 + $0x8] sm:$0xff]  }
 0x5cc   :  { %v4021_v57 = vpop.f32.mrf.mxu1  ;;  %4037 = vmatpush3.bf16.msra.mxu0 %v4308_v56 }
 0x5cd   :  { %v842_v2 = vsel %vm232_vm1, %v834_v61, 0.0  ;;  %v837_v9 = vmul.f32 %v4021_v57, %v4811_v34  ;;  %v4309_v57 = vld [vmem:[%s5719_s9] sm:$0xff]   ;;  %4038 = vmatprep.subr.bf16.mxu0 %v4595_v40 }
 0x5ce   :  { %v764_v58 = vpop.f32.mrf.mxu1 }
 0x5cf   :  { %v835_v59 = vmul.f32 %v764_v58, %v4797_v15  ;;  %v847_v20 = vsel %vm232_vm1, %v837_v9, 0.0 }
 0x5d0   :  { %4039 = vmatpush3.bf16.msra.mxu0 %v4309_v57 }
 0x5d1   :  { %v4026_v60 = vpop.f32.mrf.mxu0  ;;  %v843_v63 = vsel %vm232_vm1, %v835_v59, 0.0  ;;  %4064 = vmatprep.subr.bf16.mxu0 %v4595_v40 }
 0x5d2   :  { %v844_v4 = vadd.f32 %v843_v63, %v842_v2  ;;  %v840_v6 = vmul.f32 %v4026_v60, %v4808_v33  ;;  %v948_v2 = vrot.slane %v4751_v51, %v4805_v31 }
 0x5d3   :  { %v819_v62 = vpop.f32.mrf.mxu0 }
 0x5d4   :  { %v838_v3 = vmul.f32 %v819_v62, %v4794_v14  ;;  %v846_v16 = vadd.f32 %v845_v8, %v844_v4  ;;  %v852_v18 = vsel %vm232_vm1, %v840_v6, 0.0  ;;  %v954_v6 = vrot.slane %v4751_v51, %v4886_v27 }
 0x5d5   :  { %v4027_v1 = vpop.f32.mrf.mxu0 }
 0x5d6   :  { %v849_v11 = vsel %vm232_vm1, %v838_v3, 0.0  ;;  %v841_v12 = vmul.f32 %v4027_v1, %v4811_v34  ;;  %v848_v23 = vadd.f32 %v847_v20, %v846_v16  ;;  %v4312_v16 = vld [vmem:[%s5718_s8 + $0xc8] sm:$0xff]  }
 0x5d7   :  { %v822_v5 = vpop.f32.mrf.mxu0  ;;  %v4316_v20 = vld [vmem:[%s5718_s8 + $0xa8] sm:$0xff]  }
 0x5d8   :  { %v839_v7 = vmul.f32 %v822_v5, %v4797_v15  ;;  %v854_v22 = vsel %vm232_vm1, %v841_v12, 0.0  ;;  %v4310_v12 = vld [vmem:[%s5718_s8 + $0xd8] sm:$0xff]  }
 0x5da   :  { %v850_v13 = vsel %vm232_vm1, %v839_v7, 0.0 }
 0x5db   :  { %v851_v17 = vadd.f32 %v850_v13, %v849_v11  ;;  %v4311_v13 = vld [vmem:[%s5718_s8 + $0xd0] sm:$0xff]  }
 0x5dd   :  { %v853_v19 = vadd.f32 %v852_v18, %v851_v17  ;;  %v4313_v17 = vld [vmem:[%s5718_s8 + $0xc0] sm:$0xff]   ;;  %v4314_v18 = vld [vmem:[%s5718_s8 + $0xb8] sm:$0xff]  }
 0x5df   :  { %v855_v24 = vadd.f32 %v854_v22, %v853_v19  ;;  %v4315_v19 = vld [vmem:[%s5718_s8 + $0xb0] sm:$0xff]   ;;  %v4317_v22 = vld [vmem:[%s5718_s8 + $0xa0] sm:$0xff]  }
 0x5e1   :  { %v856_v25 = vpack.c.bf16 %v855_v24, %v848_v23  ;;  %v3754_v23 = vld [vmem:[%s5721_s11] ss:$0 sm:$0xff] }
 0x5e3   :  { %4033 = vmatmul.mubr.msk.bf16.vlgmr.msra.gmra.mxu1 %vm232_vm1, %v856_v25 }
 0x5e4   :  { %4060 = vmatprep.mubr.msk.bf16.mxu1 %vm4596_vm2, %v4595_v40  ;;  %4045 = vmatpush3.bf16.msra.mxu1 %v4310_v12 }
 0x5e5   :  { %4046 = vmatprep.subr.bf16.mxu1 %v4595_v40 }
 0x5e8   :  { %4047 = vmatpush3.bf16.msra.mxu1 %v4311_v13 }
 0x5e9   :  { %4048 = vmatprep.subr.bf16.mxu1 %v4595_v40 }
 0x5ec   :  { %4049 = vmatpush3.bf16.msra.mxu1 %v4312_v16 }
 0x5ed   :  { %4050 = vmatprep.subr.bf16.mxu1 %v4595_v40 }
 0x5f0   :  { %4051 = vmatpush3.bf16.msra.mxu1 %v4313_v17 }
 0x5f1   :  { %4052 = vmatprep.subr.bf16.mxu1 %v4595_v40 }
 0x5f4   :  { %4053 = vmatpush3.bf16.msra.mxu1 %v4314_v18 }
 0x5f5   :  { %4054 = vmatprep.subr.bf16.mxu1 %v4595_v40 }
 0x5f8   :  { %4055 = vmatpush3.bf16.msra.mxu1 %v4315_v19  ;;  %v4973_v19 = vld [vmem:[%s5711_s1 + $0x8] sm:$0xff] }
 0x5f9   :  { %4056 = vmatprep.subr.bf16.mxu1 %v4595_v40 }
 0x5fc   :  { %4057 = vmatpush3.bf16.msra.mxu1 %v4316_v20 }
 0x5fd   :  { %4058 = vmatprep.subr.bf16.mxu1 %v4595_v40 }
 0x600   :  { %4059 = vmatpush3.bf16.msra.mxu1 %v4317_v22  ;;  %v1195_v22 = vsel %vm232_vm1, %v4973_v19, 0.0 }
 0x6a3   :  { %v910_v29 = vpop.f32.mrf.mxu1 }
 0x6a4   :  { %v911_v30 = vadd.f32 %v910_v29, %v860_v28 }
 0x6a5   :  { %v4034_v32 = vpop.f32.mrf.mxu1 }
 0x6a6   :  { %v4891_v35 = vadd.f32 %v911_v30, %v4716_v21 }
 0x6a7   :  { %v913_v36 = vpop.f32.mrf.mxu1 }
 0x6a8   :  { %v914_v37 = vadd.f32 %v913_v36, %v860_v28  ;;  %v919_v38 = vsel %vm232_vm1, %v4891_v35, 0.0 }
 0x6a9   :  { %920 = vadd.xlane.f32.xlu0 %v919_v38  ;;  %v4035_v39 = vpop.f32.mrf.mxu1 }
 0x6aa   :  { %v4896_v41 = vadd.f32 %v914_v37, %v4723_v26 }
 0x6ac   :  { %v922_v42 = vsel %vm232_vm1, %v4896_v41, 0.0 }
 0x6ad   :  { %923 = vadd.xlane.f32.xlu1 %v922_v42 }
 0x732   :  { %v921_v43 = vpop.xlane.xlu0 %920 }
 0x733   :  { %v925_v44 = vmul.f32 0.03125, %v921_v43 }
 0x735   :  { %v927_v45 = vsub.f32 %v4891_v35, %v925_v44 }
 0x736   :  { %v924_v21 = vpop.xlane.xlu1 %923 }
 0x737   :  { %v926_v46 = vmul.f32 0.03125, %v924_v21  ;;  %v929_v47 = vmul.f32 %v927_v45, %v927_v45 }
 0x739   :  { %v928_v52 = vsub.f32 %v4896_v41, %v926_v46  ;;  %v931_v53 = vsel %vm232_vm1, %v929_v47, 0.0 }
 0x73a   :  { %932 = vadd.xlane.f32.xlu0 %v931_v53 }
 0x73b   :  { %v930_v54 = vmul.f32 %v928_v52, %v928_v52 }
 0x73d   :  { %v934_v26 = vsel %vm232_vm1, %v930_v54, 0.0 }
 0x73e   :  { %935 = vadd.xlane.f32.xlu1 %v934_v26 }
 0x7c3   :  { %v933_v58 = vpop.xlane.xlu0 %932 }
 0x7c4   :  { %v937_v59 = vmul.f32 0.03125, %v933_v58 }
 0x7c6   :  { %v939_v60 = vadd.f32 1e-06, %v937_v59 }
 0x7c7   :  { %v936_v61 = vpop.xlane.xlu1 %935 }
 0x7c8   :  { %4394 = vrsqrt.f32 %v939_v60  ;;  %v938_v62 = vmul.f32 0.03125, %v936_v61  ;;  %v4954_v60 = vsub.s32 4, %v4743_v49 }
 0x7ca   :  { %v940_v63 = vadd.f32 1e-06, %v938_v62  ;;  %v1131_v61 = vrot.slane %v4789_v10, %v4954_v60 }
 0x7cc   :  { %4396 = vrsqrt.f32 %v940_v63 }
 0x7d5   :  { %v4395_v0 = vpop.eup %4394 }
 0x7d6   :  { %v943_v1 = vmul.f32 %v4395_v0, %v927_v45 }
 0x7d8   :  { %v949_v5 = vmul.f32 %v948_v2, %v943_v1 }
 0x7d9   :  { %v4397_v3 = vpop.eup %4396 }
 0x7da   :  { %v944_v4 = vmul.f32 %v4397_v3, %v928_v52  ;;  %v955_v8 = vadd.f32 %v954_v6, %v949_v5 }
 0x7dc   :  { %v950_v7 = vmul.f32 %v948_v2, %v944_v4 }
 0x7de   :  { %v956_v9 = vadd.f32 %v954_v6, %v950_v7 }
 0x7e0   :  { %v957_v11 = vpack.c.bf16 %v956_v9, %v955_v8 }
 0x7e2   :  { %4041 = vmatmul.mubr.msk.bf16.vlgmr.msra.gmra.mxu0 %vm232_vm1, %v957_v11 }
 0x7e3   :  { %4068 = vmatprep.mubr.msk.bf16.mxu0 %vm4596_vm2, %v4595_v40 }
 0x8a2   :  { %v1011_v24 = vpop.f32.mrf.mxu0 }
 0x8a3   :  { %v1012_v25 = vadd.f32 %v3754_v23, %v1011_v24 }
 0x8a4   :  { %v4042_v28 = vpop.f32.mrf.mxu0 }
 0x8a5   :  { %v1018_v29 = vmul.f32 %v1012_v25, %v1012_v25 }
 0x8a6   :  { %v1014_v30 = vpop.f32.mrf.mxu0 }
 0x8a7   :  { %v1020_v32 = vmul.f32 %v1018_v29, %v1012_v25  ;;  %v1015_v36 = vadd.f32 %v3754_v23, %v1014_v30 }
 0x8a8   :  { %v4043_v37 = vpop.f32.mrf.mxu0 }
 0x8a9   :  { %v1022_v38 = vmul.f32 0.044715, %v1020_v32  ;;  %v1019_v39 = vmul.f32 %v1015_v36, %v1015_v36  ;;  %v4979_v37 = vsub.s32 5, %v4743_v49 }
 0x8ab   :  { %v1024_v42 = vadd.f32 %v1022_v38, %v1012_v25  ;;  %v1021_v43 = vmul.f32 %v1019_v39, %v1015_v36  ;;  %v1163_v39 = vrot.slane %v4751_v51, %v4954_v60 }
 0x8ad   :  { %v1026_v44 = vmul.f32 0.7978846, %v1024_v42  ;;  %v1023_v45 = vmul.f32 0.044715, %v1021_v43 }
 0x8af   :  { %4398 = vtanh.f32 %v1026_v44  ;;  %v1025_v21 = vadd.f32 %v1023_v45, %v1015_v36  ;;  %v1169_v45 = vrot.slane %v4751_v51, %v4979_v37 }
 0x8b1   :  { %v1027_v46 = vmul.f32 0.7978846, %v1025_v21 }
 0x8b3   :  { %4400 = vtanh.f32 %v1027_v46 }
 0x8bc   :  { %v4399_v47 = vpop.eup %4398 }
 0x8bd   :  { %v1030_v52 = vadd.f32 1.0, %v4399_v47 }
 0x8bf   :  { %v1032_v54 = vmul.f32 0.5, %v1030_v52 }
 0x8c0   :  { %v4401_v53 = vpop.eup %4400 }
 0x8c1   :  { %v1031_v26 = vadd.f32 1.0, %v4401_v53  ;;  %v1034_v57 = vmul.f32 %v1032_v54, %v1012_v25 }
 0x8c3   :  { %v1033_v56 = vmul.f32 0.5, %v1031_v26 }
 0x8c5   :  { %v1035_v58 = vmul.f32 %v1033_v56, %v1015_v36 }
 0x8c7   :  { %v1036_v59 = vpack.c.bf16 %v1035_v58, %v1034_v57 }
 0x8c9   :  { %4061 = vmatmul.mubr.bf16.vlgmr.msra.gmra.mxu1 %v1036_v59 }
 0x989   :  { %v1119_v62 = vpop.f32.mrf.mxu1 }
 0x98a   :  { %v1126_v63 = vadd.f32 %v1119_v62, %v4891_v35  ;;  %v4965_v35 = vld [vmem:[%s5711_s1] sm:$0xff]  ;;  %v4318_v62 = vld [vmem:[%s5718_s8 + $0xe8] sm:$0xff]  }
 0x98b   :  { %v4062_v0 = vpop.f32.mrf.mxu1  ;;  %v1192_v18 = vsel %vm232_vm1, %v4965_v35, 0.0  ;;  %4065 = vmatpush3.bf16.msra.mxu0 %v4318_v62  ;;  %v4323_v62 = vld [vmem:[%s5718_s8 + $0x100] sm:$0xff]  }
 0x98c   :  { %v1132_v1 = vadd.f32 %v1131_v61, %v1126_v63  ;;  %v4319_v63 = vld [vmem:[%s5718_s8 + $0xe0] sm:$0xff]   ;;  %4066 = vmatprep.subr.bf16.mxu0 %v4595_v40 }
 0x98d   :  { %v1122_v2 = vpop.f32.mrf.mxu1 }
 0x98e   :  { %v1127_v3 = vadd.f32 %v1122_v2, %v4896_v41  ;;  %v1134_v4 = vsel %vm232_vm1, %v1132_v1, 0.0 }
 0x98f   :  { %1135 = vadd.xlane.f32.xlu0 %v1134_v4  ;;  %v4063_v5 = vpop.f32.mrf.mxu1  ;;  %4067 = vmatpush3.bf16.msra.mxu0 %v4319_v63  ;;  %v5039_v63 = vld [vmem:[%s5720_s10 + $0x18] sm:$0x1f] }
 0x990   :  { %v1133_v6 = vadd.f32 %v1131_v61, %v1127_v3  ;;  %4072 = vmatprep.subr.bf16.mxu0 %v4595_v40 }
 0x992   :  { %v1137_v7 = vsel %vm232_vm1, %v1133_v6, 0.0 }
 0x993   :  { %1138 = vadd.xlane.f32.xlu1 %v1137_v7 }
 0xa18   :  { %v1136_v8 = vpop.xlane.xlu0 %1135 }
 0xa19   :  { %v1140_v9 = vmul.f32 0.03125, %v1136_v8 }
 0xa1b   :  { %v1142_v11 = vsub.f32 %v1132_v1, %v1140_v9 }
 0xa1c   :  { %v1139_v10 = vpop.xlane.xlu1 %1138 }
 0xa1d   :  { %v1141_v12 = vmul.f32 0.03125, %v1139_v10  ;;  %v1144_v13 = vmul.f32 %v1142_v11, %v1142_v11 }
 0xa1f   :  { %v1143_v41 = vsub.f32 %v1133_v6, %v1141_v12  ;;  %v1146_v16 = vsel %vm232_vm1, %v1144_v13, 0.0 }
 0xa20   :  { %1147 = vadd.xlane.f32.xlu0 %v1146_v16 }
 0xa21   :  { %v1145_v17 = vmul.f32 %v1143_v41, %v1143_v41 }
 0xa23   :  { %v1149_v20 = vsel %vm232_vm1, %v1145_v17, 0.0  ;;  %v5004_v17 = vld [vmem:[%s5720_s10 + $0x10] sm:$0x3f] }
 0xa24   :  { %1150 = vadd.xlane.f32.xlu1 %v1149_v20  ;;  %1193 = vadd.xlane.f32.xlu0 %v1192_v18 }
 0xa28   :  { %1196 = vadd.xlane.f32.xlu1 %v1195_v22  ;;  %v1221_v22 = vrot.slane %v5004_v17, %v4746_v50 }
 0xaa9   :  { %v1148_v23 = vpop.xlane.xlu0 %1147 }
 0xaaa   :  { %v1152_v24 = vmul.f32 0.03125, %v1148_v23 }
 0xaac   :  { %v1154_v25 = vadd.f32 1e-06, %v1152_v24 }
 0xaad   :  { %v1151_v28 = vpop.xlane.xlu1 %1150  ;;  %v1194_v32 = vpop.xlane.xlu0 %1193 }
 0xaae   :  { %4402 = vrsqrt.f32 %v1154_v25  ;;  %v1153_v29 = vmul.f32 0.03125, %v1151_v28  ;;  %v1198_v36 = vmul.f32 0.03125, %v1194_v32  ;;  %v1227_v28 = vrot.slane %v5004_v17, %v4756_v55 }
 0xab0   :  { %v1155_v30 = vadd.f32 1e-06, %v1153_v29  ;;  %v1200_v43 = vsub.f32 %v4965_v35, %v1198_v36 }
 0xab1   :  { %v1197_v38 = vpop.xlane.xlu1 %1196 }
 0xab2   :  { %4404 = vrsqrt.f32 %v1155_v30  ;;  %v1199_v21 = vmul.f32 0.03125, %v1197_v38  ;;  %v1202_v54 = vmul.f32 %v1200_v43, %v1200_v43  ;;  %v4320_v38 = vld [vmem:[%s5718_s8 + $0xf8] sm:$0xff]  }
 0xab4   :  { %v1201_v53 = vsub.f32 %v4973_v19, %v1199_v21  ;;  %v1204_v57 = vsel %vm232_vm1, %v1202_v54, 0.0 }
 0xab6   :  { %v1203_v59 = vmul.f32 %v1201_v53, %v1201_v53 }
 0xab8   :  { %v1207_v51 = vsel %vm232_vm1, %v1203_v59, 0.0 }
 0xabb   :  { %v4403_v42 = vpop.eup %4402 }
 0xabc   :  { %v1158_v44 = vmul.f32 %v4403_v42, %v1142_v11 }
 0xabe   :  { %v1164_v46 = vmul.f32 %v1163_v39, %v1158_v44 }
 0xabf   :  { %v4405_v47 = vpop.eup %4404 }
 0xac0   :  { %v1170_v52 = vadd.f32 %v1169_v45, %v1164_v46  ;;  %v1159_v49 = vmul.f32 %v4405_v47, %v1143_v41 }
 0xac2   :  { %v1230_v26 = vsel %vm232_vm1, %v1170_v52, 0.0  ;;  %v1165_v56 = vmul.f32 %v1163_v39, %v1159_v49  ;;  %v4321_v39 = vld [vmem:[%s5718_s8 + $0xf0] sm:$0xff]  }
 0xac3   :  { %1231 = vadd.xlane.f32.xlu0 %v1230_v26 }
 0xac4   :  { %v1171_v58 = vadd.f32 %v1169_v45, %v1165_v56  ;;  %v1265_v56 = vrot.slane %v5004_v17, %v4886_v27 }
 0xac6   :  { %v1233_v61 = vsel %vm232_vm1, %v1171_v58, 0.0 }
 0xac7   :  { %1205 = vadd.xlane.f32.xlu0 %v1204_v57  ;;  %1234 = vadd.xlane.f32.xlu1 %v1233_v61  ;;  %v4322_v61 = vld [vmem:[%s5718_s8 + $0x108] sm:$0xff]  }
 0xacb   :  { %1208 = vadd.xlane.f32.xlu1 %v1207_v51 }
 0xb4c   :  { %v1232_v0 = vpop.xlane.xlu0 %1231 }
 0xb4d   :  { %v1236_v1 = vmul.f32 0.03125, %v1232_v0  ;;  %v1272_v0 = vrot.slane %v5039_v63, %v4746_v50 }
 0xb4f   :  { %v1238_v2 = vsub.f32 %v1170_v52, %v1236_v1 }
 0xb50   :  { %v1206_v3 = vpop.xlane.xlu0 %1205  ;;  %v1235_v4 = vpop.xlane.xlu1 %1234 }
 0xb51   :  { %v1210_v5 = vmul.f32 0.03125, %v1206_v3  ;;  %v1237_v6 = vmul.f32 0.03125, %v1235_v4  ;;  %v1240_v7 = vmul.f32 %v1238_v2, %v1238_v2 }
 0xb53   :  { %v1212_v8 = vadd.f32 1e-06, %v1210_v5  ;;  %v1239_v9 = vsub.f32 %v1171_v58, %v1237_v6  ;;  %v1242_v11 = vsel %vm232_vm1, %v1240_v7, 0.0 }
 0xb54   :  { %1243 = vadd.xlane.f32.xlu0 %v1242_v11  ;;  %v1209_v10 = vpop.xlane.xlu1 %1208 }
 0xb55   :  { %4406 = vrsqrt.f32 %v1212_v8  ;;  %v1211_v12 = vmul.f32 0.03125, %v1209_v10  ;;  %v1241_v13 = vmul.f32 %v1239_v9, %v1239_v9 }
 0xb57   :  { %v1213_v41 = vadd.f32 1e-06, %v1211_v12  ;;  %v1245_v16 = vsel %vm232_vm1, %v1241_v13, 0.0  ;;  %v1333_v13 = vrot.slane %v5039_v63, %v4756_v55 }
 0xb58   :  { %1246 = vadd.xlane.f32.xlu1 %v1245_v16 }
 0xb59   :  { %4408 = vrsqrt.f32 %v1213_v41 }
 0xb62   :  { %v4407_v18 = vpop.eup %4406 }
 0xb63   :  { %v1216_v20 = vmul.f32 %v4407_v18, %v1200_v43 }
 0xb65   :  { %v1222_v25 = vmul.f32 %v1221_v22, %v1216_v20 }
 0xb66   :  { %v4409_v23 = vpop.eup %4408 }
 0xb67   :  { %v1217_v24 = vmul.f32 %v4409_v23, %v1201_v53  ;;  %v1228_v30 = vadd.f32 %v1227_v28, %v1222_v25  ;;  %v1259_v53 = vrot.slane %v5004_v17, %v4805_v31  ;;  %v1393_v25 = vrot.slane %v5039_v63, %v4805_v31 }
 0xb69   :  { %v1223_v29 = vmul.f32 %v1221_v22, %v1217_v24 }
 0xb6b   :  { %v1229_v32 = vadd.f32 %v1227_v28, %v1223_v29 }
 0xb6d   :  { %v1268_v36 = vpack.c.bf16 %v1229_v32, %v1228_v30 }
 0xb6f   :  { %4069 = vmatmul.mubr.msk.bf16.vlgmr.msra.gmra.mxu0 %vm232_vm1, %v1268_v36 }
 0xb70   :  { %4076 = vmatprep.mubr.msk.bf16.mxu0 %vm4596_vm2, %v4595_v40  ;;  %4073 = vmatpush3.bf16.msra.mxu0 %v4320_v38 }
 0xb71   :  { %4074 = vmatprep.subr.bf16.mxu0 %v4595_v40 }
 0xb74   :  { %4075 = vmatpush3.bf16.msra.mxu0 %v4321_v39 }
 0xb75   :  { %4080 = vmatprep.subr.bf16.mxu0 %v4595_v40 }
 0xbdd   :  { %v1244_v42 = vpop.xlane.xlu0 %1243 }
 0xbde   :  { %v1248_v43 = vmul.f32 0.03125, %v1244_v42 }
 0xbe0   :  { %v1250_v44 = vadd.f32 1e-06, %v1248_v43 }
 0xbe1   :  { %v1247_v45 = vpop.xlane.xlu1 %1246 }
 0xbe2   :  { %4410 = vrsqrt.f32 %v1250_v44  ;;  %v1249_v21 = vmul.f32 0.03125, %v1247_v45 }
 0xbe4   :  { %v1251_v46 = vadd.f32 1e-06, %v1249_v21 }
 0xbe6   :  { %4412 = vrsqrt.f32 %v1251_v46 }
 0xbef   :  { %v4411_v47 = vpop.eup %4410 }
 0xbf0   :  { %v1254_v52 = vmul.f32 %v4411_v47, %v1238_v2 }
 0xbf2   :  { %v1260_v26 = vmul.f32 %v1259_v53, %v1254_v52 }
 0xbf3   :  { %v4413_v54 = vpop.eup %4412 }
 0xbf4   :  { %v1255_v49 = vmul.f32 %v4413_v54, %v1239_v9  ;;  %v1266_v58 = vadd.f32 %v1265_v56, %v1260_v26 }
 0xbf6   :  { %v1261_v57 = vmul.f32 %v1259_v53, %v1255_v49 }
 0xbf8   :  { %v1267_v59 = vadd.f32 %v1265_v56, %v1261_v57 }
 0xbfa   :  { %v1329_v51 = vpack.c.bf16 %v1267_v59, %v1266_v58 }
 0xbfc   :  { %4077 = vmatmul.mubr.msk.bf16.vlgmr.msra.gmra.mxu0 %vm232_vm1, %v1329_v51 }
 0xbfd   :  { %4081 = vmatpush3.bf16.msra.mxu0 %v4322_v61  ;;  %4084 = vmatprep.mubr.msk.bf16.mxu0 %vm4596_vm2, %v4595_v40 }
 0xbfe   :  { %4082 = vmatprep.subr.bf16.mxu0 %v4595_v40 }
 0xc01   :  { %4083 = vmatpush3.bf16.msra.mxu0 %v4323_v62 }
 0xc04   :  { %4085 = vmatmul.mubr.msk.bf16.vlgmr.msra.gmra.mxu0 %vm232_vm1, %v1329_v51 }
 0xc2f   :  { %v1322_v1 = vpop.f32.mrf.mxu0 }
 0xc30   :  { %v1323_v2 = vadd.f32 %v1322_v1, %v1272_v0 }
 0xc31   :  { %v4070_v3 = vpop.f32.mrf.mxu0 }
 0xc32   :  { %v1447_v4 = vmul.f32 %v1323_v2, %v4794_v14  ;;  %v1448_v5 = vmul.f32 %v1323_v2, %v4797_v15  ;;  %v1449_v29 = vmul.f32 %v1323_v2, %v4808_v33  ;;  %v1450_v30 = vmul.f32 %v1323_v2, %v4811_v34 }
 0xc33   :  { %v1325_v6 = vpop.f32.mrf.mxu0 }
 0xc34   :  { %v1326_v7 = vadd.f32 %v1325_v6, %v1272_v0  ;;  %v1455_v8 = vpack.c.bf16 %v1448_v5, %v1447_v4  ;;  %v1456_v43 = vpack.c.bf16 %v1450_v30, %v1449_v29 }
 0xc35   :  { %v4071_v9 = vpop.f32.mrf.mxu0 }
 0xc36   :  { %v1451_v11 = vmul.f32 %v1326_v7, %v4794_v14  ;;  %v1452_v10 = vmul.f32 %v1326_v7, %v4797_v15  ;;  %4090 = vmatprep.mubr.msk.bf16.mxu0 %vm232_vm1, %v1455_v8  ;;  %v1453_v44 = vmul.f32 %v1326_v7, %v4808_v33  ;;  %v1454_v45 = vmul.f32 %v1326_v7, %v4811_v34 }
 0xc38   :  { %v1457_v12 = vpack.c.bf16 %v1452_v10, %v1451_v11  ;;  %v1458_v54 = vpack.c.bf16 %v1454_v45, %v1453_v44 }
 0xc3a   :  { %4096 = vmatprep.mubr.msk.bf16.mxu1 %vm232_vm1, %v1457_v12 }
 0xcbc   :  { %v1383_v41 = vpop.f32.mrf.mxu0 }
 0xcbd   :  { %v1384_v16 = vadd.f32 %v1383_v41, %v1333_v13 }
 0xcbe   :  { %v4078_v18 = vpop.f32.mrf.mxu0 }
 0xcbf   :  { %v1459_v20 = vpack.c.bf16 %v1384_v16, %v1384_v16 }
 0xcc0   :  { %v1386_v22 = vpop.f32.mrf.mxu0 }
 0xcc1   :  { %v1470_v23 = vsel %vm232_vm1, %v1459_v20, 0  ;;  %v1387_v24 = vadd.f32 %v1386_v22, %v1333_v13  ;;  %4268 = vmatprep.subr.msk.bf16.mxu0 %vm232_vm1, %v1459_v20 }
 0xcc2   :  { %v4079_v28 = vpop.f32.mrf.mxu0  ;;  %4089 = vmatpush3.bf16.xpose.msra.mxu0 %v1470_v23 }
 0xcc3   :  { %v1460_v32 = vpack.c.bf16 %v1387_v24, %v1387_v24 }
 0xcc4   :  { %v1440_v36 = vpop.f32.mrf.mxu0 }
 0xcc5   :  { %v1528_v38 = vsel %vm232_vm1, %v1460_v32, 0  ;;  %v1441_v39 = vadd.f32 %v1440_v36, %v1393_v25  ;;  %4269 = vmatprep.subr.msk.bf16.mxu1 %vm232_vm1, %v1460_v32 }
 0xcc6   :  { %v4086_v42 = vpop.f32.mrf.mxu0  ;;  %4095 = vmatpush3.bf16.xpose.msra.mxu1 %v1528_v38 }
 0xcc7   :  { %v1461_v21 = vpack.c.bf16 %v1441_v39, %v1441_v39 }
 0xcc8   :  { %v1443_v46 = vpop.f32.mrf.mxu0 }
 0xcc9   :  { %v1678_v47 = vsel %vm723_vm3, %v1461_v21, 0  ;;  %v1444_v52 = vadd.f32 %v1443_v46, %v1393_v25  ;;  %4091 = vmatmul.mubr.msk.bf16.vlgmr.msra.gmra.mxu0 %vm232_vm1, %v1456_v43  ;;  %4270 = vmatprep.subr.msk.bf16.mxu0 %vm723_vm3, %v1461_v21 }
 0xcca   :  { %v4087_v53 = vpop.f32.mrf.mxu0  ;;  %4101 = vmatpush3.bf16.msra.mxu0 %v1678_v47 }
 0xccb   :  { %v1462_v49 = vpack.c.bf16 %v1444_v52, %v1444_v52  ;;  %4112 = vmatprep.subr.bf16.mxu0 %v4595_v40 }
 0xccd   :  { %v1736_v26 = vsel %vm723_vm3, %v1462_v49, 0  ;;  %4097 = vmatmul.mubr.msk.bf16.vlgmr.msra.gmra.mxu1 %vm232_vm1, %v1458_v54  ;;  %4271 = vmatprep.subr.msk.bf16.mxu1 %vm723_vm3, %v1462_v49 }
 0xcce   :  { %4107 = vmatpush3.bf16.msra.mxu1 %v1736_v26 }
 0xccf   :  { %4120 = vmatprep.subr.bf16.mxu1 %v4595_v40 }
 0xd89   :  { %v4092_v56 = vpop.f32.mrf.mxu0 }
 0xd8a   :  { %v1585_v57 = vsel %vm624_vm4, %v4092_v56, -inf }
 0xd8b   :  { %1586 = vmax.xlane.f32.xlu0 %v1585_v57  ;;  %v1506_v58 = vpop.f32.mrf.mxu0 }
 0xd8c   :  { %v1579_v51 = vsel %vm624_vm4, %v1506_v58, -inf }
 0xd8d   :  { %v4093_v59 = vpop.f32.mrf.mxu0  ;;  %v4098_v61 = vpop.f32.mrf.mxu1 }
 0xd8e   :  { %v1588_v62 = vsel %vm624_vm4, %v4093_v59, -inf  ;;  %v1597_v6 = vsel %vm624_vm4, %v4098_v61, -inf }
 0xd8f   :  { %1580 = vmax.xlane.f32.xlu0 %v1579_v51  ;;  %1589 = vmax.xlane.f32.xlu1 %v1588_v62  ;;  %v1509_v0 = vpop.f32.mrf.mxu0  ;;  %v1564_v1 = vpop.f32.mrf.mxu1 }
 0xd90   :  { %v1582_v3 = vsel %vm624_vm4, %v1509_v0, -inf  ;;  %v1591_v4 = vsel %vm624_vm4, %v1564_v1, -inf }
 0xd91   :  { %v4099_v2 = vpop.f32.mrf.mxu1 }
 0xd92   :  { %v1600_v8 = vsel %vm624_vm4, %v4099_v2, -inf }
 0xd93   :  { %1583 = vmax.xlane.f32.xlu1 %v1582_v3  ;;  %1592 = vmax.xlane.f32.xlu0 %v1591_v4  ;;  %v1567_v5 = vpop.f32.mrf.mxu1 }
 0xd94   :  { %v1594_v7 = vsel %vm624_vm4, %v1567_v5, -inf }
 0xd97   :  { %1598 = vmax.xlane.f32.xlu0 %v1597_v6  ;;  %1595 = vmax.xlane.f32.xlu1 %v1594_v7 }
 0xd9b   :  { %1601 = vmax.xlane.f32.xlu1 %v1600_v8 }
 0xe14   :  { %v1587_v9 = vpop.xlane.xlu0 %1586 }
 0xe15   :  { %v1605_v11 = vsub.f32 %v4092_v56, %v1587_v9 }
 0xe17   :  { %v1615_v10 = vmul.f32 1.442695, %v1605_v11 }
 0xe18   :  { %v1581_v12 = vpop.xlane.xlu0 %1580  ;;  %v1590_v13 = vpop.xlane.xlu1 %1589 }
 0xe19   :  { %4414 = vpow2.f32 %v1615_v10  ;;  %v1603_v41 = vsub.f32 %v1506_v58, %v1581_v12  ;;  %v1606_v16 = vsub.f32 %v4093_v59, %v1590_v13 }
 0xe1b   :  { %v1611_v18 = vmul.f32 1.442695, %v1603_v41  ;;  %v1617_v20 = vmul.f32 1.442695, %v1606_v16 }
 0xe1c   :  { %v1584_v22 = vpop.xlane.xlu1 %1583  ;;  %v1593_v23 = vpop.xlane.xlu0 %1592 }
 0xe1d   :  { %4416 = vpow2.f32 %v1611_v18  ;;  %v1604_v24 = vsub.f32 %v1509_v0, %v1584_v22  ;;  %v1607_v25 = vsub.f32 %v1564_v1, %v1593_v23 }
 0xe1e   :  { %4418 = vpow2.f32 %v1617_v20 }
 0xe1f   :  { %v1613_v28 = vmul.f32 1.442695, %v1604_v24  ;;  %v1619_v29 = vmul.f32 1.442695, %v1607_v25 }
 0xe20   :  { %v1599_v30 = vpop.xlane.xlu0 %1598  ;;  %v1596_v32 = vpop.xlane.xlu1 %1595 }
 0xe21   :  { %4420 = vpow2.f32 %v1613_v28  ;;  %v1609_v36 = vsub.f32 %v4098_v61, %v1599_v30  ;;  %v1608_v38 = vsub.f32 %v1567_v5, %v1596_v32 }
 0xe22   :  { %4422 = vpow2.f32 %v1619_v29 }
 0xe23   :  { %v1623_v39 = vmul.f32 1.442695, %v1609_v36  ;;  %v1621_v42 = vmul.f32 1.442695, %v1608_v38 }
 0xe24   :  { %v1602_v43 = vpop.xlane.xlu1 %1601 }
 0xe25   :  { %4424 = vpow2.f32 %v1623_v39  ;;  %v1610_v44 = vsub.f32 %v4099_v2, %v1602_v43  ;;  %v4325_v43 = vld [vmem:[%s5718_s8 + $0x110] sm:$0xff]  }
 0xe26   :  { %v4415_v45 = vpop.eup %4414  ;;  %4426 = vpow2.f32 %v1621_v42  ;;  %v4324_v42 = vld [vmem:[%s5718_s8 + $0x118] sm:$0xff]  }
 0xe27   :  { %v1625_v21 = vmul.f32 1.442695, %v1610_v44  ;;  %v1633_v46 = vsel %vm624_vm4, %v4415_v45, 0.0 }
 0xe28   :  { %1634 = vadd.xlane.f32.xlu0 %v1633_v46 }
 0xe29   :  { %4428 = vpow2.f32 %v1625_v21 }
 0xe2a   :  { %v4417_v47 = vpop.eup %4416 }
 0xe2b   :  { %v4419_v52 = vpop.eup %4418  ;;  %v1627_v53 = vsel %vm624_vm4, %v4417_v47, 0.0 }
 0xe2c   :  { %1628 = vadd.xlane.f32.xlu0 %v1627_v53  ;;  %v1636_v54 = vsel %vm624_vm4, %v4419_v52, 0.0 }
 0xe2d   :  { %1637 = vadd.xlane.f32.xlu1 %v1636_v54 }
 0xe2e   :  { %v4421_v49 = vpop.eup %4420 }
 0xe2f   :  { %v4423_v26 = vpop.eup %4422  ;;  %v1630_v56 = vsel %vm624_vm4, %v4421_v49, 0.0 }
 0xe30   :  { %v1639_v57 = vsel %vm624_vm4, %v4423_v26, 0.0 }
 0xe31   :  { %1640 = vadd.xlane.f32.xlu0 %v1639_v57  ;;  %1631 = vadd.xlane.f32.xlu1 %v1630_v56 }
 0xe32   :  { %v4425_v58 = vpop.eup %4424 }
 0xe33   :  { %v4427_v59 = vpop.eup %4426  ;;  %v1645_v61 = vsel %vm624_vm4, %v4425_v58, 0.0 }
 0xe34   :  { %v1642_v51 = vsel %vm624_vm4, %v4427_v59, 0.0 }
 0xe35   :  { %1646 = vadd.xlane.f32.xlu0 %v1645_v61  ;;  %1643 = vadd.xlane.f32.xlu1 %v1642_v51 }
 0xe36   :  { %v4429_v62 = vpop.eup %4428 }
 0xe37   :  { %v1648_v0 = vsel %vm624_vm4, %v4429_v62, 0.0 }
 0xe39   :  { %1649 = vadd.xlane.f32.xlu1 %v1648_v0 }
 0xeb1   :  { %v1635_v1 = vpop.xlane.xlu0 %1634 }
 0xeb5   :  { %v1629_v2 = vpop.xlane.xlu0 %1628 }
 0xeb6   :  { %v1638_v3 = vpop.xlane.xlu1 %1637 }
 0xeb7   :  { %4430 = vrcp.f32 %v1638_v3 }
 0xeb8   :  { %4432 = vrcp.f32 %v1629_v2 }
 0xeb9   :  { %4434 = vrcp.f32 %v1635_v1 }
 0xeba   :  { %v1641_v4 = vpop.xlane.xlu0 %1640  ;;  %v1632_v5 = vpop.xlane.xlu1 %1631 }
 0xebb   :  { %4436 = vrcp.f32 %v1632_v5 }
 0xebc   :  { %4438 = vrcp.f32 %v1641_v4 }
 0xebe   :  { %v1647_v6 = vpop.xlane.xlu0 %1646  ;;  %v1644_v7 = vpop.xlane.xlu1 %1643 }
 0xebf   :  { %4440 = vrcp.f32 %v1644_v7 }
 0xec0   :  { %4442 = vrcp.f32 %v1647_v6 }
 0xec2   :  { %v1650_v8 = vpop.xlane.xlu1 %1649 }
 0xec3   :  { %4444 = vrcp.f32 %v1650_v8 }
 0xec4   :  { %v4431_v9 = vpop.eup %4430 }
 0xec5   :  { %v4433_v11 = vpop.eup %4432  ;;  %v1662_v13 = vmul.f32 %v4431_v9, %v4419_v52 }
 0xec6   :  { %v4435_v10 = vpop.eup %4434  ;;  %v1659_v41 = vmul.f32 %v4433_v11, %v4417_v47 }
 0xec7   :  { %v1661_v20 = vmul.f32 %v4435_v10, %v4415_v45 }
 0xec8   :  { %v4437_v12 = vpop.eup %4436 }
 0xec9   :  { %v1660_v16 = vmul.f32 %v4437_v12, %v4421_v49  ;;  %v4439_v18 = vpop.eup %4438  ;;  %v1668_v24 = vpack.c.bf16 %v1662_v13, %v1661_v20 }
 0xeca   :  { %v1663_v28 = vmul.f32 %v4439_v18, %v4423_v26 }
 0xecb   :  { %v1667_v22 = vpack.c.bf16 %v1660_v16, %v1659_v41  ;;  %v1813_v41 = vrot.slane %v5039_v63, %v4886_v27 }
 0xecc   :  { %v4441_v23 = vpop.eup %4440 }
 0xecd   :  { %v4443_v25 = vpop.eup %4442  ;;  %4102 = vmatprep.mubr.msk.bf16.mxu0 %vm624_vm4, %v1667_v22  ;;  %v1664_v29 = vmul.f32 %v4441_v23, %v4427_v59 }
 0xece   :  { %4103 = vmatmul.mubr.msk.bf16.vlgmr.msra.gmra.mxu0 %vm624_vm4, %v1668_v24  ;;  %v1665_v36 = vmul.f32 %v4443_v25, %v4425_v58 }
 0xecf   :  { %v1669_v32 = vpack.c.bf16 %v1664_v29, %v1663_v28  ;;  %4116 = vmatprep.mubr.msk.bf16.mxu0 %vm4596_vm2, %v4595_v40  ;;  %4113 = vmatpush3.bf16.msra.mxu0 %v4324_v42 }
 0xed0   :  { %v4445_v30 = vpop.eup %4444  ;;  %4114 = vmatprep.subr.bf16.mxu0 %v4595_v40 }
 0xed1   :  { %v1666_v38 = vmul.f32 %v4445_v30, %v4429_v62  ;;  %4108 = vmatprep.mubr.msk.bf16.mxu1 %vm624_vm4, %v1669_v32 }
 0xed3   :  { %v1670_v39 = vpack.c.bf16 %v1666_v38, %v1665_v36  ;;  %4115 = vmatpush3.bf16.msra.mxu0 %v4325_v43 }
 0xed4   :  { %4128 = vmatprep.subr.bf16.mxu0 %v4595_v40 }
 0xed5   :  { %4109 = vmatmul.mubr.msk.bf16.vlgmr.msra.gmra.mxu1 %vm624_vm4, %v1670_v39 }
 0xed6   :  { %4124 = vmatprep.mubr.msk.bf16.mxu1 %vm4596_vm2, %v4595_v40 }
 0xf8e   :  { %v4104_v44 = vpop.f32.mrf.mxu0 }
 0xf8f   :  { %v1789_v26 = vmul.f32 %v4104_v44, %v4808_v33 }
 0xf90   :  { %v1714_v45 = vpop.f32.mrf.mxu0 }
 0xf91   :  { %v1787_v52 = vmul.f32 %v1714_v45, %v4794_v14  ;;  %v1798_v0 = vsel %vm232_vm1, %v1789_v26, 0.0 }
 0xf92   :  { %v4105_v21 = vpop.f32.mrf.mxu0 }
 0xf93   :  { %v1795_v57 = vsel %vm232_vm1, %v1787_v52, 0.0  ;;  %v1790_v1 = vmul.f32 %v4105_v21, %v4811_v34  ;;  %v4326_v21 = vld [vmem:[%s5719_s9 + $0x18] sm:$0xff]  }
 0xf94   :  { %v1717_v46 = vpop.f32.mrf.mxu0  ;;  %4121 = vmatpush3.bf16.msra.mxu1 %v4326_v21 }
 0xf95   :  { %v4110_v47 = vpop.f32.mrf.mxu1  ;;  %v1788_v53 = vmul.f32 %v1717_v46, %v4797_v15  ;;  %v1800_v9 = vsel %vm232_vm1, %v1790_v1, 0.0  ;;  %v4327_v46 = vld [vmem:[%s5719_s9 + $0x10] sm:$0xff]   ;;  %4122 = vmatprep.subr.bf16.mxu1 %v4595_v40 }
 0xf96   :  { %v1793_v51 = vmul.f32 %v4110_v47, %v4808_v33 }
 0xf97   :  { %v1772_v54 = vpop.f32.mrf.mxu1  ;;  %v1796_v49 = vsel %vm232_vm1, %v1788_v53, 0.0 }
 0xf98   :  { %v1791_v58 = vmul.f32 %v1772_v54, %v4794_v14  ;;  %v1797_v59 = vadd.f32 %v1796_v49, %v1795_v57  ;;  %v1805_v7 = vsel %vm232_vm1, %v1793_v51, 0.0  ;;  %4123 = vmatpush3.bf16.msra.mxu1 %v4327_v46 }
 0xf99   :  { %v4111_v56 = vpop.f32.mrf.mxu1  ;;  %4148 = vmatprep.subr.bf16.mxu1 %v4595_v40 }
 0xf9a   :  { %v1802_v2 = vsel %vm232_vm1, %v1791_v58, 0.0  ;;  %v1794_v3 = vmul.f32 %v4111_v56, %v4811_v34  ;;  %v1799_v5 = vadd.f32 %v1798_v0, %v1797_v59  ;;  %v1901_v58 = vrot.slane %v5004_v17, %v4954_v60 }
 0xf9b   :  { %v1775_v61 = vpop.f32.mrf.mxu1 }
 0xf9c   :  { %v1792_v62 = vmul.f32 %v1775_v61, %v4797_v15  ;;  %v1807_v11 = vsel %vm232_vm1, %v1794_v3, 0.0  ;;  %v1801_v10 = vadd.f32 %v1800_v9, %v1799_v5  ;;  %v1907_v61 = vrot.slane %v5004_v17, %v4979_v37  ;;  %v4329_v17 = vld [vmem:[%s5718_s8 + $0x150] sm:$0xff]   ;;  %v4330_v5 = vld [vmem:[%s5718_s8 + $0x148] sm:$0xff]  }
 0xf9d   :  { %v4334_v9 = vld [vmem:[%s5718_s8 + $0x128] sm:$0xff]  }
 0xf9e   :  { %v1803_v4 = vsel %vm232_vm1, %v1792_v62, 0.0 }
 0xf9f   :  { %v1804_v6 = vadd.f32 %v1803_v4, %v1802_v2  ;;  %v4328_v4 = vld [vmem:[%s5718_s8 + $0x158] sm:$0xff]  }
 0xfa1   :  { %v1806_v8 = vadd.f32 %v1805_v7, %v1804_v6  ;;  %v4331_v6 = vld [vmem:[%s5718_s8 + $0x140] sm:$0xff]   ;;  %v4332_v7 = vld [vmem:[%s5718_s8 + $0x138] sm:$0xff]  }
 0xfa3   :  { %v1808_v12 = vadd.f32 %v1807_v11, %v1806_v8  ;;  %v4333_v8 = vld [vmem:[%s5718_s8 + $0x130] sm:$0xff]   ;;  %v4335_v11 = vld [vmem:[%s5718_s8 + $0x120] sm:$0xff]  }
 0xfa5   :  { %v1809_v13 = vpack.c.bf16 %v1808_v12, %v1801_v10  ;;  %v3786_v10 = vld [vmem:[%s5721_s11 + $0x8] ss:$0 sm:$0xff] }
 0xfa7   :  { %4117 = vmatmul.mubr.msk.bf16.vlgmr.msra.gmra.mxu0 %vm232_vm1, %v1809_v13 }
 0xfa8   :  { %4144 = vmatprep.mubr.msk.bf16.mxu0 %vm4596_vm2, %v4595_v40  ;;  %4129 = vmatpush3.bf16.msra.mxu0 %v4328_v4 }
 0xfa9   :  { %4130 = vmatprep.subr.bf16.mxu0 %v4595_v40 }
 0xfac   :  { %4131 = vmatpush3.bf16.msra.mxu0 %v4329_v17 }
 0xfad   :  { %4132 = vmatprep.subr.bf16.mxu0 %v4595_v40 }
 0xfb0   :  { %4133 = vmatpush3.bf16.msra.mxu0 %v4330_v5 }
 0xfb1   :  { %4134 = vmatprep.subr.bf16.mxu0 %v4595_v40 }
 0xfb4   :  { %4135 = vmatpush3.bf16.msra.mxu0 %v4331_v6 }
 0xfb5   :  { %4136 = vmatprep.subr.bf16.mxu0 %v4595_v40 }
 0xfb8   :  { %4137 = vmatpush3.bf16.msra.mxu0 %v4332_v7 }
 0xfb9   :  { %4138 = vmatprep.subr.bf16.mxu0 %v4595_v40 }
 0xfbc   :  { %4139 = vmatpush3.bf16.msra.mxu0 %v4333_v8 }
 0xfbd   :  { %4140 = vmatprep.subr.bf16.mxu0 %v4595_v40 }
 0xfc0   :  { %4141 = vmatpush3.bf16.msra.mxu0 %v4334_v9 }
 0xfc1   :  { %4142 = vmatprep.subr.bf16.mxu0 %v4595_v40 }
 0xfc4   :  { %4143 = vmatpush3.bf16.msra.mxu0 %v4335_v11 }
0x1067   :  { %v1863_v16 = vpop.f32.mrf.mxu0 }
0x1068   :  { %v1864_v18 = vadd.f32 %v1863_v16, %v1813_v41 }
0x1069   :  { %v4118_v20 = vpop.f32.mrf.mxu0 }
0x106a   :  { %v5123_v22 = vadd.f32 %v1864_v18, %v4965_v35 }
0x106b   :  { %v1866_v23 = vpop.f32.mrf.mxu0 }
0x106c   :  { %v1867_v24 = vadd.f32 %v1866_v23, %v1813_v41  ;;  %v1872_v25 = vsel %vm232_vm1, %v5123_v22, 0.0 }
0x106d   :  { %1873 = vadd.xlane.f32.xlu0 %v1872_v25  ;;  %v4119_v28 = vpop.f32.mrf.mxu0 }
0x106e   :  { %v5128_v29 = vadd.f32 %v1867_v24, %v4973_v19 }
0x1070   :  { %v1875_v30 = vsel %vm232_vm1, %v5128_v29, 0.0 }
0x1071   :  { %1876 = vadd.xlane.f32.xlu1 %v1875_v30 }
0x10f6   :  { %v1874_v32 = vpop.xlane.xlu0 %1873 }
0x10f7   :  { %v1878_v36 = vmul.f32 0.03125, %v1874_v32 }
0x10f9   :  { %v1880_v38 = vsub.f32 %v5123_v22, %v1878_v36 }
0x10fa   :  { %v1877_v35 = vpop.xlane.xlu1 %1876 }
0x10fb   :  { %v1879_v39 = vmul.f32 0.03125, %v1877_v35  ;;  %v1882_v42 = vmul.f32 %v1880_v38, %v1880_v38 }
0x10fd   :  { %v1881_v43 = vsub.f32 %v5128_v29, %v1879_v39  ;;  %v1884_v44 = vsel %vm232_vm1, %v1882_v42, 0.0 }
0x10fe   :  { %1885 = vadd.xlane.f32.xlu0 %v1884_v44 }
0x10ff   :  { %v1883_v45 = vmul.f32 %v1881_v43, %v1881_v43 }
0x1101   :  { %v1887_v19 = vsel %vm232_vm1, %v1883_v45, 0.0 }
0x1102   :  { %1888 = vadd.xlane.f32.xlu1 %v1887_v19 }
0x1187   :  { %v1886_v47 = vpop.xlane.xlu0 %1885 }
0x1188   :  { %v1890_v52 = vmul.f32 0.03125, %v1886_v47 }
0x118a   :  { %v1892_v53 = vadd.f32 1e-06, %v1890_v52 }
0x118b   :  { %v1889_v54 = vpop.xlane.xlu1 %1888 }
0x118c   :  { %4446 = vrsqrt.f32 %v1892_v53  ;;  %v1891_v49 = vmul.f32 0.03125, %v1889_v54  ;;  %v4336_v53 = vld [vmem:[%s5718_s8 + $0x168] sm:$0xff]   ;;  %v4337_v54 = vld [vmem:[%s5718_s8 + $0x160] sm:$0xff]  }
0x118e   :  { %v1893_v26 = vadd.f32 1e-06, %v1891_v49  ;;  %v2174_v49 = vld [vmem:[%s5712_s2] sm:$0xff] }
0x1190   :  { %4448 = vrsqrt.f32 %v1893_v26  ;;  %v2175_v26 = vld [vmem:[%s5712_s2 + $0x8] sm:$0xff] }
0x1199   :  { %v4447_v56 = vpop.eup %4446 }
0x119a   :  { %v1896_v57 = vmul.f32 %v4447_v56, %v1880_v38  ;;  %v2234_v56 = vsel %vm232_vm1, %v2174_v49, 0.0 }
0x119b   :  { %2235 = vadd.xlane.f32.xlu1 %v2234_v56 }
0x119c   :  { %v1902_v62 = vmul.f32 %v1901_v58, %v1896_v57  ;;  %v2240_v57 = vsel %vm232_vm1, %v2175_v26, 0.0 }
0x119d   :  { %v4449_v59 = vpop.eup %4448 }
0x119e   :  { %v1897_v51 = vmul.f32 %v4449_v59, %v1881_v43  ;;  %v1908_v1 = vadd.f32 %v1907_v61, %v1902_v62 }
0x119f   :  { %2241 = vadd.xlane.f32.xlu1 %v2240_v57 }
0x11a0   :  { %v1903_v0 = vmul.f32 %v1901_v58, %v1897_v51 }
0x11a2   :  { %v1909_v2 = vadd.f32 %v1907_v61, %v1903_v0  ;;  %v2105_v61 = vrot.slane %v5039_v63, %v4954_v60 }
0x11a4   :  { %v1914_v3 = vpack.c.bf16 %v1909_v2, %v1908_v1 }
0x11a6   :  { %4125 = vmatmul.mubr.msk.bf16.vlgmr.msra.gmra.mxu1 %vm232_vm1, %v1914_v3 }
0x11a7   :  { %4152 = vmatprep.mubr.msk.bf16.mxu1 %vm4596_vm2, %v4595_v40  ;;  %4149 = vmatpush3.bf16.msra.mxu1 %v4336_v53 }
0x11a8   :  { %4150 = vmatprep.subr.bf16.mxu1 %v4595_v40 }
0x11ab   :  { %4151 = vmatpush3.bf16.msra.mxu1 %v4337_v54 }
0x1224   :  { %v2236_v4 = vpop.xlane.xlu1 %2235 }
0x1225   :  { %v2244_v17 = vmul.f32 0.03125, %v2236_v4 }
0x1227   :  { %v2248_v5 = vsub.f32 %v2174_v49, %v2244_v17 }
0x1228   :  { %v2242_v6 = vpop.xlane.xlu1 %2241 }
0x1229   :  { %v2246_v7 = vmul.f32 0.03125, %v2242_v6  ;;  %v2252_v8 = vmul.f32 %v2248_v5, %v2248_v5 }
0x122b   :  { %v2250_v9 = vsub.f32 %v2175_v26, %v2246_v7 }
0x122d   :  { %v2254_v63 = vmul.f32 %v2250_v9, %v2250_v9 }
0x122f   :  { %v2264_v11 = vsel %vm232_vm1, %v2254_v63, 0.0 }
0x1266   :  { %v1969_v12 = vpop.f32.mrf.mxu1 }
0x1267   :  { %v1970_v13 = vadd.f32 %v3786_v10, %v1969_v12 }
0x1268   :  { %v4126_v41 = vpop.f32.mrf.mxu1 }
0x1269   :  { %v1976_v16 = vmul.f32 %v1970_v13, %v1970_v13 }
0x126a   :  { %v1972_v18 = vpop.f32.mrf.mxu1 }
0x126b   :  { %v1978_v20 = vmul.f32 %v1976_v16, %v1970_v13  ;;  %v1973_v23 = vadd.f32 %v3786_v10, %v1972_v18 }
0x126c   :  { %v4127_v24 = vpop.f32.mrf.mxu1 }
0x126d   :  { %v1980_v25 = vmul.f32 0.044715, %v1978_v20  ;;  %v1977_v28 = vmul.f32 %v1973_v23, %v1973_v23 }
0x126f   :  { %v1982_v30 = vadd.f32 %v1980_v25, %v1970_v13  ;;  %v1979_v32 = vmul.f32 %v1977_v28, %v1973_v23 }
0x1271   :  { %v1984_v36 = vmul.f32 0.7978846, %v1982_v30  ;;  %v1981_v38 = vmul.f32 0.044715, %v1979_v32 }
0x1273   :  { %4450 = vtanh.f32 %v1984_v36  ;;  %v1983_v35 = vadd.f32 %v1981_v38, %v1973_v23 }
0x1275   :  { %v1985_v39 = vmul.f32 0.7978846, %v1983_v35 }
0x1277   :  { %4452 = vtanh.f32 %v1985_v39 }
0x1280   :  { %v4451_v42 = vpop.eup %4450 }
0x1281   :  { %v1988_v43 = vadd.f32 1.0, %v4451_v42 }
0x1283   :  { %v1990_v45 = vmul.f32 0.5, %v1988_v43  ;;  %v4338_v43 = vld [vmem:[%s5718_s8 + $0x178] sm:$0xff]  }
0x1284   :  { %v4453_v44 = vpop.eup %4452  ;;  %4156 = vmatprep.subr.bf16.mxu1 %v4338_v43 }
0x1285   :  { %v1989_v19 = vadd.f32 1.0, %v4453_v44  ;;  %v1992_v46 = vmul.f32 %v1990_v45, %v1970_v13  ;;  %v4339_v44 = vld [vmem:[%s5718_s8 + $0x170] sm:$0xff]   ;;  %v4340_v45 = vld [vmem:[%s5718_s8 + $0x188] sm:$0xff]  }
0x1287   :  { %v1991_v21 = vmul.f32 0.5, %v1989_v19 }
0x1289   :  { %v1993_v47 = vmul.f32 %v1991_v21, %v1973_v23 }
0x128b   :  { %v2010_v52 = vpack.c.bf16 %v1993_v47, %v1992_v46 }
0x128d   :  { %4145 = vmatmul.mubr.bf16.vlgmr.msra.gmra.mxu0 %v2010_v52 }
0x134d   :  { %v2093_v40 = vpop.f32.mrf.mxu0 }
0x134e   :  { %v2100_v59 = vadd.f32 %v2093_v40, %v5123_v22  ;;  %v2258_v22 = vsel %vm232_vm1, %v2252_v8, 0.0 }
0x134f   :  { %v4146_v58 = vpop.f32.mrf.mxu0  ;;  %2259 = vadd.xlane.f32.xlu1 %v2258_v22 }
0x1350   :  { %v2106_v1 = vadd.f32 %v2105_v61, %v2100_v59  ;;  %v2176_v59 = vld [vmem:[%s5720_s10 + $0x20] sm:$0x3f] }
0x1351   :  { %v2096_v51 = vpop.f32.mrf.mxu0  ;;  %v2294_v4 = vrot.slane %v2176_v59, %v4756_v55 }
0x1352   :  { %v2101_v62 = vadd.f32 %v2096_v51, %v5128_v29  ;;  %v3798_v29 = vld [vmem:[%s5720_s10 + $0x30] ss:$0 sm:$0xff]  ;;  %v2286_v51 = vrot.slane %v2176_v59, %v4746_v50 }
0x1353   :  { %v4147_v0 = vpop.f32.mrf.mxu0  ;;  %2265 = vadd.xlane.f32.xlu1 %v2264_v11 }
0x1354   :  { %v2107_v2 = vadd.f32 %v2105_v61, %v2101_v62 }
0x1356   :  { %v2112_v3 = vpack.c.bf16 %v2107_v2, %v2106_v1 }
0x1358   :  { %4153 = vmatmul.mubr.msk.bf16.vlgmr.msra.gmra.mxu1 %vm232_vm1, %v2112_v3 }
0x1359   :  { %4157 = vmatpush3.bf16.msra.mxu1 %v4338_v43 }
0x135a   :  { %4158 = vmatprep.subr.bf16.mxu1 %v4339_v44 }
0x135d   :  { %4159 = vmatpush3.bf16.msra.mxu1 %v4339_v44 }
0x135e   :  { %4164 = vmatprep.subr.bf16.mxu1 %v4340_v45 }
0x13d8   :  { %v2260_v19 = vpop.xlane.xlu1 %2259 }
0x13d9   :  { %v2268_v21 = vmul.f32 0.03125, %v2260_v19 }
0x13db   :  { %v2272_v47 = vadd.f32 1e-05, %v2268_v21 }
0x13dc   :  { %v2266_v46 = vpop.xlane.xlu1 %2265 }
0x13dd   :  { %v2270_v52 = vmul.f32 0.03125, %v2266_v46  ;;  %4454 = vrsqrt.f32 %v2272_v47 }
0x13df   :  { %v2274_v53 = vadd.f32 1e-05, %v2270_v52 }
0x13e1   :  { %4456 = vrsqrt.f32 %v2274_v53 }
0x13ea   :  { %v4455_v58 = vpop.eup %4454 }
0x13eb   :  { %v2280_v61 = vmul.f32 %v4455_v58, %v2248_v5 }
0x13ed   :  { %v2288_v3 = vmul.f32 %v2286_v51, %v2280_v61 }
0x13ee   :  { %v4457_v62 = vpop.eup %4456 }
0x13ef   :  { %v2282_v1 = vmul.f32 %v4457_v62, %v2250_v9  ;;  %v2296_v22 = vadd.f32 %v2294_v4, %v2288_v3  ;;  %v4341_v9 = vld [vmem:[%s5718_s8 + $0x180] sm:$0xff]  }
0x13f1   :  { %v2290_v63 = vmul.f32 %v2286_v51, %v2282_v1 }
0x1418   :  { %v2167_v10 = vpop.f32.mrf.mxu1 }
0x1419   :  { %v5210_v12 = vadd.f32 %v3798_v29, %v2167_v10  ;;  %v2298_v10 = vadd.f32 %v2294_v4, %v2290_v63 }
0x141a   :  { %v4154_v13 = vpop.f32.mrf.mxu1 }
0x141b   :  { %v2231_v41 = vsel %vm232_vm1, %v5210_v12, 0.0 }
0x141c   :  { %2232 = vadd.xlane.f32.xlu0 %v2231_v41  ;;  %v2170_v16 = vpop.f32.mrf.mxu1  ;;  %v4342_v41 = vld [vmem:[%s5718_s8 + $0x198] sm:$0xff]  }
0x141d   :  { %v5214_v18 = vadd.f32 %v3798_v29, %v2170_v16  ;;  %v4343_v16 = vld [vmem:[%s5718_s8 + $0x190] sm:$0xff]  }
0x141e   :  { %v4155_v20 = vpop.f32.mrf.mxu1 }
0x141f   :  { %v2237_v23 = vsel %vm232_vm1, %v5214_v18, 0.0  ;;  %v5254_v20 = vld [vmem:[%s5720_s10 + $0x28] sm:$0x1f] }
0x1420   :  { %2238 = vadd.xlane.f32.xlu0 %v2237_v23  ;;  %v2304_v23 = vrot.slane %v5254_v20, %v4746_v50  ;;  %v2375_v44 = vrot.slane %v5254_v20, %v4756_v55 }
0x14a5   :  { %v2233_v24 = vpop.xlane.xlu0 %2232 }
0x14a6   :  { %v2243_v25 = vmul.f32 0.03125, %v2233_v24 }
0x14a8   :  { %v2247_v28 = vsub.f32 %v5210_v12, %v2243_v25 }
0x14a9   :  { %v2239_v30 = vpop.xlane.xlu0 %2238 }
0x14aa   :  { %v2245_v32 = vmul.f32 0.03125, %v2239_v30  ;;  %v2251_v36 = vmul.f32 %v2247_v28, %v2247_v28 }
0x14ac   :  { %v2249_v38 = vsub.f32 %v5214_v18, %v2245_v32  ;;  %v2255_v35 = vsel %vm232_vm1, %v2251_v36, 0.0 }
0x14ad   :  { %2256 = vadd.xlane.f32.xlu0 %v2255_v35 }
0x14ae   :  { %v2253_v39 = vmul.f32 %v2249_v38, %v2249_v38 }
0x14b0   :  { %v2261_v42 = vsel %vm232_vm1, %v2253_v39, 0.0 }
0x14b1   :  { %2262 = vadd.xlane.f32.xlu0 %v2261_v42 }
0x1536   :  { %v2257_v54 = vpop.xlane.xlu0 %2256 }
0x1537   :  { %v2267_v49 = vmul.f32 0.03125, %v2257_v54 }
0x1539   :  { %v2271_v26 = vadd.f32 1e-05, %v2267_v49 }
0x153a   :  { %v2263_v56 = vpop.xlane.xlu0 %2262 }
0x153b   :  { %4458 = vrsqrt.f32 %v2271_v26  ;;  %v2269_v57 = vmul.f32 0.03125, %v2263_v56 }
0x153d   :  { %v2273_v40 = vadd.f32 1e-05, %v2269_v57 }
0x153f   :  { %4460 = vrsqrt.f32 %v2273_v40  ;;  %v2440_v40 = vrot.slane %v5254_v20, %v4805_v31 }
0x1548   :  { %v4459_v0 = vpop.eup %4458 }
0x1549   :  { %v2279_v2 = vmul.f32 %v4459_v0, %v2247_v28 }
0x154b   :  { %v2287_v17 = vmul.f32 %v2286_v51, %v2279_v2 }
0x154c   :  { %v4461_v6 = vpop.eup %4460 }
0x154d   :  { %v2281_v7 = vmul.f32 %v4461_v6, %v2249_v38  ;;  %v2295_v8 = vadd.f32 %v2294_v4, %v2287_v17 }
0x154f   :  { %v2299_v11 = vpack.c.bf16 %v2296_v22, %v2295_v8  ;;  %v2289_v29 = vmul.f32 %v2286_v51, %v2281_v7 }
0x1551   :  { %4160 = vmatprep.mubr.msk.bf16.mxu1 %vm232_vm1, %v2299_v11  ;;  %v2297_v5 = vadd.f32 %v2294_v4, %v2289_v29 }
0x1553   :  { %v2300_v13 = vpack.c.bf16 %v2298_v10, %v2297_v5 }
0x1555   :  { %4161 = vmatmul.mubr.msk.bf16.vlgmr.msra.gmra.mxu1 %vm232_vm1, %v2300_v13 }
0x1556   :  { %4165 = vmatpush3.bf16.msra.mxu1 %v4340_v45  ;;  %4168 = vmatprep.mubr.msk.bf16.mxu1 %vm232_vm1, %v2299_v11 }
0x1557   :  { %4166 = vmatprep.subr.bf16.mxu1 %v4341_v9 }
0x155a   :  { %4167 = vmatpush3.bf16.msra.mxu1 %v4341_v9 }
0x155b   :  { %4172 = vmatprep.subr.bf16.mxu1 %v4342_v41 }
0x155d   :  { %4169 = vmatmul.mubr.msk.bf16.vlgmr.msra.gmra.mxu1 %vm232_vm1, %v2300_v13 }
0x155e   :  { %4173 = vmatpush3.bf16.msra.mxu1 %v4342_v41  ;;  %4176 = vmatprep.mubr.msk.bf16.mxu1 %vm232_vm1, %v2299_v11 }
0x155f   :  { %4174 = vmatprep.subr.bf16.mxu1 %v4343_v16 }
0x1562   :  { %4175 = vmatpush3.bf16.msra.mxu1 %v4343_v16 }
0x1565   :  { %4177 = vmatmul.mubr.msk.bf16.vlgmr.msra.gmra.mxu1 %vm232_vm1, %v2300_v13 }
0x1615   :  { %v4162_v24 = vpop.f32.mrf.mxu1 }
0x1616   :  { %v5258_v28 = vadd.f32 %v4162_v24, %v2304_v23 }
0x1617   :  { %v2357_v25 = vpop.f32.mrf.mxu1 }
0x1618   :  { %v2358_v36 = vadd.f32 %v2357_v25, %v2304_v23  ;;  %v2510_v35 = vmul.f32 %v5258_v28, %v4794_v14  ;;  %v2512_v1 = vmul.f32 %v5258_v28, %v4797_v15  ;;  %v2514_v17 = vmul.f32 %v5258_v28, %v4808_v33 }
0x1619   :  { %v4163_v30 = vpop.f32.mrf.mxu1 }
0x161a   :  { %v2369_v32 = vadd.f32 %v4163_v30, %v2304_v23  ;;  %v2502_v50 = vmul.f32 %v2358_v36, %v4794_v14  ;;  %v2504_v6 = vmul.f32 %v2358_v36, %v4797_v15  ;;  %v2506_v5 = vmul.f32 %v2358_v36, %v4808_v33 }
0x161b   :  { %v2360_v38 = vpop.f32.mrf.mxu1  ;;  %v2508_v25 = vmul.f32 %v2358_v36, %v4811_v34 }
0x161c   :  { %v2511_v39 = vmul.f32 %v2369_v32, %v4794_v14  ;;  %v2361_v42 = vadd.f32 %v2360_v38, %v2304_v23  ;;  %v2513_v61 = vmul.f32 %v2369_v32, %v4797_v15  ;;  %v2515_v62 = vmul.f32 %v2369_v32, %v4808_v33 }
0x161d   :  { %v4170_v43 = vpop.f32.mrf.mxu1  ;;  %v2517_v16 = vmul.f32 %v2369_v32, %v4811_v34  ;;  %v2516_v23 = vmul.f32 %v5258_v28, %v4811_v34  ;;  %v2225_v32 = vld [vmem:[%s5713_s3 + $0x50] sm:$0xff] }
0x161e   :  { %v2522_v45 = vpack.c.bf16 %v2511_v39, %v2510_v35  ;;  %v2503_v19 = vmul.f32 %v2361_v42, %v4794_v14  ;;  %v2431_v52 = vadd.f32 %v4170_v43, %v2375_v44  ;;  %v2505_v2 = vmul.f32 %v2361_v42, %v4797_v15  ;;  %v2217_v39 = vld [vmem:[%s5713_s3 + $0x10] sm:$0xff]  ;;  %v2226_v43 = vld [vmem:[%s5713_s3 + $0x58] sm:$0xff] }
0x161f   :  { %v2422_v21 = vpop.f32.mrf.mxu1  ;;  %v2507_v7 = vmul.f32 %v2361_v42, %v4808_v33  ;;  %v2523_v22 = vpack.c.bf16 %v2513_v61, %v2512_v1  ;;  %v2524_v10 = vpack.c.bf16 %v2515_v62, %v2514_v17  ;;  %v2509_v24 = vmul.f32 %v2361_v42, %v4811_v34  ;;  %v2216_v1 = vld [vmem:[%s5713_s3 + $0x8] sm:$0xff] }
0x1620   :  { %4192 = vmatprep.mubr.msk.bf16.mxu1 %vm232_vm1, %v2522_v45  ;;  %v2518_v47 = vpack.c.bf16 %v2503_v19, %v2502_v50  ;;  %v2423_v49 = vadd.f32 %v2422_v21, %v2375_v44  ;;  %v2519_v13 = vpack.c.bf16 %v2505_v2, %v2504_v6  ;;  %v2525_v30 = vpack.c.bf16 %v2517_v16, %v2516_v23  ;;  %v2223_v50 = vld [vmem:[%s5713_s3 + $0x40] sm:$0xff]  ;;  %v2221_v2 = vld [vmem:[%s5713_s3 + $0x30] sm:$0xff]  ;;  %v2228_v23 = vld [vmem:[%s5713_s3 + $0x68] sm:$0xff] }
0x1621   :  { %v4171_v46 = vpop.f32.mrf.mxu1  ;;  %v2520_v41 = vpack.c.bf16 %v2507_v7, %v2506_v5  ;;  %v2521_v38 = vpack.c.bf16 %v2509_v24, %v2508_v25 }
0x1622   :  { %v2434_v53 = vadd.f32 %v4171_v46, %v2375_v44  ;;  %4182 = vmatprep.mubr.msk.bf16.mxu0 %vm232_vm1, %v2518_v47  ;;  %v2218_v46 = vld [vmem:[%s5713_s3 + $0x18] sm:$0xff] }
0x1623   :  { %v2425_v54 = vpop.f32.mrf.mxu1 }
0x1624   :  { %v2527_v26 = vpack.c.bf16 %v2434_v53, %v2431_v52  ;;  %v2426_v56 = vadd.f32 %v2425_v54, %v2375_v44 }
0x1625   :  { %v4178_v57 = vpop.f32.mrf.mxu1 }
0x1626   :  { %v2526_v55 = vpack.c.bf16 %v2426_v56, %v2423_v49  ;;  %4273 = vmatprep.subr.msk.bf16.mxu1 %vm232_vm1, %v2527_v26  ;;  %v2623_v58 = vsel %vm232_vm1, %v2527_v26, 0  ;;  %v2496_v3 = vadd.f32 %v4178_v57, %v2440_v40  ;;  %v2215_v57 = vld [vmem:[%s5713_s3] sm:$0xff] }
0x1627   :  { %v2487_v59 = vpop.f32.mrf.mxu1  ;;  %4191 = vmatpush3.bf16.xpose.msra.mxu1 %v2623_v58 }
0x1628   :  { %4272 = vmatprep.subr.msk.bf16.mxu0 %vm232_vm1, %v2526_v55  ;;  %v2543_v51 = vsel %vm232_vm1, %v2526_v55, 0  ;;  %v2488_v63 = vadd.f32 %v2487_v59, %v2440_v40  ;;  %v2224_v55 = vld [vmem:[%s5713_s3 + $0x48] sm:$0xff] }
0x1629   :  { %v4179_v0 = vpop.f32.mrf.mxu1  ;;  %4181 = vmatpush3.bf16.xpose.msra.mxu0 %v2543_v51 }
0x162a   :  { %v2499_v4 = vadd.f32 %v4179_v0, %v2440_v40 }
0x162b   :  { %v2490_v8 = vpop.f32.mrf.mxu1 }
0x162c   :  { %v2529_v11 = vpack.c.bf16 %v2499_v4, %v2496_v3  ;;  %v2491_v29 = vadd.f32 %v2490_v8, %v2440_v40 }
0x162e   :  { %v2528_v9 = vpack.c.bf16 %v2491_v29, %v2488_v63  ;;  %4193 = vmatmul.mubr.msk.bf16.vlgmr.msra.gmra.mxu1 %vm232_vm1, %v2523_v22  ;;  %4210 = vmatprep.subr.bf16.mxu1 %v2529_v11  ;;  %v2227_v22 = vld [vmem:[%s5713_s3 + $0x60] sm:$0xff] }
0x162f   :  { %4196 = vmatprep.mubr.msk.bf16.mxu1 %vm232_vm1, %v2524_v10  ;;  %4211 = vmatpush3.bf16.msra.mxu1 %v2529_v11  ;;  %v2222_v11 = vld [vmem:[%s5713_s3 + $0x38] sm:$0xff] }
0x1630   :  { %4183 = vmatmul.mubr.msk.bf16.vlgmr.msra.gmra.mxu0 %vm232_vm1, %v2519_v13  ;;  %4200 = vmatprep.subr.bf16.mxu0 %v2528_v9 }
0x1631   :  { %4186 = vmatprep.mubr.msk.bf16.mxu0 %vm232_vm1, %v2520_v41  ;;  %4201 = vmatpush3.bf16.msra.mxu0 %v2528_v9  ;;  %v2219_v41 = vld [vmem:[%s5713_s3 + $0x20] sm:$0xff] }
0x1636   :  { %4197 = vmatmul.mubr.msk.bf16.gmra.mxu1 %vm232_vm1, %v2525_v30 }
0x1638   :  { %4187 = vmatmul.mubr.msk.bf16.gmra.mxu0 %vm232_vm1, %v2521_v38 }
0x16ee   :  { %v4194_v35 = vpop.f32.mrf.mxu1 }
0x16ef   :  { %v5302_v28 = vadd.f32 %v4194_v35, %v2225_v32  ;;  %v2229_v32 = vld [vmem:[%s5713_s3 + $0x70] sm:$0xff] }
0x16f0   :  { %v4184_v42 = vpop.f32.mrf.mxu0  ;;  %v2659_v36 = vpop.f32.mrf.mxu1 }
0x16f1   :  { %v5307_v44 = vadd.f32 %v4184_v42, %v2217_v39  ;;  %v2721_v45 = vsel %vm2690_vm5, %v5302_v28, -inf  ;;  %v5319_v54 = vadd.f32 %v2659_v36, %v2223_v50  ;;  %v2220_v39 = vld [vmem:[%s5713_s3 + $0x28] sm:$0xff]  ;;  %v2230_v50 = vld [vmem:[%s5713_s3 + $0x78] sm:$0xff] }
0x16f2   :  { %2722 = vmax.xlane.f32.xlu0 %v2721_v45  ;;  %v2579_v19 = vpop.f32.mrf.mxu0  ;;  %v4195_v21 = vpop.f32.mrf.mxu1 }
0x16f3   :  { %v5317_v47 = vadd.f32 %v4195_v21, %v2226_v43  ;;  %v2697_v56 = vsel %vm2690_vm5, %v5307_v44, -inf  ;;  %v5333_v61 = vadd.f32 %v2579_v19, %v2215_v57  ;;  %v2715_v62 = vsel %vm2690_vm5, %v5319_v54, -inf }
0x16f4   :  { %v4185_v52 = vpop.f32.mrf.mxu0  ;;  %v2662_v53 = vpop.f32.mrf.mxu1 }
0x16f5   :  { %v5321_v49 = vadd.f32 %v4185_v52, %v2218_v46  ;;  %v2724_v26 = vsel %vm2690_vm5, %v5317_v47, -inf  ;;  %v5335_v51 = vadd.f32 %v2662_v53, %v2224_v55  ;;  %v2691_v8 = vsel %vm2690_vm5, %v5333_v61, -inf }
0x16f6   :  { %2725 = vmax.xlane.f32.xlu1 %v2724_v26  ;;  %v4198_v40 = vpop.f32.mrf.mxu1  ;;  %2698 = vmax.xlane.f32.xlu0 %v2697_v56  ;;  %v2582_v58 = vpop.f32.mrf.mxu0 }
0x16f7   :  { %v2700_v0 = vsel %vm2690_vm5, %v5321_v49, -inf  ;;  %v5347_v17 = vadd.f32 %v2582_v58, %v2216_v1  ;;  %v2718_v7 = vsel %vm2690_vm5, %v5335_v51, -inf  ;;  %v5389_v42 = vadd.f32 %v4198_v40, %v2229_v32 }
0x16f8   :  { %v4188_v59 = vpop.f32.mrf.mxu0  ;;  %v2675_v3 = vpop.f32.mrf.mxu1 }
0x16f9   :  { %v5349_v6 = vadd.f32 %v4188_v59, %v2221_v2  ;;  %v5361_v5 = vadd.f32 %v2675_v3, %v2227_v22  ;;  %v2694_v13 = vsel %vm2690_vm5, %v5347_v17, -inf  ;;  %v2733_v46 = vsel %vm2690_vm5, %v5389_v42, -inf }
0x16fa   :  { %2716 = vmax.xlane.f32.xlu0 %v2715_v62  ;;  %2701 = vmax.xlane.f32.xlu1 %v2700_v0  ;;  %v2595_v4 = vpop.f32.mrf.mxu0  ;;  %v4199_v63 = vpop.f32.mrf.mxu1 }
0x16fb   :  { %v2709_v9 = vsel %vm2690_vm5, %v5349_v6, -inf  ;;  %v5375_v24 = vadd.f32 %v2595_v4, %v2219_v41  ;;  %v2727_v38 = vsel %vm2690_vm5, %v5361_v5, -inf  ;;  %v5400_v19 = vadd.f32 %v4199_v63, %v2230_v50 }
0x16fc   :  { %v4189_v29 = vpop.f32.mrf.mxu0  ;;  %v2678_v16 = vpop.f32.mrf.mxu1 }
0x16fd   :  { %v5363_v10 = vadd.f32 %v4189_v29, %v2222_v11  ;;  %v5377_v25 = vadd.f32 %v2678_v16, %v2228_v23  ;;  %v2703_v45 = vsel %vm2690_vm5, %v5375_v24, -inf  ;;  %v2736_v52 = vsel %vm2690_vm5, %v5400_v19, -inf }
0x16fe   :  { %2719 = vmax.xlane.f32.xlu1 %v2718_v7  ;;  %2692 = vmax.xlane.f32.xlu0 %v2691_v8  ;;  %v2598_v35 = vpop.f32.mrf.mxu0 }
0x16ff   :  { %v2712_v30 = vsel %vm2690_vm5, %v5363_v10, -inf  ;;  %v5391_v36 = vadd.f32 %v2598_v35, %v2220_v39  ;;  %v2730_v43 = vsel %vm2690_vm5, %v5377_v25, -inf }
0x1701   :  { %v2706_v21 = vsel %vm2690_vm5, %v5391_v36, -inf }
0x1702   :  { %2695 = vmax.xlane.f32.xlu1 %v2694_v13  ;;  %2710 = vmax.xlane.f32.xlu0 %v2709_v9 }
0x1706   :  { %2713 = vmax.xlane.f32.xlu1 %v2712_v30  ;;  %2728 = vmax.xlane.f32.xlu0 %v2727_v38 }
0x170a   :  { %2731 = vmax.xlane.f32.xlu1 %v2730_v43  ;;  %2704 = vmax.xlane.f32.xlu0 %v2703_v45 }
0x170e   :  { %2707 = vmax.xlane.f32.xlu1 %v2706_v21  ;;  %2734 = vmax.xlane.f32.xlu0 %v2733_v46 }
0x1712   :  { %2737 = vmax.xlane.f32.xlu1 %v2736_v52 }
0x177b   :  { %v2723_v53 = vpop.xlane.xlu0 %2722 }
0x177c   :  { %v2749_v26 = vsub.f32 %v5302_v28, %v2723_v53 }
0x177e   :  { %v2775_v56 = vmul.f32 1.442695, %v2749_v26 }
0x177f   :  { %v2726_v57 = vpop.xlane.xlu1 %2725  ;;  %v2699_v55 = vpop.xlane.xlu0 %2698 }
0x1780   :  { %4462 = vpow2.f32 %v2775_v56  ;;  %v2750_v40 = vsub.f32 %v5317_v47, %v2726_v57  ;;  %v2741_v58 = vsub.f32 %v5307_v44, %v2699_v55 }
0x1782   :  { %v2777_v59 = vmul.f32 1.442695, %v2750_v40  ;;  %v2759_v62 = vmul.f32 1.442695, %v2741_v58 }
0x1783   :  { %v2717_v0 = vpop.xlane.xlu0 %2716  ;;  %v2702_v1 = vpop.xlane.xlu1 %2701 }
0x1784   :  { %4464 = vpow2.f32 %v2777_v59  ;;  %v2747_v2 = vsub.f32 %v5319_v54, %v2717_v0  ;;  %v2742_v3 = vsub.f32 %v5321_v49, %v2702_v1 }
0x1785   :  { %4466 = vpow2.f32 %v2759_v62 }
0x1786   :  { %v2771_v4 = vmul.f32 1.442695, %v2747_v2  ;;  %v2761_v28 = vmul.f32 1.442695, %v2742_v3 }
0x1787   :  { %v2720_v7 = vpop.xlane.xlu1 %2719  ;;  %v2693_v8 = vpop.xlane.xlu0 %2692 }
0x1788   :  { %4468 = vpow2.f32 %v2771_v4  ;;  %v2748_v22 = vsub.f32 %v5335_v51, %v2720_v7  ;;  %v2739_v47 = vsub.f32 %v5333_v61, %v2693_v8 }
0x1789   :  { %4470 = vpow2.f32 %v2761_v28 }
0x178a   :  { %v2773_v44 = vmul.f32 1.442695, %v2748_v22  ;;  %v2755_v63 = vmul.f32 1.442695, %v2739_v47 }
0x178b   :  { %v2696_v11 = vpop.xlane.xlu1 %2695  ;;  %v2711_v29 = vpop.xlane.xlu0 %2710 }
0x178c   :  { %4472 = vpow2.f32 %v2773_v44  ;;  %v2740_v54 = vsub.f32 %v5347_v17, %v2696_v11  ;;  %v2745_v49 = vsub.f32 %v5349_v6, %v2711_v29 }
0x178d   :  { %v5417_v13 = vpop.eup %4462  ;;  %4474 = vpow2.f32 %v2755_v63 }
0x178e   :  { %v2757_v9 = vmul.f32 1.442695, %v2740_v54  ;;  %v2767_v41 = vmul.f32 1.442695, %v2745_v49  ;;  %v2817_v51 = vsel %vm2690_vm5, %v5417_v13, 0.0 }
0x178f   :  { %v2714_v16 = vpop.xlane.xlu1 %2713  ;;  %2818 = vadd.xlane.f32.xlu0 %v2817_v51  ;;  %v2729_v61 = vpop.xlane.xlu0 %2728 }
0x1790   :  { %4476 = vpow2.f32 %v2757_v9  ;;  %v2746_v23 = vsub.f32 %v5363_v10, %v2714_v16  ;;  %v2751_v30 = vsub.f32 %v5361_v5, %v2729_v61 }
0x1791   :  { %v5423_v38 = vpop.eup %4464  ;;  %4478 = vpow2.f32 %v2767_v41 }
0x1792   :  { %v5425_v17 = vpop.eup %4466  ;;  %v2769_v6 = vmul.f32 1.442695, %v2746_v23  ;;  %v2779_v32 = vmul.f32 1.442695, %v2751_v30  ;;  %v2820_v35 = vsel %vm2690_vm5, %v5423_v38, 0.0 }
0x1793   :  { %2821 = vadd.xlane.f32.xlu1 %v2820_v35  ;;  %v2732_v39 = vpop.xlane.xlu1 %2731  ;;  %v2793_v43 = vsel %vm2690_vm5, %v5425_v17, 0.0  ;;  %v2705_v45 = vpop.xlane.xlu0 %2704 }
0x1794   :  { %4480 = vpow2.f32 %v2769_v6  ;;  %v2752_v10 = vsub.f32 %v5377_v25, %v2732_v39  ;;  %2794 = vadd.xlane.f32.xlu0 %v2793_v43  ;;  %v2743_v5 = vsub.f32 %v5375_v24, %v2705_v45 }
0x1795   :  { %v5433_v50 = vpop.eup %4468  ;;  %4482 = vpow2.f32 %v2779_v32 }
0x1796   :  { %v5435_v21 = vpop.eup %4470  ;;  %v2781_v46 = vmul.f32 1.442695, %v2752_v10  ;;  %v2763_v52 = vmul.f32 1.442695, %v2743_v5  ;;  %v2811_v53 = vsel %vm2690_vm5, %v5433_v50, 0.0 }
0x1797   :  { %v2796_v26 = vsel %vm2690_vm5, %v5435_v21, 0.0  ;;  %v2708_v56 = vpop.xlane.xlu1 %2707  ;;  %v2735_v57 = vpop.xlane.xlu0 %2734 }
0x1798   :  { %4484 = vpow2.f32 %v2781_v46  ;;  %2797 = vadd.xlane.f32.xlu1 %v2796_v26  ;;  %v2744_v25 = vsub.f32 %v5391_v36, %v2708_v56  ;;  %2812 = vadd.xlane.f32.xlu0 %v2811_v53  ;;  %v2753_v24 = vsub.f32 %v5389_v42, %v2735_v57 }
0x1799   :  { %v5443_v55 = vpop.eup %4472  ;;  %4486 = vpow2.f32 %v2763_v52 }
0x179a   :  { %v5445_v40 = vpop.eup %4474  ;;  %v2765_v58 = vmul.f32 1.442695, %v2744_v25  ;;  %v2783_v59 = vmul.f32 1.442695, %v2753_v24  ;;  %v2814_v62 = vsel %vm2690_vm5, %v5443_v55, 0.0 }
0x179b   :  { %v2738_v0 = vpop.xlane.xlu1 %2737  ;;  %v2787_v1 = vsel %vm2690_vm5, %v5445_v40, 0.0 }
0x179c   :  { %4488 = vpow2.f32 %v2765_v58  ;;  %2815 = vadd.xlane.f32.xlu1 %v2814_v62  ;;  %v2754_v36 = vsub.f32 %v5400_v19, %v2738_v0  ;;  %2788 = vadd.xlane.f32.xlu0 %v2787_v1 }
0x179d   :  { %v5452_v42 = vpop.eup %4476  ;;  %4490 = vpow2.f32 %v2783_v59 }
0x179e   :  { %v5454_v2 = vpop.eup %4478  ;;  %v2785_v3 = vmul.f32 1.442695, %v2754_v36  ;;  %v2790_v4 = vsel %vm2690_vm5, %v5452_v42, 0.0 }
0x179f   :  { %v2805_v28 = vsel %vm2690_vm5, %v5454_v2, 0.0 }
0x17a0   :  { %4492 = vpow2.f32 %v2785_v3  ;;  %2791 = vadd.xlane.f32.xlu1 %v2790_v4  ;;  %2806 = vadd.xlane.f32.xlu0 %v2805_v28 }
0x17a1   :  { %v5460_v7 = vpop.eup %4480 }
0x17a2   :  { %v5462_v8 = vpop.eup %4482  ;;  %v2808_v19 = vsel %vm2690_vm5, %v5460_v7, 0.0 }
0x17a3   :  { %v2823_v22 = vsel %vm2690_vm5, %v5462_v8, 0.0 }
0x17a4   :  { %2809 = vadd.xlane.f32.xlu1 %v2808_v19  ;;  %2824 = vadd.xlane.f32.xlu0 %v2823_v22 }
0x17a5   :  { %v5468_v47 = vpop.eup %4484 }
0x17a6   :  { %v5470_v44 = vpop.eup %4486  ;;  %v2826_v63 = vsel %vm2690_vm5, %v5468_v47, 0.0 }
0x17a7   :  { %v2799_v11 = vsel %vm2690_vm5, %v5470_v44, 0.0 }
0x17a8   :  { %2827 = vadd.xlane.f32.xlu1 %v2826_v63  ;;  %2800 = vadd.xlane.f32.xlu0 %v2799_v11 }
0x17a9   :  { %v5476_v29 = vpop.eup %4488 }
0x17aa   :  { %v5478_v54 = vpop.eup %4490  ;;  %v2802_v49 = vsel %vm2690_vm5, %v5476_v29, 0.0 }
0x17ab   :  { %v2829_v9 = vsel %vm2690_vm5, %v5478_v54, 0.0 }
0x17ac   :  { %2803 = vadd.xlane.f32.xlu1 %v2802_v49  ;;  %2830 = vadd.xlane.f32.xlu0 %v2829_v9 }
0x17ad   :  { %v5484_v41 = vpop.eup %4492 }
0x17ae   :  { %v2832_v51 = vsel %vm2690_vm5, %v5484_v41, 0.0 }
0x17b0   :  { %2833 = vadd.xlane.f32.xlu1 %v2832_v51 }
0x1818   :  { %v2819_v16 = vpop.xlane.xlu0 %2818 }
0x181c   :  { %v2822_v61 = vpop.xlane.xlu1 %2821 }
0x181d   :  { %v2795_v23 = vpop.xlane.xlu0 %2794  ;;  %4494 = vrcp.f32 %v2822_v61 }
0x1821   :  { %v2798_v30 = vpop.xlane.xlu1 %2797  ;;  %v2813_v6 = vpop.xlane.xlu0 %2812 }
0x1822   :  { %4496 = vrcp.f32 %v2813_v6 }
0x1823   :  { %4498 = vrcp.f32 %v2819_v16 }
0x1825   :  { %v2816_v32 = vpop.xlane.xlu1 %2815  ;;  %v2789_v35 = vpop.xlane.xlu0 %2788 }
0x1826   :  { %4500 = vrcp.f32 %v2816_v32 }
0x1827   :  { %4502 = vrcp.f32 %v2798_v30 }
0x1828   :  { %4504 = vrcp.f32 %v2789_v35 }
0x1829   :  { %4506 = vrcp.f32 %v2795_v23  ;;  %v2792_v39 = vpop.xlane.xlu1 %2791  ;;  %v2807_v43 = vpop.xlane.xlu0 %2806 }
0x182a   :  { %4508 = vrcp.f32 %v2792_v39  ;;  %v4495_v5 = vpop.eup %4494 }
0x182b   :  { %v2862_v57 = vmul.f32 %v4495_v5, %v5423_v38 }
0x182d   :  { %v2810_v45 = vpop.xlane.xlu1 %2809  ;;  %v2825_v10 = vpop.xlane.xlu0 %2824 }
0x182e   :  { %4510 = vrcp.f32 %v2825_v10 }
0x182f   :  { %v4497_v46 = vpop.eup %4496 }
0x1830   :  { %v4499_v26 = vpop.eup %4498  ;;  %v2859_v24 = vmul.f32 %v4497_v46, %v5433_v50 }
0x1831   :  { %v2828_v52 = vpop.xlane.xlu1 %2827  ;;  %v2801_v53 = vpop.xlane.xlu0 %2800  ;;  %v2861_v62 = vmul.f32 %v4499_v26, %v5417_v13 }
0x1832   :  { %4512 = vrcp.f32 %v2828_v52 }
0x1833   :  { %v4501_v56 = vpop.eup %4500  ;;  %4514 = vrcp.f32 %v2810_v45  ;;  %v2872_v28 = vpack.c.bf16 %v2862_v57, %v2861_v62 }
0x1834   :  { %v4503_v25 = vpop.eup %4502  ;;  %4516 = vrcp.f32 %v2801_v53  ;;  %v2860_v58 = vmul.f32 %v4501_v56, %v5443_v55 }
0x1835   :  { %v4505_v59 = vpop.eup %4504  ;;  %4518 = vrcp.f32 %v2807_v43  ;;  %v2804_v0 = vpop.xlane.xlu1 %2803  ;;  %v2854_v38 = vmul.f32 %v4503_v25, %v5435_v21 }
0x1836   :  { %v2831_v1 = vpop.xlane.xlu0 %2830  ;;  %v4507_v36 = vpop.eup %4506  ;;  %4520 = vrcp.f32 %v2804_v0  ;;  %v2871_v3 = vpack.c.bf16 %v2860_v58, %v2859_v24  ;;  %v2851_v50 = vmul.f32 %v4505_v59, %v5445_v40 }
0x1837   :  { %v4509_v4 = vpop.eup %4508  ;;  %4522 = vrcp.f32 %v2831_v1  ;;  %v2853_v19 = vmul.f32 %v4507_v36, %v5425_v17 }
0x1838   :  { %4212 = vmatprep.mubr.msk.bf16.mxu1 %vm2690_vm5, %v2871_v3  ;;  %v2852_v55 = vmul.f32 %v4509_v4, %v5452_v42 }
0x1839   :  { %v2834_v13 = vpop.xlane.xlu1 %2833  ;;  %4213 = vmatmul.mubr.msk.bf16.vlgmr.msra.gmra.mxu1 %vm2690_vm5, %v2872_v28  ;;  %v2868_v63 = vpack.c.bf16 %v2854_v38, %v2853_v19 }
0x183a   :  { %4524 = vrcp.f32 %v2834_v13  ;;  %v2867_v22 = vpack.c.bf16 %v2852_v55, %v2851_v50 }
0x183b   :  { %v4511_v11 = vpop.eup %4510 }
0x183c   :  { %4202 = vmatprep.mubr.msk.bf16.mxu0 %vm2690_vm5, %v2867_v22  ;;  %v2863_v9 = vmul.f32 %v4511_v11, %v5462_v8 }
0x183d   :  { %4203 = vmatmul.mubr.msk.bf16.vlgmr.msra.gmra.mxu0 %vm2690_vm5, %v2868_v63 }
0x183f   :  { %v4513_v21 = vpop.eup %4512 }
0x1840   :  { %v4515_v49 = vpop.eup %4514  ;;  %v2864_v40 = vmul.f32 %v4513_v21, %v5468_v47 }
0x1841   :  { %v4517_v42 = vpop.eup %4516  ;;  %v2858_v61 = vmul.f32 %v4515_v49, %v5460_v7 }
0x1842   :  { %v4519_v51 = vpop.eup %4518  ;;  %v2873_v17 = vpack.c.bf16 %v2864_v40, %v2863_v9  ;;  %v2855_v23 = vmul.f32 %v4517_v42, %v5470_v44  ;;  %v4344_v44 = vld [vmem:[%s5718_s8 + $0x1a8] sm:$0xff]  }
0x1843   :  { %v4521_v16 = vpop.eup %4520  ;;  %v2857_v32 = vmul.f32 %v4519_v51, %v5454_v2  ;;  %4220 = vmatprep.subr.bf16.mxu1 %v4344_v44  ;;  %v4345_v2 = vld [vmem:[%s5718_s8 + $0x1a0] sm:$0xff]  }
0x1844   :  { %4216 = vmatprep.mubr.msk.bf16.mxu1 %vm2690_vm5, %v2873_v17  ;;  %v2856_v30 = vmul.f32 %v4521_v16, %v5476_v29  ;;  %v4523_v6 = vpop.eup %4522  ;;  %4221 = vmatpush3.bf16.msra.mxu1 %v4344_v44 }
0x1845   :  { %v2870_v8 = vpack.c.bf16 %v2858_v61, %v2857_v32  ;;  %v2865_v47 = vmul.f32 %v4523_v6, %v5478_v54  ;;  %4222 = vmatprep.subr.bf16.mxu1 %v4345_v2 }
0x1846   :  { %v2869_v35 = vpack.c.bf16 %v2856_v30, %v2855_v23 }
0x1847   :  { %v4525_v39 = vpop.eup %4524 }
0x1848   :  { %4206 = vmatprep.mubr.msk.bf16.mxu0 %vm2690_vm5, %v2869_v35  ;;  %v2866_v43 = vmul.f32 %v4525_v39, %v5484_v41  ;;  %4223 = vmatpush3.bf16.msra.mxu1 %v4345_v2 }
0x1849   :  { %4207 = vmatmul.mubr.msk.bf16.gmra.mxu0 %vm2690_vm5, %v2870_v8 }
0x184a   :  { %v2874_v7 = vpack.c.bf16 %v2866_v43, %v2865_v47 }
0x184c   :  { %4217 = vmatmul.mubr.msk.bf16.gmra.mxu1 %vm2690_vm5, %v2874_v7 }
0x18f9   :  { %v4214_v54 = vpop.f32.mrf.mxu1 }
0x18fa   :  { %v3039_v25 = vmul.f32 %v4214_v54, %v4797_v15 }
0x18fb   :  { %v2998_v45 = vpop.f32.mrf.mxu1 }
0x18fc   :  { %v3037_v24 = vmul.f32 %v2998_v45, %v4794_v14  ;;  %v3060_v19 = vsel %vm232_vm1, %v3039_v25, 0.0 }
0x18fd   :  { %v4204_v29 = vpop.f32.mrf.mxu0  ;;  %v4215_v5 = vpop.f32.mrf.mxu1 }
0x18fe   :  { %v3031_v26 = vmul.f32 %v4204_v29, %v4797_v15  ;;  %v3040_v28 = vmul.f32 %v4215_v5, %v4797_v15  ;;  %v3059_v13 = vsel %vm232_vm1, %v3037_v24, 0.0 }
0x18ff   :  { %v2921_v41 = vpop.f32.mrf.mxu0  ;;  %v3001_v56 = vpop.f32.mrf.mxu1  ;;  %v3061_v16 = vadd.f32 %v3060_v19, %v3059_v13 }
0x1900   :  { %v3029_v52 = vmul.f32 %v2921_v41, %v4794_v14  ;;  %v3038_v36 = vmul.f32 %v3001_v56, %v4794_v14  ;;  %v3046_v4 = vsel %vm232_vm1, %v3031_v26, 0.0  ;;  %v3067_v61 = vsel %vm232_vm1, %v3040_v28, 0.0 }
0x1901   :  { %v4205_v10 = vpop.f32.mrf.mxu0 }
0x1902   :  { %v3045_v59 = vsel %vm232_vm1, %v3029_v52, 0.0  ;;  %v3032_v62 = vmul.f32 %v4205_v10, %v4797_v15  ;;  %v3066_v40 = vsel %vm232_vm1, %v3038_v36, 0.0 }
0x1903   :  { %v2924_v46 = vpop.f32.mrf.mxu0  ;;  %v3047_v22 = vadd.f32 %v3046_v4, %v3045_v59  ;;  %v3068_v8 = vadd.f32 %v3067_v61, %v3066_v40 }
0x1904   :  { %v3030_v57 = vmul.f32 %v2924_v46, %v4794_v14  ;;  %v3053_v14 = vsel %vm232_vm1, %v3032_v62, 0.0  ;;  %v3078_v46 = vrot.slane %v5254_v20, %v4886_v27  ;;  %v4568_v20 = vld [vmem:[%s5712_s2] sm:$0xff] }
0x1906   :  { %v3052_v38 = vsel %vm232_vm1, %v3030_v57, 0.0 }
0x1907   :  { %v3054_v42 = vadd.f32 %v3053_v14, %v3052_v38 }
0x1909   :  { %v4208_v53 = vpop.f32.mrf.mxu0 }
0x190a   :  { %v3035_v21 = vmul.f32 %v4208_v53, %v4811_v34 }
0x190b   :  { %v2937_v58 = vpop.f32.mrf.mxu0 }
0x190c   :  { %v3033_v0 = vmul.f32 %v2937_v58, %v4808_v33  ;;  %v4218_v1 = vpop.f32.mrf.mxu1  ;;  %v3050_v47 = vsel %vm232_vm1, %v3035_v21, 0.0 }
0x190d   :  { %v4209_v3 = vpop.f32.mrf.mxu0  ;;  %v3043_v6 = vmul.f32 %v4218_v1, %v4811_v34 }
0x190e   :  { %v3048_v50 = vsel %vm232_vm1, %v3033_v0, 0.0  ;;  %v3014_v55 = vpop.f32.mrf.mxu1  ;;  %v3036_v49 = vmul.f32 %v4209_v3, %v4811_v34 }
0x190f   :  { %v3041_v63 = vmul.f32 %v3014_v55, %v4808_v33  ;;  %v2940_v11 = vpop.f32.mrf.mxu0  ;;  %v3049_v51 = vadd.f32 %v3048_v50, %v3047_v22  ;;  %v3064_v41 = vsel %vm232_vm1, %v3043_v6, 0.0 }
0x1910   :  { %v3034_v15 = vmul.f32 %v2940_v11, %v4808_v33  ;;  %v4219_v9 = vpop.f32.mrf.mxu1  ;;  %v3057_v43 = vsel %vm232_vm1, %v3036_v49, 0.0 }
0x1911   :  { %v3062_v17 = vsel %vm232_vm1, %v3041_v63, 0.0  ;;  %v3044_v35 = vmul.f32 %v4219_v9, %v4811_v34  ;;  %v3051_v44 = vadd.f32 %v3050_v47, %v3049_v51 }
0x1912   :  { %v3055_v23 = vsel %vm232_vm1, %v3034_v15, 0.0  ;;  %v3017_v30 = vpop.f32.mrf.mxu1  ;;  %v3063_v7 = vadd.f32 %v3062_v17, %v3061_v16 }
0x1913   :  { %v3056_v32 = vadd.f32 %v3055_v23, %v3054_v42  ;;  %v3042_v39 = vmul.f32 %v3017_v30, %v4808_v33  ;;  %v3071_v45 = vsel %vm232_vm1, %v3044_v35, 0.0  ;;  %v4346_v23 = vld [vmem:[%s5719_s9 + $0x28] sm:$0xff]   ;;  %v4347_v30 = vld [vmem:[%s5719_s9 + $0x20] sm:$0xff]  }
0x1914   :  { %v3065_v5 = vadd.f32 %v3064_v41, %v3063_v7  ;;  %4228 = vmatprep.subr.bf16.mxu1 %v4346_v23 }
0x1915   :  { %v3058_v2 = vadd.f32 %v3057_v43, %v3056_v32  ;;  %v3069_v29 = vsel %vm232_vm1, %v3042_v39, 0.0 }
0x1916   :  { %v3070_v54 = vadd.f32 %v3069_v29, %v3068_v8 }
0x1917   :  { %v3073_v10 = vpack.c.bf16 %v3058_v2, %v3051_v44 }
0x1918   :  { %v3072_v34 = vadd.f32 %v3071_v45, %v3070_v54 }
0x1919   :  { %4224 = vmatprep.mubr.msk.bf16.mxu1 %vm232_vm1, %v3073_v10  ;;  %v5595_v10 = vld [vmem:[%s5720_s10 + $0x20] sm:$0x3f] }
0x191a   :  { %v3074_v33 = vpack.c.bf16 %v3072_v34, %v3065_v5  ;;  %v3205_v5 = vrot.slane %v5595_v10, %v4805_v31 }
0x191c   :  { %4225 = vmatmul.mubr.msk.bf16.vlgmr.msra.gmra.mxu1 %vm232_vm1, %v3074_v33 }
0x191d   :  { %4229 = vmatpush3.bf16.msra.mxu1 %v4346_v23 }
0x191e   :  { %4230 = vmatprep.subr.bf16.mxu1 %v4347_v30 }
0x1921   :  { %4231 = vmatpush3.bf16.msra.mxu1 %v4347_v30 }
0x19dc   :  { %v4226_v52 = vpop.f32.mrf.mxu1 }
0x19dd   :  { %v3140_v26 = vadd.f32 %v4226_v52, %v3078_v46 }
0x19de   :  { %v3131_v53 = vpop.f32.mrf.mxu1 }
0x19df   :  { %v3132_v56 = vadd.f32 %v3131_v53, %v3078_v46  ;;  %v5558_v58 = vadd.f32 %v3140_v26, %v5214_v18  ;;  %v3213_v53 = vrot.slane %v5595_v10, %v4886_v27  ;;  %v4348_v27 = vld [vmem:[%s5718_s8 + $0x1e8] sm:$0xff]  }
0x19e0   :  { %v4227_v57 = vpop.f32.mrf.mxu1  ;;  %4236 = vmatprep.subr.bf16.mxu0 %v4348_v27 }
0x19e1   :  { %v5555_v25 = vadd.f32 %v3132_v56, %v5210_v12  ;;  %v3143_v59 = vadd.f32 %v4227_v57, %v3078_v46  ;;  %v4569_v12 = vld [vmem:[%s5712_s2 + $0x8] sm:$0xff]  ;;  %v3156_v3 = vsel %vm232_vm1, %v5558_v58, 0.0  ;;  %4237 = vmatpush3.bf16.msra.mxu0 %v4348_v27 }
0x19e2   :  { %v3134_v24 = vpop.f32.mrf.mxu1 }
0x19e3   :  { %v3135_v62 = vadd.f32 %v3134_v24, %v3078_v46  ;;  %v3150_v0 = vsel %vm232_vm1, %v5555_v25, 0.0  ;;  %v5570_v36 = vadd.f32 %v4569_v12, %v3143_v59 }
0x19e4   :  { %3151 = vadd.xlane.f32.xlu0 %v3150_v0 }
0x19e5   :  { %v5565_v1 = vadd.f32 %v4568_v20, %v3135_v62  ;;  %v3159_v4 = vsel %vm232_vm1, %v5570_v36, 0.0 }
0x19e7   :  { %v3153_v18 = vsel %vm232_vm1, %v5565_v1, 0.0 }
0x19e8   :  { %3154 = vadd.xlane.f32.xlu1 %v3153_v18  ;;  %3157 = vadd.xlane.f32.xlu0 %v3156_v3 }
0x19ec   :  { %3160 = vadd.xlane.f32.xlu1 %v3159_v4  ;;  %v4349_v4 = vld [vmem:[%s5718_s8 + $0x1e0] sm:$0xff]  }
0x19ed   :  { %4238 = vmatprep.subr.bf16.mxu0 %v4349_v4 }
0x19ee   :  { %4239 = vmatpush3.bf16.msra.mxu0 %v4349_v4 }
0x1a6d   :  { %v3152_v28 = vpop.xlane.xlu0 %3151 }
0x1a6e   :  { %v3162_v38 = vmul.f32 0.03125, %v3152_v28  ;;  %v4350_v28 = vld [vmem:[%s5718_s8 + $0x1d8] sm:$0xff]  }
0x1a6f   :  { %4240 = vmatprep.subr.bf16.mxu0 %v4350_v28 }
0x1a70   :  { %v3166_v50 = vsub.f32 %v5555_v25, %v3162_v38  ;;  %4241 = vmatpush3.bf16.msra.mxu0 %v4350_v28  ;;  %v4351_v38 = vld [vmem:[%s5718_s8 + $0x1d0] sm:$0xff]   ;;  %v4571_v28 = vld [vmem:[%s5720_s10 + $0x28] sm:$0x1f] }
0x1a71   :  { %v3155_v55 = vpop.xlane.xlu1 %3154  ;;  %v3158_v19 = vpop.xlane.xlu0 %3157  ;;  %4242 = vmatprep.subr.bf16.mxu0 %v4351_v38 }
0x1a72   :  { %v3163_v13 = vmul.f32 0.03125, %v3155_v55  ;;  %v3164_v22 = vmul.f32 0.03125, %v3158_v19  ;;  %v3170_v63 = vmul.f32 %v3166_v50, %v3166_v50  ;;  %v4353_v55 = vld [vmem:[%s5718_s8 + $0x1c0] sm:$0xff]   ;;  %v4354_v19 = vld [vmem:[%s5718_s8 + $0x1b8] sm:$0xff]  }
0x1a74   :  { %v3167_v11 = vsub.f32 %v5565_v1, %v3163_v13  ;;  %v3168_v14 = vsub.f32 %v5558_v58, %v3164_v22  ;;  %v3174_v21 = vsel %vm232_vm1, %v3170_v63, 0.0  ;;  %4243 = vmatpush3.bf16.msra.mxu0 %v4351_v38  ;;  %v4355_v13 = vld [vmem:[%s5718_s8 + $0x1b0] sm:$0xff]   ;;  %v3433_v38 = vrot.slane %v4571_v28, %v4954_v60 }
0x1a75   :  { %v3161_v49 = vpop.xlane.xlu1 %3160  ;;  %3175 = vadd.xlane.f32.xlu0 %v3174_v21  ;;  %v3834_v22 = vld [vmem:[%s5721_s11 + $0x10] ss:$0 sm:$0xff]  ;;  %s4576_s11 = scalar_lea.vmem %s3713_s0, 32 }
0x1a76   :  { %v3165_v15 = vmul.f32 0.03125, %v3161_v49  ;;  %v3171_v9 = vmul.f32 %v3167_v11, %v3167_v11  ;;  %v3172_v40 = vmul.f32 %v3168_v14, %v3168_v14 }
0x1a78   :  { %v3169_v42 = vsub.f32 %v5570_v36, %v3165_v15  ;;  %v3177_v51 = vsel %vm232_vm1, %v3171_v9, 0.0  ;;  %v3180_v17 = vsel %vm232_vm1, %v3172_v40, 0.0 }
0x1a79   :  { %3178 = vadd.xlane.f32.xlu1 %v3177_v51  ;;  %3181 = vadd.xlane.f32.xlu0 %v3180_v17 }
0x1a7a   :  { %v3173_v16 = vmul.f32 %v3169_v42, %v3169_v42 }
0x1a7c   :  { %v3183_v61 = vsel %vm232_vm1, %v3173_v16, 0.0 }
0x1a7d   :  { %3184 = vadd.xlane.f32.xlu1 %v3183_v61 }
0x1afe   :  { %v3176_v6 = vpop.xlane.xlu0 %3175 }
0x1aff   :  { %v3186_v32 = vmul.f32 0.03125, %v3176_v6 }
0x1b01   :  { %v3190_v35 = vadd.f32 1e-05, %v3186_v32 }
0x1b02   :  { %v3179_v39 = vpop.xlane.xlu1 %3178  ;;  %v3182_v8 = vpop.xlane.xlu0 %3181 }
0x1b03   :  { %4526 = vrsqrt.f32 %v3190_v35  ;;  %v3187_v47 = vmul.f32 0.03125, %v3179_v39  ;;  %v3188_v43 = vmul.f32 0.03125, %v3182_v8 }
0x1b05   :  { %v3191_v7 = vadd.f32 1e-05, %v3187_v47  ;;  %v3192_v44 = vadd.f32 1e-05, %v3188_v43 }
0x1b06   :  { %v3185_v2 = vpop.xlane.xlu1 %3184 }
0x1b07   :  { %4528 = vrsqrt.f32 %v3191_v7  ;;  %v3189_v29 = vmul.f32 0.03125, %v3185_v2 }
0x1b08   :  { %4530 = vrsqrt.f32 %v3192_v44 }
0x1b09   :  { %v3193_v54 = vadd.f32 1e-05, %v3189_v29 }
0x1b0b   :  { %4532 = vrsqrt.f32 %v3193_v54 }
0x1b10   :  { %v4527_v41 = vpop.eup %4526 }
0x1b11   :  { %v3198_v45 = vmul.f32 %v4527_v41, %v3166_v50  ;;  %v4352_v50 = vld [vmem:[%s5718_s8 + $0x1c8] sm:$0xff]   ;;  %s4572_s8 = scalar_lea.vmem %s3713_s0, 16 }
0x1b12   :  { %4244 = vmatprep.subr.bf16.mxu0 %v4352_v50  ;;  %p4573_p0 = scmp.ne.s32.totalorder %s3713_s0, %s4572_s8  ;;  %p4578_p2 = scmp.lt.s32.totalorder %s4576_s11, %s4572_s8 }
0x1b13   :  { %v3206_v52 = vmul.f32 %v3205_v5, %v3198_v45  ;;  %4245 = vmatpush3.bf16.msra.mxu0 %v4352_v50 }
0x1b14   :  { %v4529_v34 = vpop.eup %4528  ;;  %4246 = vmatprep.subr.bf16.mxu0 %v4353_v55  ;;  %p4579_p3 = por %p4578_p2, %p4577_p1 }
0x1b15   :  { %v4531_v33 = vpop.eup %4530  ;;  %v3199_v46 = vmul.f32 %v4529_v34, %v3167_v11  ;;  %v3214_v59 = vadd.f32 %v3213_v53, %v3206_v52 }
0x1b16   :  { %v3200_v26 = vmul.f32 %v4531_v33, %v3168_v14  ;;  %p4580_p4 = pnand %p4579_p3, %p4573_p0 }
0x1b17   :  { %v3207_v56 = vmul.f32 %v3205_v5, %v3199_v46  ;;  %4247 = vmatpush3.bf16.msra.mxu0 %v4353_v55 }
0x1b18   :  { %v4533_v57 = vpop.eup %4532  ;;  %v3208_v0 = vmul.f32 %v3205_v5, %v3200_v26  ;;  %4248 = vmatprep.subr.bf16.mxu0 %v4354_v19 }
0x1b19   :  { %v3201_v24 = vmul.f32 %v4533_v57, %v3169_v42  ;;  %v3215_v62 = vadd.f32 %v3213_v53, %v3207_v56 }
0x1b1a   :  { %v3216_v18 = vadd.f32 %v3213_v53, %v3208_v0 }
0x1b1b   :  { %v3218_v20 = vpack.c.bf16 %v3215_v62, %v3214_v59  ;;  %v3209_v12 = vmul.f32 %v3205_v5, %v3201_v24  ;;  %4249 = vmatpush3.bf16.msra.mxu0 %v4354_v19 }
0x1b1c   :  { %4250 = vmatprep.subr.bf16.mxu0 %v4355_v13 }
0x1b1d   :  { %4232 = vmatprep.mubr.msk.bf16.mxu1 %vm232_vm1, %v3218_v20  ;;  %v3217_v31 = vadd.f32 %v3213_v53, %v3209_v12 }
0x1b1f   :  { %v3219_v3 = vpack.c.bf16 %v3217_v31, %v3216_v18  ;;  %4251 = vmatpush3.bf16.msra.mxu0 %v4355_v13 }
0x1b21   :  { %4233 = vmatmul.mubr.msk.bf16.vlgmr.msra.gmra.mxu1 %vm232_vm1, %v3219_v3 }
0x1be1   :  { %v4234_v63 = vpop.f32.mrf.mxu1 }
0x1be2   :  { %v3285_v11 = vadd.f32 %v4234_v63, %v3834_v22 }
0x1be3   :  { %v3276_v14 = vpop.f32.mrf.mxu1 }
0x1be4   :  { %v3293_v21 = vmul.f32 %v3285_v11, %v3285_v11  ;;  %v3277_v49 = vadd.f32 %v3834_v22, %v3276_v14 }
0x1be5   :  { %v4235_v15 = vpop.f32.mrf.mxu1 }
0x1be6   :  { %v3297_v9 = vmul.f32 %v3293_v21, %v3285_v11  ;;  %v3291_v40 = vmul.f32 %v3277_v49, %v3277_v49  ;;  %v3288_v42 = vadd.f32 %v4235_v15, %v3834_v22 }
0x1be7   :  { %v3279_v51 = vpop.f32.mrf.mxu1 }
0x1be8   :  { %v3301_v17 = vmul.f32 0.044715, %v3297_v9  ;;  %v3295_v16 = vmul.f32 %v3291_v40, %v3277_v49  ;;  %v3294_v61 = vmul.f32 %v3288_v42, %v3288_v42  ;;  %v3280_v23 = vadd.f32 %v3834_v22, %v3279_v51 }
0x1bea   :  { %v3305_v30 = vadd.f32 %v3301_v17, %v3285_v11  ;;  %v3299_v6 = vmul.f32 0.044715, %v3295_v16  ;;  %v3298_v32 = vmul.f32 %v3294_v61, %v3288_v42  ;;  %v3292_v35 = vmul.f32 %v3280_v23, %v3280_v23 }
0x1bec   :  { %v3309_v39 = vmul.f32 0.7978846, %v3305_v30  ;;  %v3303_v8 = vadd.f32 %v3299_v6, %v3277_v49  ;;  %v3302_v47 = vmul.f32 0.044715, %v3298_v32  ;;  %v3296_v43 = vmul.f32 %v3292_v35, %v3280_v23 }
0x1bee   :  { %v3307_v7 = vmul.f32 0.7978846, %v3303_v8  ;;  %v3306_v44 = vadd.f32 %v3302_v47, %v3288_v42  ;;  %v3300_v2 = vmul.f32 0.044715, %v3296_v43  ;;  %4534 = vtanh.f32 %v3309_v39 }
0x1bf0   :  { %4536 = vtanh.f32 %v3307_v7  ;;  %v3310_v29 = vmul.f32 0.7978846, %v3306_v44  ;;  %v3304_v54 = vadd.f32 %v3300_v2, %v3280_v23  ;;  %v4356_v2 = vld [vmem:[%s5719_s9 + $0x38] sm:$0xff]  }
0x1bf1   :  { %4256 = vmatprep.subr.bf16.mxu1 %v4356_v2 }
0x1bf2   :  { %4538 = vtanh.f32 %v3310_v29  ;;  %v3308_v41 = vmul.f32 0.7978846, %v3304_v54  ;;  %v4357_v29 = vld [vmem:[%s5719_s9 + $0x30] sm:$0xff]   ;;  %4257 = vmatpush3.bf16.msra.mxu1 %v4356_v2 }
0x1bf3   :  { %4258 = vmatprep.subr.bf16.mxu1 %v4357_v29 }
0x1bf4   :  { %4540 = vtanh.f32 %v3308_v41 }
0x1bf6   :  { %4259 = vmatpush3.bf16.msra.mxu1 %v4357_v29 }
0x1bfb   :  { %v4535_v45 = vpop.eup %4534 }
0x1bfc   :  { %v3317_v46 = vadd.f32 1.0, %v4535_v45 }
0x1bfd   :  { %v4537_v5 = vpop.eup %4536 }
0x1bfe   :  { %v3315_v34 = vadd.f32 1.0, %v4537_v5  ;;  %v3321_v24 = vmul.f32 0.5, %v3317_v46 }
0x1bff   :  { %v4539_v33 = vpop.eup %4538 }
0x1c00   :  { %v3318_v52 = vadd.f32 1.0, %v4539_v33  ;;  %v3319_v57 = vmul.f32 0.5, %v3315_v34  ;;  %v3325_v12 = vmul.f32 %v3321_v24, %v3285_v11 }
0x1c01   :  { %v4541_v53 = vpop.eup %4540 }
0x1c02   :  { %v3322_v26 = vmul.f32 0.5, %v3318_v52  ;;  %v3316_v56 = vadd.f32 1.0, %v4541_v53  ;;  %v3323_v0 = vmul.f32 %v3319_v57, %v3277_v49 }
0x1c04   :  { %v3320_v59 = vmul.f32 0.5, %v3316_v56  ;;  %v3326_v62 = vmul.f32 %v3322_v26, %v3288_v42 }
0x1c06   :  { %v3324_v20 = vmul.f32 %v3320_v59, %v3280_v23  ;;  %v3328_v31 = vpack.c.bf16 %v3326_v62, %v3325_v12  ;;  %v3493_v62 = vrot.slane %v5595_v10, %v4954_v60 }
0x1c08   :  { %v3327_v18 = vpack.c.bf16 %v3324_v20, %v3323_v0 }
0x1c0a   :  { %4252 = vmatprep.mubr.bf16.mxu0 %v3327_v18  ;;  %v3501_v18 = vrot.slane %v5595_v10, %v4979_v37 }
0x1c0b   :  { %4253 = vmatmul.mubr.bf16.vlgmr.msra.gmra.mxu0 %v3328_v31 }
0x1ccb   :  { %v4254_v3 = vpop.f32.mrf.mxu0 }
0x1ccc   :  { %v3428_v4 = vadd.f32 %v4254_v3, %v5558_v58 }
0x1ccd   :  { %v3411_v27 = vpop.f32.mrf.mxu0 }
0x1cce   :  { %v3426_v50 = vadd.f32 %v3411_v27, %v5555_v25  ;;  %v3436_v22 = vadd.f32 %v3433_v38, %v3428_v4 }
0x1ccf   :  { %v4255_v55 = vpop.f32.mrf.mxu0 }
0x1cd0   :  { %v3434_v19 = vadd.f32 %v3433_v38, %v3426_v50  ;;  %v3429_v63 = vadd.f32 %v4255_v55, %v5570_v36  ;;  %v3444_v49 = vsel %vm232_vm1, %v3436_v22, 0.0 }
0x1cd1   :  { %v3414_v13 = vpop.f32.mrf.mxu0 }
0x1cd2   :  { %v3427_v11 = vadd.f32 %v3414_v13, %v5565_v1  ;;  %v3438_v14 = vsel %vm232_vm1, %v3434_v19, 0.0  ;;  %v3437_v21 = vadd.f32 %v3433_v38, %v3429_v63 }
0x1cd3   :  { %3439 = vadd.xlane.f32.xlu0 %v3438_v14 }
0x1cd4   :  { %v3435_v58 = vadd.f32 %v3433_v38, %v3427_v11  ;;  %v3447_v25 = vsel %vm232_vm1, %v3437_v21, 0.0 }
0x1cd6   :  { %v3441_v15 = vsel %vm232_vm1, %v3435_v58, 0.0 }
0x1cd7   :  { %3445 = vadd.xlane.f32.xlu0 %v3444_v49  ;;  %3442 = vadd.xlane.f32.xlu1 %v3441_v15  ;;  %v3623_v49 = vld [vmem:[%s5714_s4 + $0x10] sm:$0xff]  ;;  %v3624_v15 = vld [vmem:[%s5714_s4 + $0x18] sm:$0xff] }
0x1cdb   :  { %3448 = vadd.xlane.f32.xlu1 %v3447_v25 }
0x1d5c   :  { %v3440_v9 = vpop.xlane.xlu0 %3439 }
0x1d5d   :  { %v3450_v40 = vmul.f32 0.03125, %v3440_v9 }
0x1d5f   :  { %v3454_v42 = vsub.f32 %v3434_v19, %v3450_v40 }
0x1d60   :  { %v3446_v36 = vpop.xlane.xlu0 %3445  ;;  %v3443_v51 = vpop.xlane.xlu1 %3442 }
0x1d61   :  { %v3452_v1 = vmul.f32 0.03125, %v3446_v36  ;;  %v3451_v17 = vmul.f32 0.03125, %v3443_v51  ;;  %v3458_v16 = vmul.f32 %v3454_v42, %v3454_v42 }
0x1d63   :  { %v3456_v61 = vsub.f32 %v3436_v22, %v3452_v1  ;;  %v3455_v23 = vsub.f32 %v3435_v58, %v3451_v17  ;;  %v3462_v30 = vsel %vm232_vm1, %v3458_v16, 0.0  ;;  %v3622_v58 = vld [vmem:[%s5714_s4 + $0x8] sm:$0xff] }
0x1d64   :  { %3463 = vadd.xlane.f32.xlu0 %v3462_v30  ;;  %v3449_v6 = vpop.xlane.xlu1 %3448 }
0x1d65   :  { %v3453_v32 = vmul.f32 0.03125, %v3449_v6  ;;  %v3460_v35 = vmul.f32 %v3456_v61, %v3456_v61  ;;  %v3459_v39 = vmul.f32 %v3455_v23, %v3455_v23 }
0x1d67   :  { %v3457_v8 = vsub.f32 %v3437_v21, %v3453_v32  ;;  %v3468_v47 = vsel %vm232_vm1, %v3460_v35, 0.0  ;;  %v3465_v43 = vsel %vm232_vm1, %v3459_v39, 0.0  ;;  %v3621_v21 = vld [vmem:[%s5714_s4] sm:$0xff] }
0x1d68   :  { %3469 = vadd.xlane.f32.xlu0 %v3468_v47  ;;  %3466 = vadd.xlane.f32.xlu1 %v3465_v43 }
0x1d69   :  { %v3461_v7 = vmul.f32 %v3457_v8, %v3457_v8 }
0x1d6b   :  { %v3471_v44 = vsel %vm232_vm1, %v3461_v7, 0.0 }
0x1d6c   :  { %3472 = vadd.xlane.f32.xlu1 %v3471_v44 }
0x1ded   :  { %v3464_v54 = vpop.xlane.xlu0 %3463 }
0x1dee   :  { %v3474_v41 = vmul.f32 0.03125, %v3464_v54 }
0x1df0   :  { %v3478_v45 = vadd.f32 1e-05, %v3474_v41 }
0x1df1   :  { %v3470_v5 = vpop.xlane.xlu0 %3469  ;;  %v3467_v34 = vpop.xlane.xlu1 %3466 }
0x1df2   :  { %4542 = vrsqrt.f32 %v3478_v45  ;;  %v3476_v33 = vmul.f32 0.03125, %v3470_v5  ;;  %v3475_v46 = vmul.f32 0.03125, %v3467_v34  ;;  %v3653_v45 = vld [vmem:[%s5715_s5] sm:$0xff]  ;;  %v3654_v5 = vld [vmem:[%s5715_s5 + $0x8] sm:$0xff] }
0x1df4   :  { %v3480_v52 = vadd.f32 1e-05, %v3476_v33  ;;  %v3479_v53 = vadd.f32 1e-05, %v3475_v46  ;;  %v3682_v33 = vsel %vm3665_vm10, %v3653_v45, 0.0  ;;  %v3683_v46 = vsel %vm3665_vm10, %v3654_v5, 0.0 }
0x1df5   :  { %v3473_v26 = vpop.xlane.xlu1 %3472 }
0x1df6   :  { %4544 = vrsqrt.f32 %v3480_v52  ;;  %v3477_v56 = vmul.f32 0.03125, %v3473_v26  ;;  %v3684_v52 = vadd.f32 %v3683_v46, %v3682_v33 }
0x1df7   :  { %4546 = vrsqrt.f32 %v3479_v53  ;;  %v3656_v53 = vld [vmem:[%s5715_s5 + $0x18] sm:$0xff] }
0x1df8   :  { %v3481_v57 = vadd.f32 1e-05, %v3477_v56  ;;  %v3687_v56 = vsel %vm3665_vm10, %v3656_v53, 0.0 }
0x1dfa   :  { %4548 = vrsqrt.f32 %v3481_v57 }
0x1dff   :  { %v4543_v24 = vpop.eup %4542 }
0x1e00   :  { %v3486_v59 = vmul.f32 %v4543_v24, %v3454_v42 }
0x1e02   :  { %v3494_v3 = vmul.f32 %v3493_v62, %v3486_v59 }
0x1e03   :  { %v4545_v0 = vpop.eup %4544 }
0x1e04   :  { %v4547_v20 = vpop.eup %4546  ;;  %v3488_v12 = vmul.f32 %v4545_v0, %v3456_v61  ;;  %v3502_v50 = vadd.f32 %v3501_v18, %v3494_v3 }
0x1e05   :  { %v3487_v31 = vmul.f32 %v4547_v20, %v3455_v23 }
0x1e06   :  { %v3496_v38 = vmul.f32 %v3493_v62, %v3488_v12 }
0x1e07   :  { %v4549_v27 = vpop.eup %4548  ;;  %v3495_v4 = vmul.f32 %v3493_v62, %v3487_v31 }
0x1e08   :  { %v3489_v28 = vmul.f32 %v4549_v27, %v3457_v8  ;;  %v3504_v22 = vadd.f32 %v3501_v18, %v3496_v38  ;;  %v3620_v8 = vand.u32 127, %v260_v48  ;;  %v3655_v48 = vld [vmem:[%s5715_s5 + $0x10] sm:$0xff] }
0x1e09   :  { %v3503_v55 = vadd.f32 %v3501_v18, %v3495_v4  ;;  %v3685_v34 = vsel %vm3665_vm10, %v3655_v48, 0.0 }
0x1e0a   :  { %v3497_v19 = vmul.f32 %v3493_v62, %v3489_v28  ;;  %v3686_v26 = vadd.f32 %v3685_v34, %v3684_v52 }
0x1e0b   :  { %v3510_v13 = vpack.c.bf16 %v3503_v55, %v3502_v50 }
0x1e0c   :  { %v3505_v63 = vadd.f32 %v3501_v18, %v3497_v19  ;;  %v3688_v57 = vadd.f32 %v3687_v56, %v3686_v26 }
0x1e0d   :  { %4260 = vmatprep.mubr.msk.bf16.mxu1 %vm232_vm1, %v3510_v13 }
0x1e0e   :  { %v3511_v60 = vpack.c.bf16 %v3505_v63, %v3504_v22 }
0x1e10   :  { %4261 = vmatmul.mubr.msk.bf16.vlgmr.msra.gmra.mxu1 %vm232_vm1, %v3511_v60 }
0x1ed0   :  { %v4262_v11 = vpop.f32.mrf.mxu1 }
0x1ed2   :  { %v3564_v14 = vpop.f32.mrf.mxu1 }
0x1ed3   :  { %3579 = vmax.xlane.f32.xlu0 %v3564_v14 }
0x1ed4   :  { %v4263_v37 = vpop.f32.mrf.mxu1 }
0x1ed6   :  { %v3567_v10 = vpop.f32.mrf.mxu1 }
0x1ed7   :  { %3583 = vmax.xlane.f32.xlu0 %v4262_v11  ;;  %3581 = vmax.xlane.f32.xlu1 %v3567_v10 }
0x1edb   :  { %3585 = vmax.xlane.f32.xlu1 %v4263_v37 }
0x1eec   :  { %3629 = vperm.xlu1 %4287, %v3622_v58  }
0x1eed   :  { %3626 = vperm.xlu0 %4286, %v3621_v21  }
0x1ef0   :  { %3632 = vperm.xlu1 %4287, %v3623_v49  }
0x1ef4   :  { %3635 = vperm.xlu1 %4287, %v3624_v15  }
0x1f5c   :  { %v5670_v25 = vpop.xlane.xlu0 %3579 }
0x1f5d   :  { %v3587_v9 = vsub.f32 %v3564_v14, %v5670_v25 }
0x1f5f   :  { %v3591_v40 = vmul.f32 1.442695, %v3587_v9 }
0x1f60   :  { %v5673_v42 = vpop.xlane.xlu0 %3583  ;;  %v5675_v36 = vpop.xlane.xlu1 %3581 }
0x1f61   :  { %4550 = vpow2.f32 %v3591_v40  ;;  %v3589_v51 = vsub.f32 %v4262_v11, %v5673_v42  ;;  %v3588_v1 = vsub.f32 %v3567_v10, %v5675_v36 }
0x1f63   :  { %v3595_v17 = vmul.f32 1.442695, %v3589_v51  ;;  %v3593_v16 = vmul.f32 1.442695, %v3588_v1 }
0x1f64   :  { %v5679_v61 = vpop.xlane.xlu1 %3585 }
0x1f65   :  { %4552 = vpow2.f32 %v3595_v17  ;;  %v3590_v23 = vsub.f32 %v4263_v37, %v5679_v61 }
0x1f66   :  { %4554 = vpow2.f32 %v3593_v16 }
0x1f67   :  { %v3597_v30 = vmul.f32 1.442695, %v3590_v23 }
0x1f68   :  { %v3630_v6 = vpop.permute.xlu1 %3629  ;;  %v3627_v43 = vpop.permute.xlu0 %3626 }
0x1f69   :  { %4556 = vpow2.f32 %v3597_v30  ;;  %vm3637_vm7 = vcmp.eq.s32.totalorder %v3620_v8, %v3627_v43  ;;  %vm3638_vm8 = vcmp.eq.s32.totalorder %v3620_v8, %v3630_v6 }
0x1f6a   :  { %v3641_v2 = vsel %vm3637_vm7, %v3564_v14, 0.0  ;;  %v3642_v54 = vsel %vm3638_vm8, %v3567_v10, 0.0 }
0x1f6c   :  { %v3633_v35 = vpop.permute.xlu1 %3632 }
0x1f6d   :  { %vm3639_vm6 = vcmp.eq.s32.totalorder %v3620_v8, %v3633_v35 }
0x1f6e   :  { %v4551_v32 = vpop.eup %4550  ;;  %v3643_v44 = vsel %vm3639_vm6, %v4262_v11, 0.0 }
0x1f6f   :  { %3599 = vadd.xlane.f32.xlu1 %v4551_v32 }
0x1f70   :  { %v3636_v29 = vpop.permute.xlu1 %3635 }
0x1f71   :  { %vm3640_vm9 = vcmp.eq.s32.totalorder %v3620_v8, %v3636_v29 }
0x1f72   :  { %v4553_v39 = vpop.eup %4552  ;;  %v3644_v41 = vsel %vm3640_vm9, %v4263_v37, 0.0 }
0x1f73   :  { %v4555_v47 = vpop.eup %4554  ;;  %3603 = vadd.xlane.f32.xlu1 %v4553_v39 }
0x1f74   :  { %3601 = vadd.xlane.f32.xlu0 %v4555_v47 }
0x1f76   :  { %v4557_v7 = vpop.eup %4556 }
0x1f77   :  { %3605 = vadd.xlane.f32.xlu1 %v4557_v7 }
0x1f78   :  { %3649 = vadd.xlane.f32.xlu0 %v3643_v44 }
0x1f7b   :  { %3645 = vadd.xlane.f32.xlu1 %v3641_v2 }
0x1f7f   :  { %3647 = vadd.xlane.f32.xlu1 %v3642_v54 }
0x1f83   :  { %3651 = vadd.xlane.f32.xlu1 %v3644_v41 }
0x1f87   :  { %3689 = vadd.xlane.f32.xlu1 %v3688_v57 }
0x1ff8   :  { %v3600_v24 = vpop.xlane.xlu1 %3599 }
0x1ff9   :  { %4558 = vlog2.f32 %v3600_v24 }
0x1ffc   :  { %v3604_v59 = vpop.xlane.xlu1 %3603 }
0x1ffd   :  { %v3602_v62 = vpop.xlane.xlu0 %3601  ;;  %4560 = vlog2.f32 %v3604_v59 }
0x1ffe   :  { %4562 = vlog2.f32 %v3602_v62 }
0x2000   :  { %v3606_v0 = vpop.xlane.xlu1 %3605 }
0x2001   :  { %4564 = vlog2.f32 %v3606_v0  ;;  %v3650_v13 = vpop.xlane.xlu0 %3649 }
0x2004   :  { %v3646_v12 = vpop.xlane.xlu1 %3645 }
0x2006   :  { %v4559_v20 = vpop.eup %4558 }
0x2007   :  { %v3608_v18 = vmul.f32 0.6931472, %v4559_v20 }
0x2008   :  { %v3648_v50 = vpop.xlane.xlu1 %3647 }
0x2009   :  { %v3615_v31 = vadd.f32 %v3608_v18, %v5670_v25 }
0x200a   :  { %v4561_v3 = vpop.eup %4560 }
0x200b   :  { %v4563_v27 = vpop.eup %4562  ;;  %v3612_v4 = vmul.f32 0.6931472, %v4561_v3  ;;  %v3657_v38 = vsub.f32 %v3615_v31, %v3646_v12 }
0x200c   :  { %v3610_v28 = vmul.f32 0.6931472, %v4563_v27  ;;  %v3652_v21 = vpop.xlane.xlu1 %3651 }
0x200d   :  { %v3617_v55 = vadd.f32 %v3612_v4, %v5673_v42  ;;  %v3661_v11 = vmul.f32 %v3657_v38, %v3653_v45 }
0x200e   :  { %v4565_v19 = vpop.eup %4564  ;;  %v3616_v22 = vadd.f32 %v3610_v28, %v5675_v36 }
0x200f   :  { %v3659_v63 = vsub.f32 %v3617_v55, %v3650_v13  ;;  %v3614_v60 = vmul.f32 0.6931472, %v4565_v19  ;;  %v3666_v15 = vsel %vm3665_vm10, %v3661_v11, 0.0 }
0x2010   :  { %v3658_v14 = vsub.f32 %v3616_v22, %v3648_v50  ;;  %v3690_v17 = vpop.xlane.xlu1 %3689 }
0x2011   :  { %v3618_v37 = vadd.f32 %v3614_v60, %v5679_v61  ;;  %v3663_v10 = vmul.f32 %v3659_v63, %v3655_v48  ;;  %v3691_v16 = vrot.slane %v3690_v17, 4 }
0x2012   :  { %v3662_v58 = vmul.f32 %v3658_v14, %v3654_v5 }
0x2013   :  { %v3660_v49 = vsub.f32 %v3618_v37, %v3652_v21  ;;  %v3669_v42 = vsel %vm3665_vm10, %v3663_v10, 0.0  ;;  %v3692_v61 = vadd.f32 %v3691_v16, %v3690_v17 }
0x2014   :  { %v3667_v25 = vsel %vm3665_vm10, %v3662_v58, 0.0 }
0x2015   :  { %v3668_v9 = vadd.f32 %v3667_v25, %v3666_v15  ;;  %v3664_v40 = vmul.f32 %v3660_v49, %v3656_v53  ;;  %v3693_v23 = vrot.slane %v3692_v61, 2 }
0x2017   :  { %v3671_v36 = vsel %vm3665_vm10, %v3664_v40, 0.0  ;;  %v3670_v51 = vadd.f32 %v3669_v42, %v3668_v9  ;;  %v3694_v35 = vadd.f32 %v3693_v23, %v3692_v61 }
0x2019   :  { %v3672_v1 = vadd.f32 %v3671_v36, %v3670_v51  ;;  %v3695_v47 = vrot.slane %v3694_v35, 1 }
0x201b   :  { %3673 = vadd.xlane.f32.xlu0 %v3672_v1  ;;  %v3696_v44 = vadd.f32 %v3695_v47, %v3694_v35 }
0x20a4   :  { %v3674_v30 = vpop.xlane.xlu0 %3673 }
0x20a5   :  { %v3675_v6 = vrot.slane %v3674_v30, 4 }
0x20a7   :  { %v3676_v32 = vadd.f32 %v3675_v6, %v3674_v30 }
0x20a9   :  { %v3677_v39 = vrot.slane %v3676_v32, 2 }
0x20ab   :  { %v3678_v8 = vadd.f32 %v3677_v39, %v3676_v32 }
0x20ad   :  { %v3679_v43 = vrot.slane %v3678_v8, 1 }
0x20af   :  { %v3680_v7 = vadd.f32 %v3679_v43, %v3678_v8 }
0x20b1   :  { %4274 = vpush %v3680_v7 }
0x20b2   :  { %4276 = vpush %v3696_v44 }
0x20e2   :  { %s4275_s5 = spop %4274 }
0x20e3   :  { %s4277_s18 = spop %4276 }
0x20e4   :  { %s3698_s19 = smax.f32 %s4598_s6, %s4277_s18 }
0x20e5   :  { %v3699_v2 = vstv %s3698_s19 }
0x20e6   :  { %4566 = vrcp.f32 %v3699_v2 }
0x20f3   :  { %v4567_v29 = vpop.eup %4566 }
0x20f4   :  { %4278 = vpush %v4567_v29 }
0x2125   :  { %s4279_s7 = spop %4278 }
0x2126   :  { %s3702_s21 = smul.f32 %s4279_s7, %s4275_s5 }
0x2128   :  { %v3703_v54 = vstv %s3702_s21 }
0x2129   :  { %3705 = vst.msk [vmem:[#allocation2] sm:$0x1] %vm3704_vm11, %v3703_v54 }
0x212a   :  { %4583 = shalt.err (!%p4580_p4)
}
0x212b   :  { %3715 = dma.vmem_to_hbm [thread:$0]  %s3713_s0, 16, %s5722_s12, [#allocation3]  }
0x212c   :  { %4592 = dma.done.wait [#allocation3], 16  }
0x212d   :  { %4593 = vsyncadd [#allocation3], 4294967280 }
0x212e   :  { %3719 = vsyncpa [#allocation3], 1 }

</bundles_post_ra>
